<compile_context>
chip_gen: v5e
topology: v5e:2x2
jax: 0.10.0
libtpu: 0.0.40
codegen_flags: <defaults>
</compile_context>

<pallas_src>
import functools

import jax
import jax.numpy as jnp
from jax.experimental import pallas as pl
from jax.experimental.pallas import tpu as pltpu


# ----------------------------------------------------------------------------
# Fused LocalMHA kernel.
#   x_ref:    (T, N, C)   input (t, batch, c)
#   wq_ref:   (C, C)      q weight (pre-transposed, y = x @ W)
#   wkv_ref:  (C, 2C)     kv weight (first C cols -> k, last C cols -> v)
#   wp_ref:   (C, C)      output projection weight
#   bp_ref:   (1, C)      output projection bias
#   mm_ref:   (N, T)      mappingmask (batch, t)
#   out_ref:  (T*N, C)    attention output, flat (row = t*N + n)
#   halt_ref: (N, T)      halting score (batch, t)
#   ctx_sc:   (T*N, C)    VMEM scratch for per-head contexts
# ----------------------------------------------------------------------------
def _local_mha_kernel(x_ref, wq_ref, wkv_ref, wp_ref, bp_ref, mm_ref,
                      out_ref, halt_ref, ctx_sc, *, num_heads, scale):
    T, N, C = x_ref.shape
    hd = C // num_heads

    # Fold t into the matmul M dimension: (T, N, C) -> (T*N, C) = (128, C).
    x2 = x_ref[...].reshape(T * N, C).astype(jnp.float32)
    q2 = jnp.dot(x2, wq_ref[...], preferred_element_type=jnp.float32)    # (T*N, C)
    kv2 = jnp.dot(x2, wkv_ref[...], preferred_element_type=jnp.float32)  # (T*N, 2C)

    q3 = q2.reshape(T, N, C)
    kv3 = kv2.reshape(T, N, 2 * C)

    # Per-t column sums of the head-averaged attention (all the halting head needs).
    col_acc = jnp.zeros((T, N), jnp.float32)

    # Static head loop (num_heads is small); scores/softmax/context are batched
    # over T with single-batch-dim einsums.  Contexts land in ctx_sc at their
    # lane offsets so the output projection below is a single K=C matmul.
    for h in range(num_heads):
        lo = h * hd
        qh = q3[:, :, lo:lo + hd]               # (T, N, hd)
        kh = kv3[:, :, lo:lo + hd]              # k head h (packed kv lanes)
        vh = kv3[:, :, C + lo:C + lo + hd]      # v head h

        logits = jnp.einsum('tnd,tmd->tnm', qh, kh,
                            preferred_element_type=jnp.float32) * scale
        logits = logits - jnp.max(logits, axis=-1, keepdims=True)
        e = jnp.exp(logits)
        a = e / jnp.sum(e, axis=-1, keepdims=True)            # exact softmax

        col_acc = col_acc + jnp.sum(a, axis=1)                 # (T, N)

        ctx_h = jnp.einsum('tnm,tmd->tnd', a, vh,
                           preferred_element_type=jnp.float32) # (T, N, hd)
        ctx_sc[:, lo:lo + hd] = ctx_h.reshape(T * N, hd)

    # Single output projection (K = C) + bias; lane-flat (T*N, C) store.
    o = jnp.dot(ctx_sc[...], wp_ref[...],
                preferred_element_type=jnp.float32) + bp_ref[...]
    out_ref[...] = o.astype(out_ref.dtype)

    # ---- fused halting-score epilogue (PyTorch batch B == N here) ----
    hs = col_acc.T * (1.0 / num_heads)                         # (B, T)
    mm = mm_ref[...].astype(jnp.float32)                       # (B, T)
    neg = (1.0 - mm) * (-1e10)                                 # (B, T)
    # z[i, j, t] = hs[i, t] * mm[j, t] + neg[j, t]   ((B,1,T) x (B,T) broadcast)
    z = hs[:, None, :] * mm[None, :, :] + neg[None, :, :]      # (B, B, T)
    z = z - jnp.max(z, axis=-1, keepdims=True)
    ez = jnp.exp(z)
    soft = ez / jnp.sum(ez, axis=-1, keepdims=True)
    soft = soft * mm[None, :, :]
    soft = jnp.where(jnp.isnan(soft), jnp.zeros_like(soft), soft)
    halt_ref[...] = jnp.sum(soft, axis=1).astype(halt_ref.dtype)   # (B, T)


# ----------------------------------------------------------------------------
# LocalMHA forward: one fused pallas_call (grid = 1, everything VMEM-resident).
# ----------------------------------------------------------------------------
def local_mha_forward(params, x, mask, mappingmask, num_heads):
    del mask  # mask1 in the PyTorch forward is computed but never consumed.
    T, N, C = x.shape
    scale = (C // num_heads) ** -0.5
    kernel = functools.partial(_local_mha_kernel, num_heads=num_heads, scale=scale)
    vmem = lambda: pl.BlockSpec(memory_space=pltpu.MemorySpace.VMEM)

    out_flat, halting = pl.pallas_call(
        kernel,
        out_shape=(jax.ShapeDtypeStruct((T * N, C), x.dtype),
                   jax.ShapeDtypeStruct((N, T), jnp.float32)),
        in_specs=[vmem(), vmem(), vmem(), vmem(), vmem(), vmem()],
        out_specs=(vmem(), vmem()),
        scratch_shapes=[pltpu.VMEM((T * N, C), jnp.float32)],
    )(x, params['wq'], params['wkv'], params['wp'], params['bp'],
      mappingmask.astype(jnp.float32))

    # (T*N, C) -> (T, N, C): contiguous wrapper-side reshape (free).
    return out_flat.reshape(T, N, C), halting


# ----------------------------------------------------------------------------
# Pure-JAX reference (mirrors the PyTorch semantics) for validation.
# ----------------------------------------------------------------------------
def local_mha_reference(params, x, mappingmask, num_heads):
    T, N, C = x.shape
    hd = C // num_heads
    scale = hd ** -0.5
    hi = jax.lax.Precision.HIGHEST
    q = jnp.dot(x, params['wq'], precision=hi)
    kv = jnp.dot(x, params['wkv'], precision=hi)
    k, v = kv[..., :C], kv[..., C:]
    qh = q.reshape(T, N, num_heads, hd).transpose(0, 2, 1, 3)
    kh = k.reshape(T, N, num_heads, hd).transpose(0, 2, 1, 3)
    vh = v.reshape(T, N, num_heads, hd).transpose(0, 2, 1, 3)
    attn = jax.nn.softmax(
        jnp.einsum('thnd,thmd->thnm', qh, kh, precision=hi) * scale, axis=-1)
    o = jnp.einsum('thnm,thmd->thnd', attn, vh, precision=hi)
    o = o.transpose(0, 2, 1, 3).reshape(T, N, C)
    o = jnp.dot(o, params['wp'], precision=hi) + params['bp']
    attn_mean = attn.mean(axis=1)                              # (T, N, N)
    hs = jnp.sum(attn_mean, axis=1)[:, None, :]                # (T, 1, B)
    hs = jnp.transpose(hs, (2, 1, 0))                          # (B, 1, T)
    mm = mappingmask
    mask3 = (1.0 - mm) * (-1e10)
    h1 = hs * mm                                               # (B, B, T)
    h2 = jax.nn.softmax(h1 + mask3, axis=-1) * mm
    h2 = jnp.where(jnp.isnan(h2), jnp.zeros_like(h2), h2)
    halting = jnp.sum(h2, axis=1)                              # (B, T)
    return o, halting


if __name__ == "__main__":
    key = jax.random.PRNGKey(0)
    T, B, C, H = 16, 8, 32, 4       # t, batch, dim, heads
    ks = jax.random.split(key, 8)

    x = jax.random.normal(ks[0], (T, B, C), jnp.float32)
    mask = jnp.ones((B, T, T), jnp.float32)                    # unused by forward
    lengths = jnp.array([16, 12, 7, 16, 3, 10, 5, 14])
    mappingmask = (jnp.arange(T)[None, :] < lengths[:, None]).astype(jnp.float32)

    params = {
        'wq':  0.05 * jax.random.normal(ks[1], (C, C), jnp.float32),
        'wkv': 0.05 * jax.random.normal(ks[2], (C, 2 * C), jnp.float32),
        'wp':  0.05 * jax.random.normal(ks[3], (C, C), jnp.float32),
        'bp':  0.05 * jax.random.normal(ks[4], (1, C), jnp.float32),
    }

    out, halting = local_mha_forward(params, x, mask, mappingmask, H)
    jax.block_until_ready((out, halting))

    ref_out, ref_halting = local_mha_reference(params, x, mappingmask, H)
    assert out.shape == (T, B, C) and halting.shape == (B, T)
    # Approx reciprocal removed -> tighter tolerances; remaining slack only
    # covers the MXU f32-pass decomposition vs. the HIGHEST-precision reference.
    assert jnp.allclose(out, ref_out, atol=2e-3, rtol=2e-3)
    assert jnp.allclose(halting, ref_halting, atol=2e-3, rtol=2e-3)

    print("KERNEL_OK")
</pallas_src>

<mosaic_0001>
module attributes {stable_mosaic.version = 11 : i64} {
  func.func @_local_mha_kernel(%arg0: memref<16x8x32xf32, #tpu.memory_space<vmem>>, %arg1: memref<32x32xf32, #tpu.memory_space<vmem>>, %arg2: memref<32x64xf32, #tpu.memory_space<vmem>>, %arg3: memref<32x32xf32, #tpu.memory_space<vmem>>, %arg4: memref<1x32xf32, #tpu.memory_space<vmem>>, %arg5: memref<8x16xf32, #tpu.memory_space<vmem>>, %arg6: memref<128x32xf32, #tpu.memory_space<vmem>>, %arg7: memref<8x16xf32, #tpu.memory_space<vmem>>, %arg8: memref<128x32xf32, #tpu.memory_space<vmem>>) attributes {dimension_semantics = [], scalar_prefetch = 0 : i64, scratch_operands = 1 : i64, tpu.core_type = #tpu.core_type<tc>} {
    %c0 = arith.constant 0 : index
    %c0_0 = arith.constant 0 : index
    %c0_1 = arith.constant 0 : index
    %0 = vector.load %arg0[%c0, %c0_0, %c0_1] : memref<16x8x32xf32, #tpu.memory_space<vmem>>, vector<16x8x32xf32>
    %1 = vector.shape_cast %0 : vector<16x8x32xf32> to vector<128x32xf32>
    %c0_2 = arith.constant 0 : index
    %c0_3 = arith.constant 0 : index
    %2 = vector.load %arg1[%c0_2, %c0_3] : memref<32x32xf32, #tpu.memory_space<vmem>>, vector<32x32xf32>
    %cst = arith.constant dense<0.000000e+00> : vector<128x32xf32>
    %3 = tpu.matmul %1, %2, %cst {dimension_numbers = #tpu.dot_dimension_numbers<[1], [0], [0], [1], [0, 0, 1, 1], [], []>} : vector<128x32xf32>, vector<32x32xf32>, vector<128x32xf32> -> vector<128x32xf32>
    %c0_4 = arith.constant 0 : index
    %c0_5 = arith.constant 0 : index
    %4 = vector.load %arg2[%c0_4, %c0_5] : memref<32x64xf32, #tpu.memory_space<vmem>>, vector<32x64xf32>
    %cst_6 = arith.constant dense<0.000000e+00> : vector<128x64xf32>
    %5 = tpu.matmul %1, %4, %cst_6 {dimension_numbers = #tpu.dot_dimension_numbers<[1], [0], [0], [1], [0, 0, 1, 1], [], []>} : vector<128x32xf32>, vector<32x64xf32>, vector<128x64xf32> -> vector<128x64xf32>
    %6 = vector.shape_cast %3 : vector<128x32xf32> to vector<16x8x32xf32>
    %7 = vector.shape_cast %5 : vector<128x64xf32> to vector<16x8x64xf32>
    %cst_7 = arith.constant 0.000000e+00 : f32
    %8 = vector.broadcast %cst_7 : f32 to vector<16x8xf32>
    %9 = vector.extract_strided_slice %6 {offsets = [0, 0, 0], sizes = [16, 8, 8], strides = [1, 1, 1]} : vector<16x8x32xf32> to vector<16x8x8xf32>
    %10 = vector.extract_strided_slice %7 {offsets = [0, 0, 0], sizes = [16, 8, 8], strides = [1, 1, 1]} : vector<16x8x64xf32> to vector<16x8x8xf32>
    %11 = vector.extract_strided_slice %7 {offsets = [0, 0, 32], sizes = [16, 8, 8], strides = [1, 1, 1]} : vector<16x8x64xf32> to vector<16x8x8xf32>
    "tpu.trace_start"() <{level = 10 : i32, message = "tnd,tmd->tnm"}> : () -> ()
    %cst_8 = arith.constant dense<0.000000e+00> : vector<16x8x8xf32>
    %12 = tpu.matmul %9, %10, %cst_8 {dimension_numbers = #tpu.dot_dimension_numbers<[2], [2], [1], [1], [0, 0, 0, 1, 1, 1], [0], [0]>} : vector<16x8x8xf32>, vector<16x8x8xf32>, vector<16x8x8xf32> -> vector<16x8x8xf32>
    "tpu.trace_stop"() : () -> ()
    %cst_9 = arith.constant 0.353553385 : f32
    %13 = vector.broadcast %cst_9 : f32 to vector<16x8x8xf32>
    %14 = arith.mulf %12, %13 : vector<16x8x8xf32>
    %cst_10 = arith.constant dense<0xFF800000> : vector<16x8xf32>
    %15 = vector.multi_reduction <maximumf>, %14, %cst_10 [2] : vector<16x8x8xf32> to vector<16x8xf32>
    %16 = vector.shape_cast %15 : vector<16x8xf32> to vector<16x8x1xf32>
    %17 = vector.broadcast %16 : vector<16x8x1xf32> to vector<16x8x8xf32>
    %18 = arith.subf %14, %17 : vector<16x8x8xf32>
    %19 = math.exp %18 : vector<16x8x8xf32>
    %cst_11 = arith.constant dense<0.000000e+00> : vector<16x8xf32>
    %20 = vector.multi_reduction <add>, %19, %cst_11 [2] : vector<16x8x8xf32> to vector<16x8xf32>
    %21 = vector.shape_cast %20 : vector<16x8xf32> to vector<16x8x1xf32>
    %22 = vector.broadcast %21 : vector<16x8x1xf32> to vector<16x8x8xf32>
    %23 = arith.divf %19, %22 : vector<16x8x8xf32>
    %cst_12 = arith.constant dense<0.000000e+00> : vector<16x8xf32>
    %24 = vector.multi_reduction <add>, %23, %cst_12 [1] : vector<16x8x8xf32> to vector<16x8xf32>
    %25 = arith.addf %8, %24 : vector<16x8xf32>
    "tpu.trace_start"() <{level = 10 : i32, message = "tnm,tmd->tnd"}> : () -> ()
    %cst_13 = arith.constant dense<0.000000e+00> : vector<16x8x8xf32>
    %26 = tpu.matmul %23, %11, %cst_13 {dimension_numbers = #tpu.dot_dimension_numbers<[2], [1], [1], [2], [0, 0, 0, 1, 1, 2], [0], [0]>} : vector<16x8x8xf32>, vector<16x8x8xf32>, vector<16x8x8xf32> -> vector<16x8x8xf32>
    "tpu.trace_stop"() : () -> ()
    %27 = vector.shape_cast %26 : vector<16x8x8xf32> to vector<128x8xf32>
    %c0_14 = arith.constant 0 : index
    %c0_15 = arith.constant 0 : index
    %28 = vector.load %arg8[%c0_14, %c0_15] : memref<128x32xf32, #tpu.memory_space<vmem>>, vector<128x8xf32>
    tpu.vector_store %arg8[%c0_14, %c0_15], %27 {strides = array<i32>} : memref<128x32xf32, #tpu.memory_space<vmem>>, vector<128x8xf32>,
    %29 = vector.extract_strided_slice %6 {offsets = [0, 0, 8], sizes = [16, 8, 8], strides = [1, 1, 1]} : vector<16x8x32xf32> to vector<16x8x8xf32>
    %30 = vector.extract_strided_slice %7 {offsets = [0, 0, 8], sizes = [16, 8, 8], strides = [1, 1, 1]} : vector<16x8x64xf32> to vector<16x8x8xf32>
    %31 = vector.extract_strided_slice %7 {offsets = [0, 0, 40], sizes = [16, 8, 8], strides = [1, 1, 1]} : vector<16x8x64xf32> to vector<16x8x8xf32>
    "tpu.trace_start"() <{level = 10 : i32, message = "tnd,tmd->tnm"}> : () -> ()
    %cst_16 = arith.constant dense<0.000000e+00> : vector<16x8x8xf32>
    %32 = tpu.matmul %29, %30, %cst_16 {dimension_numbers = #tpu.dot_dimension_numbers<[2], [2], [1], [1], [0, 0, 0, 1, 1, 1], [0], [0]>} : vector<16x8x8xf32>, vector<16x8x8xf32>, vector<16x8x8xf32> -> vector<16x8x8xf32>
    "tpu.trace_stop"() : () -> ()
    %cst_17 = arith.constant 0.353553385 : f32
    %33 = vector.broadcast %cst_17 : f32 to vector<16x8x8xf32>
    %34 = arith.mulf %32, %33 : vector<16x8x8xf32>
    %cst_18 = arith.constant dense<0xFF800000> : vector<16x8xf32>
    %35 = vector.multi_reduction <maximumf>, %34, %cst_18 [2] : vector<16x8x8xf32> to vector<16x8xf32>
    %36 = vector.shape_cast %35 : vector<16x8xf32> to vector<16x8x1xf32>
    %37 = vector.broadcast %36 : vector<16x8x1xf32> to vector<16x8x8xf32>
    %38 = arith.subf %34, %37 : vector<16x8x8xf32>
    %39 = math.exp %38 : vector<16x8x8xf32>
    %cst_19 = arith.constant dense<0.000000e+00> : vector<16x8xf32>
    %40 = vector.multi_reduction <add>, %39, %cst_19 [2] : vector<16x8x8xf32> to vector<16x8xf32>
    %41 = vector.shape_cast %40 : vector<16x8xf32> to vector<16x8x1xf32>
    %42 = vector.broadcast %41 : vector<16x8x1xf32> to vector<16x8x8xf32>
    %43 = arith.divf %39, %42 : vector<16x8x8xf32>
    %cst_20 = arith.constant dense<0.000000e+00> : vector<16x8xf32>
    %44 = vector.multi_reduction <add>, %43, %cst_20 [1] : vector<16x8x8xf32> to vector<16x8xf32>
    %45 = arith.addf %25, %44 : vector<16x8xf32>
    "tpu.trace_start"() <{level = 10 : i32, message = "tnm,tmd->tnd"}> : () -> ()
    %cst_21 = arith.constant dense<0.000000e+00> : vector<16x8x8xf32>
    %46 = tpu.matmul %43, %31, %cst_21 {dimension_numbers = #tpu.dot_dimension_numbers<[2], [1], [1], [2], [0, 0, 0, 1, 1, 2], [0], [0]>} : vector<16x8x8xf32>, vector<16x8x8xf32>, vector<16x8x8xf32> -> vector<16x8x8xf32>
    "tpu.trace_stop"() : () -> ()
    %47 = vector.shape_cast %46 : vector<16x8x8xf32> to vector<128x8xf32>
    %c0_22 = arith.constant 0 : index
    %c8 = arith.constant 8 : index
    %48 = vector.load %arg8[%c0_22, %c8] : memref<128x32xf32, #tpu.memory_space<vmem>>, vector<128x8xf32>
    tpu.vector_store %arg8[%c0_22, %c8], %47 {strides = array<i32>} : memref<128x32xf32, #tpu.memory_space<vmem>>, vector<128x8xf32>,
    %49 = vector.extract_strided_slice %6 {offsets = [0, 0, 16], sizes = [16, 8, 8], strides = [1, 1, 1]} : vector<16x8x32xf32> to vector<16x8x8xf32>
    %50 = vector.extract_strided_slice %7 {offsets = [0, 0, 16], sizes = [16, 8, 8], strides = [1, 1, 1]} : vector<16x8x64xf32> to vector<16x8x8xf32>
    %51 = vector.extract_strided_slice %7 {offsets = [0, 0, 48], sizes = [16, 8, 8], strides = [1, 1, 1]} : vector<16x8x64xf32> to vector<16x8x8xf32>
    "tpu.trace_start"() <{level = 10 : i32, message = "tnd,tmd->tnm"}> : () -> ()
    %cst_23 = arith.constant dense<0.000000e+00> : vector<16x8x8xf32>
    %52 = tpu.matmul %49, %50, %cst_23 {dimension_numbers = #tpu.dot_dimension_numbers<[2], [2], [1], [1], [0, 0, 0, 1, 1, 1], [0], [0]>} : vector<16x8x8xf32>, vector<16x8x8xf32>, vector<16x8x8xf32> -> vector<16x8x8xf32>
    "tpu.trace_stop"() : () -> ()
    %cst_24 = arith.constant 0.353553385 : f32
    %53 = vector.broadcast %cst_24 : f32 to vector<16x8x8xf32>
    %54 = arith.mulf %52, %53 : vector<16x8x8xf32>
    %cst_25 = arith.constant dense<0xFF800000> : vector<16x8xf32>
    %55 = vector.multi_reduction <maximumf>, %54, %cst_25 [2] : vector<16x8x8xf32> to vector<16x8xf32>
    %56 = vector.shape_cast %55 : vector<16x8xf32> to vector<16x8x1xf32>
    %57 = vector.broadcast %56 : vector<16x8x1xf32> to vector<16x8x8xf32>
    %58 = arith.subf %54, %57 : vector<16x8x8xf32>
    %59 = math.exp %58 : vector<16x8x8xf32>
    %cst_26 = arith.constant dense<0.000000e+00> : vector<16x8xf32>
    %60 = vector.multi_reduction <add>, %59, %cst_26 [2] : vector<16x8x8xf32> to vector<16x8xf32>
    %61 = vector.shape_cast %60 : vector<16x8xf32> to vector<16x8x1xf32>
    %62 = vector.broadcast %61 : vector<16x8x1xf32> to vector<16x8x8xf32>
    %63 = arith.divf %59, %62 : vector<16x8x8xf32>
    %cst_27 = arith.constant dense<0.000000e+00> : vector<16x8xf32>
    %64 = vector.multi_reduction <add>, %63, %cst_27 [1] : vector<16x8x8xf32> to vector<16x8xf32>
    %65 = arith.addf %45, %64 : vector<16x8xf32>
    "tpu.trace_start"() <{level = 10 : i32, message = "tnm,tmd->tnd"}> : () -> ()
    %cst_28 = arith.constant dense<0.000000e+00> : vector<16x8x8xf32>
    %66 = tpu.matmul %63, %51, %cst_28 {dimension_numbers = #tpu.dot_dimension_numbers<[2], [1], [1], [2], [0, 0, 0, 1, 1, 2], [0], [0]>} : vector<16x8x8xf32>, vector<16x8x8xf32>, vector<16x8x8xf32> -> vector<16x8x8xf32>
    "tpu.trace_stop"() : () -> ()
    %67 = vector.shape_cast %66 : vector<16x8x8xf32> to vector<128x8xf32>
    %c0_29 = arith.constant 0 : index
    %c16 = arith.constant 16 : index
    %68 = vector.load %arg8[%c0_29, %c16] : memref<128x32xf32, #tpu.memory_space<vmem>>, vector<128x8xf32>
    tpu.vector_store %arg8[%c0_29, %c16], %67 {strides = array<i32>} : memref<128x32xf32, #tpu.memory_space<vmem>>, vector<128x8xf32>,
    %69 = vector.extract_strided_slice %6 {offsets = [0, 0, 24], sizes = [16, 8, 8], strides = [1, 1, 1]} : vector<16x8x32xf32> to vector<16x8x8xf32>
    %70 = vector.extract_strided_slice %7 {offsets = [0, 0, 24], sizes = [16, 8, 8], strides = [1, 1, 1]} : vector<16x8x64xf32> to vector<16x8x8xf32>
    %71 = vector.extract_strided_slice %7 {offsets = [0, 0, 56], sizes = [16, 8, 8], strides = [1, 1, 1]} : vector<16x8x64xf32> to vector<16x8x8xf32>
    "tpu.trace_start"() <{level = 10 : i32, message = "tnd,tmd->tnm"}> : () -> ()
    %cst_30 = arith.constant dense<0.000000e+00> : vector<16x8x8xf32>
    %72 = tpu.matmul %69, %70, %cst_30 {dimension_numbers = #tpu.dot_dimension_numbers<[2], [2], [1], [1], [0, 0, 0, 1, 1, 1], [0], [0]>} : vector<16x8x8xf32>, vector<16x8x8xf32>, vector<16x8x8xf32> -> vector<16x8x8xf32>
    "tpu.trace_stop"() : () -> ()
    %cst_31 = arith.constant 0.353553385 : f32
    %73 = vector.broadcast %cst_31 : f32 to vector<16x8x8xf32>
    %74 = arith.mulf %72, %73 : vector<16x8x8xf32>
    %cst_32 = arith.constant dense<0xFF800000> : vector<16x8xf32>
    %75 = vector.multi_reduction <maximumf>, %74, %cst_32 [2] : vector<16x8x8xf32> to vector<16x8xf32>
    %76 = vector.shape_cast %75 : vector<16x8xf32> to vector<16x8x1xf32>
    %77 = vector.broadcast %76 : vector<16x8x1xf32> to vector<16x8x8xf32>
    %78 = arith.subf %74, %77 : vector<16x8x8xf32>
    %79 = math.exp %78 : vector<16x8x8xf32>
    %cst_33 = arith.constant dense<0.000000e+00> : vector<16x8xf32>
    %80 = vector.multi_reduction <add>, %79, %cst_33 [2] : vector<16x8x8xf32> to vector<16x8xf32>
    %81 = vector.shape_cast %80 : vector<16x8xf32> to vector<16x8x1xf32>
    %82 = vector.broadcast %81 : vector<16x8x1xf32> to vector<16x8x8xf32>
    %83 = arith.divf %79, %82 : vector<16x8x8xf32>
    %cst_34 = arith.constant dense<0.000000e+00> : vector<16x8xf32>
    %84 = vector.multi_reduction <add>, %83, %cst_34 [1] : vector<16x8x8xf32> to vector<16x8xf32>
    %85 = arith.addf %65, %84 : vector<16x8xf32>
    "tpu.trace_start"() <{level = 10 : i32, message = "tnm,tmd->tnd"}> : () -> ()
    %cst_35 = arith.constant dense<0.000000e+00> : vector<16x8x8xf32>
    %86 = tpu.matmul %83, %71, %cst_35 {dimension_numbers = #tpu.dot_dimension_numbers<[2], [1], [1], [2], [0, 0, 0, 1, 1, 2], [0], [0]>} : vector<16x8x8xf32>, vector<16x8x8xf32>, vector<16x8x8xf32> -> vector<16x8x8xf32>
    "tpu.trace_stop"() : () -> ()
    %87 = vector.shape_cast %86 : vector<16x8x8xf32> to vector<128x8xf32>
    %c0_36 = arith.constant 0 : index
    %c24 = arith.constant 24 : index
    %88 = vector.load %arg8[%c0_36, %c24] : memref<128x32xf32, #tpu.memory_space<vmem>>, vector<128x8xf32>
    tpu.vector_store %arg8[%c0_36, %c24], %87 {strides = array<i32>} : memref<128x32xf32, #tpu.memory_space<vmem>>, vector<128x8xf32>,
    %c0_37 = arith.constant 0 : index
    %c0_38 = arith.constant 0 : index
    %89 = vector.load %arg8[%c0_37, %c0_38] : memref<128x32xf32, #tpu.memory_space<vmem>>, vector<128x32xf32>
    %c0_39 = arith.constant 0 : index
    %c0_40 = arith.constant 0 : index
    %90 = vector.load %arg3[%c0_39, %c0_40] : memref<32x32xf32, #tpu.memory_space<vmem>>, vector<32x32xf32>
    %cst_41 = arith.constant dense<0.000000e+00> : vector<128x32xf32>
    %91 = tpu.matmul %89, %90, %cst_41 {dimension_numbers = #tpu.dot_dimension_numbers<[1], [0], [0], [1], [0, 0, 1, 1], [], []>} : vector<128x32xf32>, vector<32x32xf32>, vector<128x32xf32> -> vector<128x32xf32>
    %c0_42 = arith.constant 0 : index
    %c0_43 = arith.constant 0 : index
    %92 = vector.load %arg4[%c0_42, %c0_43] : memref<1x32xf32, #tpu.memory_space<vmem>>, vector<1x32xf32>
    %93 = vector.broadcast %92 : vector<1x32xf32> to vector<128x32xf32>
    %94 = arith.addf %91, %93 : vector<128x32xf32>
    %c0_44 = arith.constant 0 : index
    %c0_45 = arith.constant 0 : index
    %95 = vector.load %arg6[%c0_44, %c0_45] : memref<128x32xf32, #tpu.memory_space<vmem>>, vector<128x32xf32>
    tpu.vector_store %arg6[%c0_44, %c0_45], %94 {strides = array<i32>} : memref<128x32xf32, #tpu.memory_space<vmem>>, vector<128x32xf32>,
    %96 = tpu.transpose %85, [1, 0] : vector<16x8xf32> -> vector<8x16xf32>
    %cst_46 = arith.constant 2.500000e-01 : f32
    %97 = vector.broadcast %cst_46 : f32 to vector<8x16xf32>
    %98 = arith.mulf %96, %97 : vector<8x16xf32>
    %c0_47 = arith.constant 0 : index
    %c0_48 = arith.constant 0 : index
    %99 = vector.load %arg5[%c0_47, %c0_48] : memref<8x16xf32, #tpu.memory_space<vmem>>, vector<8x16xf32>
    %cst_49 = arith.constant 1.000000e+00 : f32
    %100 = vector.broadcast %cst_49 : f32 to vector<8x16xf32>
    %101 = arith.subf %100, %99 : vector<8x16xf32>
    %cst_50 = arith.constant -1.000000e+10 : f32
    %102 = vector.broadcast %cst_50 : f32 to vector<8x16xf32>
    %103 = arith.mulf %101, %102 : vector<8x16xf32>
    %104 = vector.shape_cast %98 : vector<8x16xf32> to vector<8x1x16xf32>
    %105 = vector.shape_cast %99 : vector<8x16xf32> to vector<1x8x16xf32>
    %106 = vector.broadcast %104 : vector<8x1x16xf32> to vector<8x8x16xf32>
    %107 = vector.broadcast %105 : vector<1x8x16xf32> to vector<8x8x16xf32>
    %108 = arith.mulf %106, %107 : vector<8x8x16xf32>
    %109 = vector.shape_cast %103 : vector<8x16xf32> to vector<1x8x16xf32>
    %110 = vector.broadcast %109 : vector<1x8x16xf32> to vector<8x8x16xf32>
    %111 = arith.addf %108, %110 : vector<8x8x16xf32>
    %cst_51 = arith.constant dense<0xFF800000> : vector<8x8xf32>
    %112 = vector.multi_reduction <maximumf>, %111, %cst_51 [2] : vector<8x8x16xf32> to vector<8x8xf32>
    %113 = vector.shape_cast %112 : vector<8x8xf32> to vector<8x8x1xf32>
    %114 = vector.broadcast %113 : vector<8x8x1xf32> to vector<8x8x16xf32>
    %115 = arith.subf %111, %114 : vector<8x8x16xf32>
    %116 = math.exp %115 : vector<8x8x16xf32>
    %cst_52 = arith.constant dense<0.000000e+00> : vector<8x8xf32>
    %117 = vector.multi_reduction <add>, %116, %cst_52 [2] : vector<8x8x16xf32> to vector<8x8xf32>
    %118 = vector.shape_cast %117 : vector<8x8xf32> to vector<8x8x1xf32>
    %119 = vector.broadcast %118 : vector<8x8x1xf32> to vector<8x8x16xf32>
    %120 = arith.divf %116, %119 : vector<8x8x16xf32>
    %121 = vector.shape_cast %99 : vector<8x16xf32> to vector<1x8x16xf32>
    %122 = vector.broadcast %121 : vector<1x8x16xf32> to vector<8x8x16xf32>
    %123 = arith.mulf %120, %122 : vector<8x8x16xf32>
    %124 = arith.cmpf one, %123, %123 : vector<8x8x16xf32>
    %cst_53 = arith.constant 0.000000e+00 : f32
    %125 = vector.broadcast %cst_53 : f32 to vector<8x8x16xf32>
    %126 = arith.select %124, %125, %123 : vector<8x8x16xi1>, vector<8x8x16xf32>
    %cst_54 = arith.constant dense<0.000000e+00> : vector<8x16xf32>
    %127 = vector.multi_reduction <add>, %126, %cst_54 [1] : vector<8x8x16xf32> to vector<8x16xf32>
    %c0_55 = arith.constant 0 : index
    %c0_56 = arith.constant 0 : index
    %128 = vector.load %arg7[%c0_55, %c0_56] : memref<8x16xf32, #tpu.memory_space<vmem>>, vector<8x16xf32>
    tpu.vector_store %arg7[%c0_55, %c0_56], %127 {strides = array<i32>} : memref<8x16xf32, #tpu.memory_space<vmem>>, vector<8x16xf32>,
    return
  }
}

</mosaic_0001>

<bundles_post_ra>
// kernel: tpu_custom_call.1
= control target key start
LH: loop header
LB: loop body
LE: loop exit
PB: predicated region body
PF: predicated region fallthrough
CT: control target
= control target key end

     0   :  { %13 = vsyncpa [#allocation4], 0  ;;  %s10606_s0 = inlined_call_operand.hbm [shape: f32[16,8,32], index: 0, kind: input, shape index: {}]   ;;  %s10607_s1 = inlined_call_operand.hbm [shape: f32[32,32], index: 1, kind: input, shape index: {}]   ;;  %s10608_s2 = inlined_call_operand.hbm [shape: f32[32,64], index: 2, kind: input, shape index: {}]   ;;  %s10609_s3 = inlined_call_operand.hbm [shape: f32[32,32], index: 3, kind: input, shape index: {}]   ;;  %s10610_s4 = inlined_call_operand.vmem [shape: f32[1,32], index: 4, kind: input, shape index: {}]   ;;  %s10611_s5 = inlined_call_operand.hbm [shape: f32[8,16], index: 5, kind: input, shape index: {}]   ;;  %s10612_s6 = inlined_call_operand.vmem [shape: f32[128,32], index: 6, kind: output, shape index: {0}]   ;;  %s10613_s7 = inlined_call_operand.hbm [shape: f32[8,16], index: 7, kind: output, shape index: {1}]  }
   0x1   :  { %14 = vsyncpa [#allocation7], 0 }
   0x2   :  { %15 = vsyncpa [#allocation10], 0 }
   0x3   :  { %16 = vsyncpa [#allocation5], 0  ;;  %s34_s26 = sshll.u32 %s10607_s1, 4  ;;  %s7548_s27 = smov [#allocation6]   ;;  %s35_s26 = int_to_ptr.hbm [resolvable:$true] %s34_s26 }
   0x4   :  { %s36_s28 = sshll.u32 %s7548_s27, 4  ;;  %s60_s8 = sshll.u32 %s10609_s3, 4  ;;  %s37_s28 = int_to_ptr.vmem [resolvable:$true] %s36_s28  ;;  %s61_s8 = int_to_ptr.hbm [resolvable:$true] %s60_s8 }
   0x5   :  { %s7549_s9 = smov 128   ;;  %s7550_s10 = smov 8  }
   0x6   :  { %42 = dma.hbm_to_vmem [thread:$0]  %s35_s26, 512, %s37_s28, [#allocation7], %s7549_s9, %s7549_s9, %s7550_s10  }
   0x7   :  { %s7551_s11 = smov [#allocation9]   ;;  %s21_s15 = sshll.u32 %s10606_s0, 4  ;;  %s22_s15 = int_to_ptr.hbm [resolvable:$true] %s21_s15 }
   0x8   :  { %s62_s12 = sshll.u32 %s7551_s11, 4  ;;  %s47_s17 = sshll.u32 %s10608_s2, 4  ;;  %s63_s12 = int_to_ptr.vmem [resolvable:$true] %s62_s12  ;;  %s48_s17 = int_to_ptr.hbm [resolvable:$true] %s47_s17 }
   0x9   :  { %68 = dma.hbm_to_vmem [thread:$0]  %s61_s8, 512, %s63_s12, [#allocation10], %s7549_s9, %s7549_s9, %s7550_s10  }
   0xa   :  { %s7552_s3 = smov [#allocation3]   ;;  %s7553_s19 = smov [#allocation8]  }
   0xb   :  { %s23_s18 = sshll.u32 %s7552_s3, 4  ;;  %s49_s20 = sshll.u32 %s7553_s19, 4  ;;  %s24_s18 = int_to_ptr.vmem [resolvable:$true] %s23_s18  ;;  %s50_s20 = int_to_ptr.vmem [resolvable:$true] %s49_s20 }
   0xc   :  { %29 = dma.hbm_to_vmem [thread:$0]  %s22_s15, 2048, %s24_s18, [#allocation4], %s7549_s9, %s7549_s9, %s7550_s10  }
   0xd   :  { %s76_s0 = sshll.u32 %s10611_s5, 4  ;;  %s7554_s23 = smov [#allocation11]   ;;  %s77_s0 = int_to_ptr.hbm [resolvable:$true] %s76_s0 }
   0xe   :  { %55 = dma.hbm_to_vmem [thread:$0]  %s48_s17, 512, %s50_s20, [#allocation7], %s7549_s9, %s7549_s9, %s7550_s10  }
   0xf   :  { %s78_s24 = sshll.u32 %s7554_s23, 4  ;;  %s79_s24 = int_to_ptr.vmem [resolvable:$true] %s78_s24 }
  0x10   :  { %81 = dma.hbm_to_vmem [thread:$0]  %s77_s0, 128, %s79_s24, [#allocation10]  }
  0x11   :  { %7540 = dma.done.wait [#allocation4], 2048  }
  0x12   :  { %7541 = vsyncadd [#allocation4], 4294965248 }
  0x13   :  { %7542 = dma.done.wait [#allocation7], 1024  }
  0x14   :  { %7543 = vsyncadd [#allocation7], 4294966272 }
  0x15   :  { %7544 = dma.done.wait [#allocation10], 640  }
  0x16   :  { %7545 = vsyncadd [#allocation10], 4294966656  ;;  %v121_v0 = vld [vmem:[#allocation6 + $0x18] sm:$0xff]  ;;  %v120_v1 = vld [vmem:[#allocation6 + $0x10] sm:$0xff]  ;;  %vm122_vm0 = vcmask 261120   ;;  %s7555_s2 = smov 120  }
  0x17   :  { %183 = vmatpush.msra.mxu0 %v121_v0  ;;  %6922 = vmatpush.msra.mxu1 %v121_v0  ;;  %v119_v2 = vld [vmem:[#allocation6 + $0x8] sm:$0xff]  ;;  %v118_v3 = vld [vmem:[#allocation6] sm:$0xff]  ;;  %v116_v5 = vld [vmem:[#allocation3 + $0x70] sm:$0xff]  ;;  %vm305_vm1 = vcmask 64512   ;;  %s7556_s5 = smov 88   ;;  %s7557_s25 = smov 96  }
  0x18   :  { %v102_v4 = vld [vmem:[#allocation3] sm:$0xff]  ;;  %v239_v6 = vld [vmem:[#allocation8 + $0x18] sm:$0xff]  ;;  %v238_v7 = vld [vmem:[#allocation8 + $0x10] sm:$0xff]  ;;  %s7558_s26 = smov 112   ;;  %s7559_s27 = smov 80  }
  0x19   :  { %184 = vmatpush.msra.mxu0 %v120_v1  ;;  %6923 = vmatpush.msra.mxu1 %v120_v1  ;;  %v237_v8 = vld [vmem:[#allocation8 + $0x8] sm:$0xff]  ;;  %v236_v9 = vld [vmem:[#allocation8] sm:$0xff]  ;;  %v117_v11 = vld [vmem:[#allocation3 + $0x78] sm:$0xff]  ;;  %s7560_s28 = smov 104   ;;  %s7561_s29 = smov 72  }
  0x1a   :  { %v103_v10 = vld [vmem:[#allocation3 + $0x8] sm:$0xff]  ;;  %v104_v12 = vld [vmem:[#allocation3 + $0x10] sm:$0xff]  ;;  %v105_v13 = vld [vmem:[#allocation3 + $0x18] sm:$0xff]  ;;  %s7562_s30 = smov 16   ;;  %s7563_s8 = smov 24  }
  0x1b   :  { %185 = vmatpush.msra.mxu0 %v119_v2  ;;  %6924 = vmatpush.msra.mxu1 %v119_v2  ;;  %v106_v14 = vld [vmem:[#allocation3 + $0x20] sm:$0xff]  ;;  %v107_v15 = vld [vmem:[#allocation3 + $0x28] sm:$0xff]  ;;  %v108_v16 = vld [vmem:[#allocation3 + $0x30] sm:$0xff]  ;;  %s6668_s1 = sshll.u32 %s10613_s7, 4  ;;  %s6669_s1 = int_to_ptr.hbm [resolvable:$true] %s6668_s1 }
  0x1c   :  { %v109_v17 = vld [vmem:[#allocation3 + $0x38] sm:$0xff]  ;;  %v110_v18 = vld [vmem:[#allocation3 + $0x40] sm:$0xff]  ;;  %v111_v19 = vld [vmem:[#allocation3 + $0x48] sm:$0xff] }
  0x1d   :  { %186 = vmatpush.msra.mxu0 %v118_v3  ;;  %6925 = vmatpush.msra.mxu1 %v118_v3  ;;  %v112_v20 = vld [vmem:[#allocation3 + $0x50] sm:$0xff]  ;;  %v113_v21 = vld [vmem:[#allocation3 + $0x58] sm:$0xff]  ;;  %v114_v22 = vld [vmem:[#allocation3 + $0x60] sm:$0xff] }
  0x1e   :  { %6682 = vmatmul.msk.f32.vlgmr.msra.gmra.mxu0 %vm122_vm0, %v102_v4  ;;  %6696 = vmatmul.msk.f32.vlgmr.msra.gmra.mxu1 %vm122_vm0, %v116_v5  ;;  %v115_v23 = vld [vmem:[#allocation3 + $0x68] sm:$0xff] }
  0x1f   :  { %252 = vmatpush.msrb.mxu1 %v239_v6 }
  0x21   :  { %253 = vmatpush.msrb.mxu1 %v238_v7 }
  0x23   :  { %254 = vmatpush.msrb.mxu1 %v237_v8 }
  0x25   :  { %255 = vmatpush.msrb.mxu1 %v236_v9 }
  0x26   :  { %6683 = vmatmul.msk.f32.gmra.mxu0 %vm122_vm0, %v103_v10  ;;  %6697 = vmatmul.msk.f32.gmra.mxu1 %vm122_vm0, %v117_v11 }
  0x2e   :  { %6684 = vmatmul.msk.f32.gmra.mxu0 %vm122_vm0, %v104_v12  ;;  %6698 = vmatmul.msk.f32.vlgmr.msrb.gmra.mxu1 %vm122_vm0, %v102_v4 }
  0x36   :  { %6685 = vmatmul.msk.f32.gmra.mxu0 %vm122_vm0, %v105_v13  ;;  %6699 = vmatmul.msk.f32.gmra.mxu1 %vm122_vm0, %v103_v10 }
  0x3e   :  { %6686 = vmatmul.msk.f32.gmra.mxu0 %vm122_vm0, %v106_v14  ;;  %6700 = vmatmul.msk.f32.gmra.mxu1 %vm122_vm0, %v104_v12 }
  0x46   :  { %6687 = vmatmul.msk.f32.gmra.mxu0 %vm122_vm0, %v107_v15  ;;  %6701 = vmatmul.msk.f32.gmra.mxu1 %vm122_vm0, %v105_v13 }
  0x4e   :  { %6688 = vmatmul.msk.f32.gmra.mxu0 %vm122_vm0, %v108_v16  ;;  %6702 = vmatmul.msk.f32.gmra.mxu1 %vm122_vm0, %v106_v14 }
  0x56   :  { %6689 = vmatmul.msk.f32.gmra.mxu0 %vm122_vm0, %v109_v17  ;;  %6703 = vmatmul.msk.f32.gmra.mxu1 %vm122_vm0, %v107_v15 }
  0x5e   :  { %6690 = vmatmul.msk.f32.gmra.mxu0 %vm122_vm0, %v110_v18  ;;  %6704 = vmatmul.msk.f32.gmra.mxu1 %vm122_vm0, %v108_v16 }
  0x66   :  { %6691 = vmatmul.msk.f32.gmra.mxu0 %vm122_vm0, %v111_v19  ;;  %6705 = vmatmul.msk.f32.gmra.mxu1 %vm122_vm0, %v109_v17 }
  0x6e   :  { %6692 = vmatmul.msk.f32.gmra.mxu0 %vm122_vm0, %v112_v20  ;;  %6706 = vmatmul.msk.f32.gmra.mxu1 %vm122_vm0, %v110_v18 }
  0x76   :  { %6693 = vmatmul.msk.f32.gmra.mxu0 %vm122_vm0, %v113_v21  ;;  %6707 = vmatmul.msk.f32.gmra.mxu1 %vm122_vm0, %v111_v19 }
  0x7e   :  { %6694 = vmatmul.msk.f32.gmra.mxu0 %vm122_vm0, %v114_v22  ;;  %6708 = vmatmul.msk.f32.gmra.mxu1 %vm122_vm0, %v112_v20 }
  0x86   :  { %6695 = vmatmul.msk.f32.gmra.mxu0 %vm122_vm0, %v115_v23  ;;  %6709 = vmatmul.msk.f32.gmra.mxu1 %vm122_vm0, %v113_v21 }
  0x8e   :  { %6710 = vmatmul.msk.f32.gmra.mxu1 %vm122_vm0, %v114_v22 }
  0x96   :  { %6711 = vmatmul.msk.f32.gmra.mxu1 %vm122_vm0, %v115_v23 }
  0x9b   :  { %v7654_v24 = vpop.f32.mrf.mxu0  ;;  %v7656_v25 = vpop.f32.mrf.mxu1 }
  0x9c   :  { %10696 = vst [vmem:[#allocation17_spill] sm:$0xff] %v7654_v24  ;;  %1682 = vrot.lane.b32.xlu0 %v7654_v24, %s7555_s2 }
  0x9d   :  { %10697 = vst [vmem:[#allocation18_spill] sm:$0xff] %v7656_v25 }
  0x9e   :  { %6712 = vmatmul.msk.f32.gmra.mxu1 %vm122_vm0, %v116_v5 }
  0xa3   :  { %v7661_v26 = vpop.f32.mrf.mxu0  ;;  %v7663_v27 = vpop.f32.mrf.mxu1 }
  0xa4   :  { %10698 = vst [vmem:[#allocation19_spill] sm:$0xff] %v7661_v26  ;;  %2102 = vrot.lane.b32.xlu1 %v7663_v27, %s7555_s2  ;;  %2074 = vrot.lane.b32.xlu0 %v7656_v25, %s7555_s2 }
  0xa5   :  { %10699 = vst [vmem:[#allocation20_spill] sm:$0xff] %v7663_v27 }
  0xa6   :  { %6713 = vmatmul.msk.f32.gmra.mxu1 %vm122_vm0, %v117_v11 }
  0xab   :  { %v7670_v28 = vpop.f32.mrf.mxu0  ;;  %v7672_v29 = vpop.f32.mrf.mxu1 }
  0xac   :  { %10700 = vst [vmem:[#allocation21_spill] sm:$0xff] %v7670_v28  ;;  %1684 = vrot.lane.b32.xlu1 %v7672_v29, %s7555_s2  ;;  %6714 = vmatpush.xpose.msk.msra.mxu1 %vm305_vm1, %v7672_v29 }
  0xad   :  { %10701 = vst [vmem:[#allocation22_spill] sm:$0xff] %v7672_v29  ;;  %1710 = vrot.lane.b32.xlu0 %v7661_v26, %s7555_s2 }
  0xaf   :  { %6715 = vmatmul.msk.f32.vlgmr.msra.gmra.mxu1 %vm305_vm1, %v7654_v24 }
  0xb3   :  { %v7682_v30 = vpop.f32.mrf.mxu0  ;;  %v7684_v31 = vpop.f32.mrf.mxu1 }
  0xb4   :  { %10702 = vst [vmem:[#allocation23_spill] sm:$0xff] %v7682_v30  ;;  %v7688_v32 = vpack.i.bf16 %v7684_v31, %v7672_v29  ;;  %6716 = vmatpush.xpose.msk.msrb.mxu1 %vm305_vm1, %v7684_v31 }
  0xb5   :  { %10703 = vst [vmem:[#allocation24_spill] sm:$0xff] %v7684_v31  ;;  %1738 = vrot.lane.b32.xlu0 %v7670_v28, %s7555_s2 }
  0xb6   :  { %10704 = vst [vmem:[#allocation25_spill] sm:$0xff] %v7688_v32  ;;  %6958 = vrot.lane.b32.xlu2 %v7688_v32, %s7556_s5 }
  0xb7   :  { %6717 = vmatmul.msk.f32.vlgmr.msrb.gmra.mxu1 %vm305_vm1, %v7661_v26 }
  0xbb   :  { %v7698_v33 = vpop.f32.mrf.mxu0  ;;  %v7700_v34 = vpop.f32.mrf.mxu1 }
  0xbc   :  { %10705 = vst [vmem:[#allocation26_spill] sm:$0xff] %v7698_v33  ;;  %6718 = vmatpush.xpose.msk.msra.mxu2 %vm305_vm1, %v7700_v34  ;;  %1794 = vrot.lane.b32.xlu1 %v7698_v33, %s7555_s2 }
  0xbd   :  { %10706 = vst [vmem:[#allocation27_spill] sm:$0xff] %v7700_v34  ;;  %6953 = vrot.lane.b32.xlu0 %v7688_v32, %s7557_s25 }
  0xbf   :  { %6719 = vmatmul.msk.f32.vlgmr.msra.gmra.mxu2 %vm305_vm1, %v7670_v28 }
  0xc3   :  { %v7710_v35 = vpop.f32.mrf.mxu0  ;;  %v7712_v36 = vpop.f32.mrf.mxu1 }
  0xc4   :  { %10707 = vst [vmem:[#allocation28_spill] sm:$0xff] %v7710_v35  ;;  %6720 = vmatpush.xpose.msk.msra.mxu3 %vm305_vm1, %v7712_v36  ;;  %v6962_v37 = vpack.i.bf16 %v7712_v36, %v7700_v34 }
  0xc5   :  { %10708 = vst [vmem:[#allocation29_spill] sm:$0xff] %v7712_v36  ;;  %1712 = vrot.lane.b32.xlu0 %v7684_v31, %s7555_s2 }
  0xc6   :  { %6963 = vrot.lane.b32.xlu1 %v6962_v37, %s7557_s25 }
  0xc7   :  { %6721 = vmatmul.msk.f32.vlgmr.msra.gmra.mxu3 %vm305_vm1, %v7682_v30 }
  0xcb   :  { %v7723_v38 = vpop.f32.mrf.mxu0  ;;  %v7725_v39 = vpop.f32.mrf.mxu1 }
  0xcc   :  { %10709 = vst [vmem:[#allocation30_spill] sm:$0xff] %v7723_v38  ;;  %6722 = vmatpush.xpose.msk.msrb.mxu2 %vm305_vm1, %v7725_v39  ;;  %1796 = vrot.lane.b32.xlu2 %v7725_v39, %s7555_s2 }
  0xcd   :  { %10710 = vst [vmem:[#allocation31_spill] sm:$0xff] %v7725_v39  ;;  %1766 = vrot.lane.b32.xlu0 %v7682_v30, %s7555_s2 }
  0xce   :  { %1822 = vrot.lane.b32.xlu1 %v7710_v35, %s7555_s2 }
  0xcf   :  { %6723 = vmatmul.msk.f32.vlgmr.msrb.gmra.mxu2 %vm305_vm1, %v7698_v33 }
  0xd3   :  { %v7737_v40 = vpop.f32.mrf.mxu0  ;;  %v7739_v41 = vpop.f32.mrf.mxu1 }
  0xd4   :  { %10711 = vst [vmem:[#allocation32_spill] sm:$0xff] %v7737_v40  ;;  %6724 = vmatpush.xpose.msk.msrb.mxu3 %vm305_vm1, %v7739_v41  ;;  %1850 = vrot.lane.b32.xlu2 %v7723_v38, %s7555_s2  ;;  %v6967_v46 = vpack.i.bf16 %v7739_v41, %v7725_v39 }
  0xd5   :  { %10712 = vst [vmem:[#allocation33_spill] sm:$0xff] %v7739_v41  ;;  %1740 = vrot.lane.b32.xlu0 %v7700_v34, %s7555_s2 }
  0xd6   :  { %1878 = vrot.lane.b32.xlu1 %v7737_v40, %s7555_s2 }
  0xd7   :  { %6725 = vmatmul.msk.f32.vlgmr.msrb.gmra.mxu3 %vm305_vm1, %v7710_v35 }
  0xdb   :  { %v7751_v42 = vpop.f32.mrf.mxu0  ;;  %v7753_v43 = vpop.f32.mrf.mxu1 }
  0xdc   :  { %10713 = vst [vmem:[#allocation34_spill] sm:$0xff] %v7751_v42  ;;  %6726 = vmatpush.xpose.msk.msra.mxu2 %vm305_vm1, %v7753_v43  ;;  %1824 = vrot.lane.b32.xlu2 %v7739_v41, %s7555_s2 }
  0xdd   :  { %10714 = vst [vmem:[#allocation35_spill] sm:$0xff] %v7753_v43  ;;  %1768 = vrot.lane.b32.xlu0 %v7712_v36, %s7555_s2 }
  0xdf   :  { %6727 = vmatmul.msk.f32.vlgmr.msra.gmra.mxu2 %vm305_vm1, %v7723_v38 }
  0xe3   :  { %v7763_v44 = vpop.f32.mrf.mxu0  ;;  %v7765_v45 = vpop.f32.mrf.mxu1 }
  0xe4   :  { %10715 = vst [vmem:[#allocation36_spill] sm:$0xff] %v7763_v44  ;;  %6728 = vmatpush.xpose.msk.msra.mxu3 %vm305_vm1, %v7765_v45  ;;  %1934 = vrot.lane.b32.xlu1 %v7763_v44, %s7555_s2  ;;  %v6977_v49 = vpack.i.bf16 %v7765_v45, %v7753_v43 }
  0xe5   :  { %10716 = vst [vmem:[#allocation37_spill] sm:$0xff] %v7765_v45  ;;  %6968 = vrot.lane.b32.xlu0 %v6967_v46, %s7557_s25  ;;  %1906 = vrot.lane.b32.xlu2 %v7751_v42, %s7555_s2 }
  0xe7   :  { %6729 = vmatmul.msk.f32.vlgmr.msra.gmra.mxu3 %vm305_vm1, %v7737_v40 }
  0xeb   :  { %v7778_v47 = vpop.f32.mrf.mxu0  ;;  %v7780_v48 = vpop.f32.mrf.mxu1 }
  0xec   :  { %10717 = vst [vmem:[#allocation38_spill] sm:$0xff] %v7778_v47  ;;  %6730 = vmatpush.xpose.msk.msrb.mxu2 %vm305_vm1, %v7780_v48  ;;  %1880 = vrot.lane.b32.xlu1 %v7765_v45, %s7555_s2  ;;  %v6982_v50 = vpack.i.bf16 %v7712_v36, %v7780_v48 }
  0xed   :  { %10718 = vst [vmem:[#allocation39_spill] sm:$0xff] %v7780_v48  ;;  %6973 = vrot.lane.b32.xlu0 %v6967_v46, %s7556_s5  ;;  %6978 = vrot.lane.b32.xlu2 %v6977_v49, %s7557_s25 }
  0xef   :  { %6731 = vmatmul.msk.f32.vlgmr.msrb.gmra.mxu2 %vm305_vm1, %v7751_v42 }
  0xf3   :  { %v7794_v51 = vpop.f32.mrf.mxu0  ;;  %v7796_v52 = vpop.f32.mrf.mxu1 }
  0xf4   :  { %10719 = vst [vmem:[#allocation40_spill] sm:$0xff] %v7794_v51  ;;  %6983 = vrot.lane.b32.xlu1 %v6982_v50, %s7556_s5  ;;  %6732 = vmatpush.xpose.msk.msrb.mxu3 %vm305_vm1, %v7796_v52  ;;  %v6987_v58 = vpack.i.bf16 %v7796_v52, %v7780_v48 }
  0xf5   :  { %10720 = vst [vmem:[#allocation41_spill] sm:$0xff] %v7796_v52  ;;  %1852 = vrot.lane.b32.xlu0 %v7753_v43, %s7555_s2 }
  0xf7   :  { %6733 = vmatmul.msk.f32.vlgmr.msrb.gmra.mxu3 %vm305_vm1, %v7763_v44 }
  0xfb   :  { %v7805_v53 = vpop.f32.mrf.mxu0  ;;  %v7807_v54 = vpop.f32.mrf.mxu1 }
  0xfc   :  { %10721 = vst [vmem:[#allocation42_spill] sm:$0xff] %v7805_v53  ;;  %6734 = vmatpush.xpose.msk.msra.mxu2 %vm305_vm1, %v7807_v54  ;;  %2018 = vrot.lane.b32.xlu2 %v7805_v53, %s7555_s2 }
  0xfd   :  { %10722 = vst [vmem:[#allocation43_spill] sm:$0xff] %v7807_v54  ;;  %1908 = vrot.lane.b32.xlu0 %v7780_v48, %s7555_s2  ;;  %1936 = vrot.lane.b32.xlu1 %v7796_v52, %s7555_s2 }
  0xff   :  { %6735 = vmatmul.msk.f32.vlgmr.msra.gmra.mxu2 %vm305_vm1, %v7778_v47 }
 0x103   :  { %v7819_v55 = vpop.f32.mrf.mxu0  ;;  %v7821_v56 = vpop.f32.mrf.mxu1 }
 0x104   :  { %10723 = vst [vmem:[#allocation44_spill] sm:$0xff] %v7819_v55  ;;  %6736 = vmatpush.xpose.msk.msra.mxu3 %vm305_vm1, %v7821_v56  ;;  %2046 = vrot.lane.b32.xlu2 %v7819_v55, %s7555_s2  ;;  %v6992_v1 = vpack.i.bf16 %v7821_v56, %v7807_v54 }
 0x105   :  { %10724 = vst [vmem:[#allocation45_spill] sm:$0xff] %v7821_v56  ;;  %1962 = vrot.lane.b32.xlu0 %v7778_v47, %s7555_s2  ;;  %1964 = vrot.lane.b32.xlu1 %v7807_v54, %s7555_s2 }
 0x107   :  { %6737 = vmatmul.msk.f32.vlgmr.msra.gmra.mxu3 %vm305_vm1, %v7794_v51 }
 0x10b   :  { %v7833_v57 = vpop.f32.mrf.mxu1 }
 0x10c   :  { %10725 = vst [vmem:[#allocation46_spill] sm:$0xff] %v7833_v57  ;;  %2020 = vrot.lane.b32.xlu2 %v7833_v57, %s7555_s2  ;;  %6738 = vmatpush.xpose.msk.msrb.mxu2 %vm305_vm1, %v7833_v57  ;;  %v7850_v60 = vpack.i.bf16 %v7833_v57, %v7796_v52 }
 0x10d   :  { %6988 = vrot.lane.b32.xlu0 %v6987_v58, %s7557_s25  ;;  %1992 = vrot.lane.b32.xlu1 %v7821_v56, %s7555_s2 }
 0x10e   :  { %v7844_v59 = vpop.permute.xlu0 %1682  ;;  %10727 = vst [vmem:[#allocation48_spill] sm:$0xff] %v7850_v60 }
 0x10f   :  { %10726 = vst [vmem:[#allocation47_spill] sm:$0xff] %v7844_v59  ;;  %6739 = vmatmul.msk.f32.vlgmr.msrb.gmra.mxu2 %vm305_vm1, %v7805_v53 }
 0x110   :  { %v7876_v3 = vpop.permute.xlu2 %6958 }
 0x111   :  { %10729 = vst [vmem:[#allocation50_spill] sm:$0xff] %v7876_v3 }
 0x113   :  { %v7852_v61 = vpop.f32.mrf.mxu1 }
 0x114   :  { %10728 = vst [vmem:[#allocation49_spill] sm:$0xff] %v7852_v61  ;;  %6740 = vmatpush.xpose.msk.msrb.mxu3 %vm305_vm1, %v7852_v61  ;;  %6998 = vrot.lane.b32.xlu2 %v7850_v60, %s7556_s5  ;;  %v7002_v63 = vpack.i.bf16 %v7852_v61, %v7833_v57 }
 0x115   :  { %1990 = vrot.lane.b32.xlu0 %v7794_v51, %s7555_s2 }
 0x116   :  { %v7860_v62 = vpop.permute.xlu0 %2074  ;;  %v7870_v2 = vpop.permute.xlu1 %2102 }
 0x117   :  { %6741 = vmatmul.msk.f32.vlgmr.msrb.gmra.mxu3 %vm305_vm1, %v7819_v55 }
 0x11b   :  { %v7866_v0 = vpop.f32.mrf.mxu1 }
 0x11c   :  { %6742 = vmatpush.xpose.msk.msra.mxu2 %vm305_vm1, %v7866_v0  ;;  %7003 = vrot.lane.b32.xlu2 %v7002_v63, %s7557_s25 }
 0x11d   :  { %6993 = vrot.lane.b32.xlu0 %v6992_v1, %s7557_s25 }
 0x11e   :  { %v7890_v7 = vpop.permute.xlu1 %1684 }
 0x11f   :  { %v7878_v4 = vpop.permute.xlu0 %1710  ;;  %6743 = vmatmul.msk.f32.vlgmr.msra.gmra.mxu2 %vm305_vm1, %v7656_v25  ;;  %10732 = vst [vmem:[#allocation53_spill] sm:$0xff] %v7890_v7  ;;  %v7960_v25 = vpack.i.bf16 %v7765_v45, %v7700_v34 }
 0x120   :  { %10730 = vst [vmem:[#allocation51_spill] sm:$0xff] %v7878_v4 }
 0x121   :  { %10745 = vst [vmem:[#allocation66_spill] sm:$0xff] %v7960_v25 }
 0x123   :  { %v7882_v5 = vpop.f32.mrf.mxu1 }
 0x124   :  { %10731 = vst [vmem:[#allocation52_spill] sm:$0xff] %v7882_v5  ;;  %6744 = vmatpush.xpose.msk.msra.mxu3 %vm305_vm1, %v7882_v5  ;;  %2048 = vrot.lane.b32.xlu2 %v7852_v61, %s7555_s2  ;;  %v7007_v6 = vpack.i.bf16 %v7882_v5, %v7866_v0 }
 0x126   :  { %7008 = vrot.lane.b32.xlu0 %v7007_v6, %s7557_s25  ;;  %v7893_v8 = vpop.permute.xlu2 %1796 }
 0x127   :  { %10733 = vst [vmem:[#allocation54_spill] sm:$0xff] %v7893_v8  ;;  %v1739_v9 = vpop.permute.xlu0 %1738  ;;  %6745 = vmatmul.msk.f32.vlgmr.msra.gmra.mxu3 %vm305_vm1, %v7663_v27 }
 0x12c   :  { %2076 = vrot.lane.b32.xlu2 %v7866_v0, %s7555_s2  ;;  %v329_v49 = vpop.f32.mrf.mxu1 }
 0x12d   :  { %v7919_v1 = vmul.f32 0.35355338, %v329_v49 }
 0x12e   :  { %v7899_v10 = vpop.permute.xlu1 %1794  ;;  %v1851_v14 = vpop.permute.xlu2 %1850 }
 0x12f   :  { %10734 = vst [vmem:[#allocation55_spill] sm:$0xff] %v7899_v10  ;;  %v6954_v11 = vpop.permute.xlu0 %6953 }
 0x130   :  { %v6956_v12 = vunpack.i.h.bf16 %v6954_v11  ;;  %v6955_v13 = vunpack.i.l.bf16 %v6954_v11 }
 0x132   :  { %1271 = vmatpush.msrb.mxu2 %v6955_v13  ;;  %1297 = vmatpush.msrb.mxu3 %v6956_v12 }
 0x134   :  { %2104 = vrot.lane.b32.xlu2 %v7882_v5, %s7555_s2 }
 0x136   :  { %v7905_v19 = vpop.permute.xlu2 %1824 }
 0x137   :  { %v7903_v15 = vpop.permute.xlu0 %1712  ;;  %10736 = vst [vmem:[#allocation57_spill] sm:$0xff] %v7905_v19 }
 0x138   :  { %10735 = vst [vmem:[#allocation56_spill] sm:$0xff] %v7903_v15  ;;  %v6964_v16 = vpop.permute.xlu1 %6963 }
 0x139   :  { %v6966_v17 = vunpack.i.h.bf16 %v6964_v16  ;;  %v6965_v18 = vunpack.i.l.bf16 %v6964_v16  ;;  %v738_v16 = vsel %vm305_vm1, %v7919_v1, -inf }
 0x13b   :  { %1323 = vmatpush.msra.mxu2 %v6965_v18  ;;  %1349 = vmatpush.msra.mxu3 %v6966_v17  ;;  %v355_v17 = vpop.f32.mrf.mxu1 }
 0x13f   :  { %v1767_v20 = vpop.permute.xlu0 %1766  ;;  %v7911_v37 = vpop.permute.xlu2 %1906 }
 0x140   :  { %v7907_v22 = vpop.permute.xlu1 %1822  ;;  %10738 = vst [vmem:[#allocation59_spill] sm:$0xff] %v7911_v37 }
 0x141   :  { %10737 = vst [vmem:[#allocation58_spill] sm:$0xff] %v7907_v22 }
 0x142   :  { %v381_v21 = vpop.f32.mrf.mxu2 }
 0x143   :  { %v7909_v23 = vmul.f32 0.35355338, %v381_v21 }
 0x145   :  { %v744_v46 = vsel %vm305_vm1, %v7909_v23, -inf }
 0x146   :  { %745 = vmax.xlane.f32.xlu1 %v744_v46 }
 0x147   :  { %v1741_v50 = vpop.permute.xlu0 %1740  ;;  %v7923_v12 = vpop.permute.xlu2 %6978 }
 0x148   :  { %6766 = vmatpush.xpose.msk.msrb.mxu0 %vm305_vm1, %v1741_v50  ;;  %v1879_v6 = vpop.permute.xlu1 %1878 }
 0x14a   :  { %v407_v58 = vpop.f32.mrf.mxu3 }
 0x14b   :  { %v7916_v63 = vmul.f32 0.35355338, %v407_v58  ;;  %6767 = vmatmul.msk.f32.vlgmr.msrb.gmra.mxu0 %vm305_vm1, %v1739_v9  ;;  %v7929_v9 = vmul.f32 0.35355338, %v355_v17 }
 0x14d   :  { %v747_v11 = vsel %vm305_vm1, %v7916_v63, -inf  ;;  %v741_v58 = vsel %vm305_vm1, %v7929_v9, -inf }
 0x14e   :  { %748 = vmax.xlane.f32.xlu1 %v747_v11 }
 0x14f   :  { %v1769_v13 = vpop.permute.xlu0 %1768 }
 0x150   :  { %6768 = vmatpush.xpose.msk.msra.mxu1 %vm305_vm1, %v1769_v13  ;;  %739 = vmax.xlane.f32.xlu0 %v738_v16 }
 0x152   :  { %v433_v18 = vpop.f32.mrf.mxu2 }
 0x153   :  { %6769 = vmatmul.msk.f32.vlgmr.msra.gmra.mxu1 %vm305_vm1, %v1767_v20  ;;  %v7933_v46 = vmul.f32 0.35355338, %v433_v18 }
 0x155   :  { %v750_v11 = vsel %vm305_vm1, %v7933_v46, -inf }
 0x156   :  { %v7931_v21 = vpop.permute.xlu2 %2018  ;;  %v7935_v49 = vpop.permute.xlu1 %1934 }
 0x157   :  { %10739 = vst [vmem:[#allocation60_spill] sm:$0xff] %v7931_v21  ;;  %v7937_v50 = vpop.permute.xlu0 %6968 }
 0x158   :  { %10740 = vst [vmem:[#allocation61_spill] sm:$0xff] %v7935_v49  ;;  %742 = vmax.xlane.f32.xlu0 %v741_v58 }
 0x15a   :  { %v459_v13 = vpop.f32.mrf.mxu3 }
 0x15b   :  { %v7945_v16 = vmul.f32 0.35355338, %v459_v13 }
 0x15d   :  { %751 = vmax.xlane.f32.xlu2 %v750_v11  ;;  %v753_v60 = vsel %vm305_vm1, %v7945_v16, -inf }
 0x15e   :  { %v7943_v20 = vpop.permute.xlu2 %2046  ;;  %v1881_v17 = vpop.permute.xlu1 %1880 }
 0x15f   :  { %10741 = vst [vmem:[#allocation62_spill] sm:$0xff] %v7943_v20  ;;  %v7947_v18 = vpop.permute.xlu0 %6973  ;;  %6776 = vmatpush.xpose.msk.msrb.mxu1 %vm305_vm1, %v1881_v17 }
 0x160   :  { %10742 = vst [vmem:[#allocation63_spill] sm:$0xff] %v7947_v18 }
 0x162   :  { %6777 = vmatmul.msk.f32.vlgmr.msrb.gmra.mxu1 %vm305_vm1, %v1879_v6  ;;  %v485_v13 = vpop.f32.mrf.mxu2 }
 0x165   :  { %754 = vmax.xlane.f32.xlu2 %v753_v60 }
 0x166   :  { %v7953_v58 = vpop.permute.xlu2 %2020  ;;  %v7955_v32 = vpop.permute.xlu1 %6983 }
 0x167   :  { %10743 = vst [vmem:[#allocation64_spill] sm:$0xff] %v7953_v58  ;;  %v1853_v11 = vpop.permute.xlu0 %1852 }
 0x168   :  { %10744 = vst [vmem:[#allocation65_spill] sm:$0xff] %v7955_v32  ;;  %6774 = vmatpush.xpose.msk.msra.mxu0 %vm305_vm1, %v1853_v11 }
 0x16a   :  { %v511_v27 = vpop.f32.mrf.mxu3 }
 0x16b   :  { %v7962_v17 = vmul.f32 0.35355338, %v511_v27  ;;  %6775 = vmatmul.msk.f32.vlgmr.msra.gmra.mxu0 %vm305_vm1, %v1851_v14 }
 0x16c   :  { %7013 = vrot.lane.b32.xlu0 %v7960_v25, %s7556_s5 }
 0x16d   :  { %v759_v60 = vsel %vm305_vm1, %v7962_v17, -inf }
 0x16e   :  { %760 = vmax.xlane.f32.xlu1 %v759_v60  ;;  %v7969_v6 = vpop.permute.xlu2 %6998 }
 0x16f   :  { %10746 = vst [vmem:[#allocation67_spill] sm:$0xff] %v7969_v6  ;;  %v7971_v11 = vpop.permute.xlu0 %1908  ;;  %v7973_v20 = vpop.permute.xlu1 %1936 }
 0x170   :  { %10747 = vst [vmem:[#allocation68_spill] sm:$0xff] %v7971_v11 }
 0x171   :  { %10748 = vst [vmem:[#allocation69_spill] sm:$0xff] %v7973_v20 }
 0x172   :  { %v537_v21 = vpop.f32.mrf.mxu2 }
 0x173   :  { %v7975_v18 = vmul.f32 0.35355338, %v537_v21 }
 0x175   :  { %v762_v27 = vsel %vm305_vm1, %v7975_v18, -inf }
 0x176   :  { %763 = vmax.xlane.f32.xlu2 %v762_v27  ;;  %v7979_v14 = vpop.permute.xlu2 %7003 }
 0x177   :  { %10749 = vst [vmem:[#allocation70_spill] sm:$0xff] %v7979_v14  ;;  %v1963_v25 = vpop.permute.xlu0 %1962  ;;  %v1965_v49 = vpop.permute.xlu1 %1964 }
 0x178   :  { %6782 = vmatpush.xpose.msk.msrb.mxu0 %vm305_vm1, %v1965_v49 }
 0x17a   :  { %v563_v3 = vpop.f32.mrf.mxu3 }
 0x17b   :  { %6783 = vmatmul.msk.f32.vlgmr.msrb.gmra.mxu0 %vm305_vm1, %v1963_v25 }
 0x17e   :  { %v7983_v60 = vpop.permute.xlu2 %2048 }
 0x17f   :  { %10750 = vst [vmem:[#allocation71_spill] sm:$0xff] %v7983_v60  ;;  %v7985_v6 = vpop.permute.xlu0 %6988  ;;  %v1993_v37 = vpop.permute.xlu1 %1992 }
 0x180   :  { %6784 = vmatpush.xpose.msk.msra.mxu1 %vm305_vm1, %v1993_v37 }
 0x182   :  { %v589_v21 = vpop.f32.mrf.mxu2 }
 0x183   :  { %v7988_v22 = vmul.f32 0.35355338, %v589_v21  ;;  %v6986_v21 = vunpack.i.h.bf16 %v7955_v32 }
 0x185   :  { %v768_v27 = vsel %vm305_vm1, %v7988_v22, -inf }
 0x186   :  { %769 = vmax.xlane.f32.xlu1 %v768_v27  ;;  %v2077_v58 = vpop.permute.xlu2 %2076  ;;  %v8002_v27 = vmul.f32 0.35355338, %v485_v13 }
 0x187   :  { %v1991_v10 = vpop.permute.xlu0 %1990  ;;  %6790 = vmatpush.xpose.msk.msra.mxu0 %vm305_vm1, %v2077_v58 }
 0x188   :  { %6785 = vmatmul.msk.f32.vlgmr.msra.gmra.mxu1 %vm305_vm1, %v1991_v10  ;;  %v8008_v10 = vmul.f32 0.35355338, %v563_v3 }
 0x18a   :  { %v615_v25 = vpop.f32.mrf.mxu3  ;;  %6791 = vmatmul.msk.f32.vlgmr.msra.gmra.mxu0 %vm305_vm1, %v7860_v62  ;;  %v756_v62 = vsel %vm305_vm1, %v8002_v27, -inf }
 0x18b   :  { %v7996_v49 = vmul.f32 0.35355338, %v615_v25 }
 0x18d   :  { %v771_v37 = vsel %vm305_vm1, %v7996_v49, -inf }
 0x18e   :  { %772 = vmax.xlane.f32.xlu2 %v771_v37  ;;  %v2105_v60 = vpop.permute.xlu2 %2104  ;;  %v765_v37 = vsel %vm305_vm1, %v8008_v10, -inf }
 0x18f   :  { %6792 = vmatpush.xpose.msk.msrb.mxu1 %vm305_vm1, %v2105_v60  ;;  %v8026_v4 = vpop.permute.xlu0 %6993 }
 0x192   :  { %6793 = vmatmul.msk.f32.vlgmr.msrb.gmra.mxu1 %vm305_vm1, %v7870_v2  ;;  %v641_v32 = vpop.f32.mrf.mxu2 }
 0x193   :  { %2757 = vmatpush.msra.mxu1 %v6986_v21  ;;  %v8016_v60 = vmul.f32 0.35355338, %v641_v32 }
 0x195   :  { %v774_v2 = vsel %vm305_vm1, %v8016_v60, -inf }
 0x196   :  { %757 = vmax.xlane.f32.xlu0 %v756_v62 }
 0x198   :  { %v8031_v11 = vpop.permute.xlu0 %7008 }
 0x199   :  { %10751 = vst [vmem:[#allocation72_spill] sm:$0xff] %v8031_v11 }
 0x19a   :  { %v667_v58 = vpop.f32.mrf.mxu3 }
 0x19b   :  { %v8010_v25 = vmul.f32 0.35355338, %v667_v58 }
 0x19d   :  { %v777_v13 = vsel %vm305_vm1, %v8010_v25, -inf }
 0x19e   :  { %766 = vmax.xlane.f32.xlu0 %v765_v37  ;;  %778 = vmax.xlane.f32.xlu2 %v777_v13 }
 0x1a2   :  { %v693_v21 = vpop.f32.mrf.mxu2 }
 0x1a3   :  { %v8020_v3 = vmul.f32 0.35355338, %v693_v21 }
 0x1a5   :  { %v780_v62 = vsel %vm305_vm1, %v8020_v3, -inf }
 0x1a6   :  { %775 = vmax.xlane.f32.xlu0 %v774_v2 }
 0x1aa   :  { %v719_v58 = vpop.f32.mrf.mxu3 }
 0x1ab   :  { %v8024_v20 = vmul.f32 0.35355338, %v719_v58 }
 0x1ad   :  { %v783_v32 = vsel %vm305_vm1, %v8024_v20, -inf }
 0x1ae   :  { %781 = vmax.xlane.f32.xlu0 %v780_v62 }
 0x1b6   :  { %784 = vmax.xlane.f32.xlu0 %v783_v32 }
 0x1b9   :  { %v746_v37 = vpop.xlane.xlu1 %745 }
 0x1ba   :  { %v788_v13 = vsub.f32 %v7909_v23, %v746_v37 }
 0x1bc   :  { %v806_v2 = vmul.f32 1.442695, %v788_v13 }
 0x1be   :  { %7108 = vpow2.f32 %v806_v2 }
 0x1c1   :  { %v749_v15 = vpop.xlane.xlu1 %748 }
 0x1c3   :  { %v740_v21 = vpop.xlane.xlu0 %739 }
 0x1c4   :  { %v8033_v59 = vpop.eup %7108  ;;  %v786_v62 = vsub.f32 %v7919_v1, %v740_v21  ;;  %v789_v1 = vsub.f32 %v7916_v63, %v749_v15 }
 0x1c5   :  { %v840_v58 = vsel %vm305_vm1, %v8033_v59, 0.0 }
 0x1c6   :  { %v802_v19 = vmul.f32 1.442695, %v786_v62  ;;  %841 = vadd.xlane.f32.xlu2 %v840_v58 }
 0x1c8   :  { %7110 = vpow2.f32 %v802_v19  ;;  %v1763_v8 = vpop.f32.mrf.mxu0 }
 0x1c9   :  { %v8038_v32 = vmul.f32 0.35355338, %v1763_v8 }
 0x1cb   :  { %10752 = vst [vmem:[#allocation73_spill] sm:$0xff] %v8038_v32  ;;  %v743_v23 = vpop.xlane.xlu0 %742  ;;  %v2152_v37 = vsel %vm305_vm1, %v8038_v32, -inf  ;;  %v808_v32 = vmul.f32 1.442695, %v789_v1 }
 0x1cc   :  { %v787_v13 = vsub.f32 %v7929_v9, %v743_v23  ;;  %2153 = vmax.xlane.f32.xlu0 %v2152_v37 }
 0x1ce   :  { %v8043_v2 = vpop.eup %7110  ;;  %v804_v21 = vmul.f32 1.442695, %v787_v13 }
 0x1cf   :  { %v834_v62 = vsel %vm305_vm1, %v8043_v2, 0.0 }
 0x1d0   :  { %7112 = vpow2.f32 %v804_v21  ;;  %v1791_v19 = vpop.f32.mrf.mxu1  ;;  %835 = vadd.xlane.f32.xlu1 %v834_v62  ;;  %v752_v8 = vpop.xlane.xlu2 %751 }
 0x1d1   :  { %v8048_v58 = vmul.f32 0.35355338, %v1791_v19  ;;  %v790_v7 = vsub.f32 %v7933_v46, %v752_v8 }
 0x1d3   :  { %10753 = vst [vmem:[#allocation74_spill] sm:$0xff] %v8048_v58  ;;  %v810_v11 = vmul.f32 1.442695, %v790_v7  ;;  %v2155_v9 = vsel %vm305_vm1, %v8048_v58, -inf }
 0x1d4   :  { %2156 = vmax.xlane.f32.xlu0 %v2155_v9 }
 0x1d5   :  { %7114 = vpow2.f32 %v810_v11 }
 0x1d6   :  { %v8053_v15 = vpop.eup %7112  ;;  %7116 = vpow2.f32 %v808_v32 }
 0x1d7   :  { %v837_v63 = vsel %vm305_vm1, %v8053_v15, 0.0 }
 0x1d8   :  { %838 = vadd.xlane.f32.xlu1 %v837_v63  ;;  %v755_v37 = vpop.xlane.xlu2 %754 }
 0x1d9   :  { %v791_v46 = vsub.f32 %v7945_v16, %v755_v37 }
 0x1db   :  { %v8057_v23 = vpop.eup %7114  ;;  %v812_v19 = vmul.f32 1.442695, %v791_v46 }
 0x1dc   :  { %v8059_v13 = vpop.eup %7116  ;;  %v846_v7 = vsel %vm305_vm1, %v8057_v23, 0.0 }
 0x1dd   :  { %847 = vadd.xlane.f32.xlu2 %v846_v7  ;;  %v843_v32 = vsel %vm305_vm1, %v8059_v13, 0.0  ;;  %7118 = vpow2.f32 %v812_v19 }
 0x1de   :  { %v7014_v1 = vpop.permute.xlu0 %7013 }
 0x1df   :  { %v7016_v11 = vunpack.i.h.bf16 %v7014_v1  ;;  %v7015_v21 = vunpack.i.l.bf16 %v7014_v1  ;;  %v1903_v62 = vpop.f32.mrf.mxu1 }
 0x1e0   :  { %844 = vadd.xlane.f32.xlu1 %v843_v32  ;;  %v8066_v8 = vmul.f32 0.35355338, %v1903_v62 }
 0x1e1   :  { %2731 = vmatpush.msrb.mxu0 %v7015_v21  ;;  %2861 = vmatpush.msrb.mxu1 %v7016_v11  ;;  %v761_v46 = vpop.xlane.xlu1 %760 }
 0x1e2   :  { %10754 = vst [vmem:[#allocation75_spill] sm:$0xff] %v8066_v8  ;;  %v2167_v9 = vsel %vm305_vm1, %v8066_v8, -inf }
 0x1e3   :  { %v8074_v7 = vpop.eup %7118 }
 0x1e4   :  { %v849_v1 = vsel %vm305_vm1, %v8074_v7, 0.0 }
 0x1e8   :  { %v1875_v63 = vpop.f32.mrf.mxu0  ;;  %2168 = vmax.xlane.f32.xlu1 %v2167_v9 }
 0x1e9   :  { %v8070_v16 = vmul.f32 0.35355338, %v1875_v63  ;;  %v764_v11 = vpop.xlane.xlu2 %763 }
 0x1eb   :  { %v2164_v37 = vsel %vm305_vm1, %v8070_v16, -inf }
 0x1ec   :  { %2165 = vmax.xlane.f32.xlu0 %v2164_v37 }
 0x1f0   :  { %850 = vadd.xlane.f32.xlu1 %v849_v1 }
 0x1f8   :  { %v1987_v1 = vpop.f32.mrf.mxu0 }
 0x1f9   :  { %v770_v21 = vpop.xlane.xlu1 %769 }
 0x1fa   :  { %v796_v32 = vsub.f32 %v7988_v22, %v770_v21 }
 0x1fc   :  { %v822_v62 = vmul.f32 1.442695, %v796_v32 }
 0x1fe   :  { %7120 = vpow2.f32 %v822_v62 }
 0x201   :  { %v773_v19 = vpop.xlane.xlu2 %772 }
 0x202   :  { %v797_v9 = vsub.f32 %v7996_v49, %v773_v19  ;;  %v793_v49 = vsub.f32 %v7962_v17, %v761_v46 }
 0x204   :  { %v8080_v63 = vpop.eup %7120  ;;  %v824_v8 = vmul.f32 1.442695, %v797_v9  ;;  %v816_v9 = vmul.f32 1.442695, %v793_v49 }
 0x205   :  { %10755 = vst [vmem:[#allocation76_spill] sm:$0xff] %v8080_v63  ;;  %v2015_v58 = vpop.f32.mrf.mxu1  ;;  %v864_v37 = vsel %vm305_vm1, %v8080_v63, 0.0 }
 0x206   :  { %v8084_v14 = vmul.f32 0.35355338, %v2015_v58  ;;  %865 = vadd.xlane.f32.xlu0 %v864_v37  ;;  %7122 = vpow2.f32 %v824_v8 }
 0x207   :  { %v2099_v63 = vpop.f32.mrf.mxu0 }
 0x208   :  { %10756 = vst [vmem:[#allocation77_spill] sm:$0xff] %v8084_v14  ;;  %v2179_v22 = vsel %vm305_vm1, %v8084_v14, -inf }
 0x209   :  { %2180 = vmax.xlane.f32.xlu1 %v2179_v22  ;;  %v758_v21 = vpop.xlane.xlu0 %757 }
 0x20a   :  { %v792_v32 = vsub.f32 %v8002_v27, %v758_v21  ;;  %v8097_v27 = vmul.f32 0.35355338, %v2099_v63  ;;  %v794_v63 = vsub.f32 %v7975_v18, %v764_v11 }
 0x20c   :  { %v814_v62 = vmul.f32 1.442695, %v792_v32  ;;  %v8090_v19 = vpop.eup %7122  ;;  %v2188_v21 = vsel %vm305_vm1, %v8097_v27, -inf  ;;  %v7017_v32 = vpack.i.bf16 %v7753_v43, %v7852_v61 }
 0x20d   :  { %10757 = vst [vmem:[#allocation78_spill] sm:$0xff] %v8090_v19  ;;  %v867_v58 = vsel %vm305_vm1, %v8090_v19, 0.0 }
 0x20e   :  { %7124 = vpow2.f32 %v814_v62 }
 0x20f   :  { %7126 = vpow2.f32 %v816_v9  ;;  %v818_v9 = vmul.f32 1.442695, %v794_v63 }
 0x211   :  { %868 = vadd.xlane.f32.xlu1 %v867_v58  ;;  %v767_v8 = vpop.xlane.xlu0 %766  ;;  %v779_v37 = vpop.xlane.xlu2 %778 }
 0x212   :  { %v799_v14 = vsub.f32 %v8010_v25, %v779_v37  ;;  %v8115_v37 = vmul.f32 0.35355338, %v1987_v1 }
 0x214   :  { %v8095_v22 = vpop.eup %7124  ;;  %v828_v17 = vmul.f32 1.442695, %v799_v14  ;;  %10759 = vst [vmem:[#allocation80_spill] sm:$0xff] %v8115_v37  ;;  %v2176_v11 = vsel %vm305_vm1, %v8115_v37, -inf }
 0x215   :  { %v852_v46 = vsel %vm305_vm1, %v8095_v22, 0.0  ;;  %v8105_v25 = vpop.eup %7126 }
 0x216   :  { %853 = vadd.xlane.f32.xlu2 %v852_v46  ;;  %7128 = vpow2.f32 %v828_v17  ;;  %v855_v62 = vsel %vm305_vm1, %v8105_v25, 0.0 }
 0x217   :  { %7130 = vpow2.f32 %v818_v9 }
 0x219   :  { %2189 = vmax.xlane.f32.xlu1 %v2188_v21  ;;  %v776_v49 = vpop.xlane.xlu0 %775  ;;  %v795_v21 = vsub.f32 %v8008_v10, %v767_v8 }
 0x21a   :  { %7018 = vrot.lane.b32.xlu0 %v7017_v32, %s7556_s5 }
 0x21b   :  { %v820_v32 = vmul.f32 1.442695, %v795_v21 }
 0x21c   :  { %v8109_v14 = vpop.eup %7128 }
 0x21d   :  { %10758 = vst [vmem:[#allocation79_spill] sm:$0xff] %v8109_v14  ;;  %v873_v58 = vsel %vm305_vm1, %v8109_v14, 0.0 }
 0x21e   :  { %856 = vadd.xlane.f32.xlu2 %v855_v62  ;;  %v8121_v62 = vpop.eup %7130 }
 0x21f   :  { %10760 = vst [vmem:[#allocation81_spill] sm:$0xff] %v8121_v62  ;;  %v858_v10 = vsel %vm305_vm1, %v8121_v62, 0.0 }
 0x221   :  { %874 = vadd.xlane.f32.xlu1 %v873_v58  ;;  %v782_v17 = vpop.xlane.xlu0 %781 }
 0x222   :  { %v800_v46 = vsub.f32 %v8020_v3, %v782_v17  ;;  %v798_v3 = vsub.f32 %v8016_v60, %v776_v49 }
 0x224   :  { %v830_v18 = vmul.f32 1.442695, %v800_v46  ;;  %v826_v58 = vmul.f32 1.442695, %v798_v3 }
 0x226   :  { %7132 = vpow2.f32 %v830_v18  ;;  %2177 = vmax.xlane.f32.xlu2 %v2176_v11  ;;  %v2127_v18 = vpop.f32.mrf.mxu1 }
 0x227   :  { %7134 = vpow2.f32 %v820_v32  ;;  %v8143_v32 = vmul.f32 0.35355338, %v2127_v18 }
 0x229   :  { %v785_v63 = vpop.xlane.xlu0 %784  ;;  %10765 = vst [vmem:[#allocation86_spill] sm:$0xff] %v8143_v32 }
 0x22a   :  { %v801_v1 = vsub.f32 %v8024_v20, %v785_v63 }
 0x22c   :  { %v8124_v14 = vpop.eup %7132  ;;  %v832_v9 = vmul.f32 1.442695, %v801_v1  ;;  %v2191_v1 = vsel %vm305_vm1, %v8143_v32, -inf }
 0x22d   :  { %10761 = vst [vmem:[#allocation82_spill] sm:$0xff] %v8124_v14  ;;  %v876_v8 = vsel %vm305_vm1, %v8124_v14, 0.0  ;;  %v8131_v17 = vpop.eup %7134 }
 0x22e   :  { %7136 = vpow2.f32 %v832_v9  ;;  %859 = vadd.xlane.f32.xlu2 %v858_v10  ;;  %877 = vadd.xlane.f32.xlu1 %v876_v8  ;;  %10762 = vst [vmem:[#allocation83_spill] sm:$0xff] %v8131_v17  ;;  %v861_v20 = vsel %vm305_vm1, %v8131_v17, 0.0 }
 0x22f   :  { %7138 = vpow2.f32 %v826_v58 }
 0x234   :  { %v8133_v46 = vpop.eup %7136 }
 0x235   :  { %10763 = vst [vmem:[#allocation84_spill] sm:$0xff] %v8133_v46  ;;  %v879_v60 = vsel %vm305_vm1, %v8133_v46, 0.0  ;;  %v8139_v49 = vpop.eup %7138 }
 0x236   :  { %862 = vadd.xlane.f32.xlu2 %v861_v20  ;;  %880 = vadd.xlane.f32.xlu1 %v879_v60  ;;  %10764 = vst [vmem:[#allocation85_spill] sm:$0xff] %v8139_v49  ;;  %v870_v11 = vsel %vm305_vm1, %v8139_v49, 0.0 }
 0x239   :  { %v842_v21 = vpop.xlane.xlu2 %841 }
 0x23a   :  { %7140 = vrcp.f32 %v842_v21  ;;  %v923_v49 = vand.u32 2147483648, %v842_v21  ;;  %vm917_vm7 = vweird.f32 %v842_v21 }
 0x23e   :  { %871 = vadd.xlane.f32.xlu2 %v870_v11 }
 0x240   :  { %v7141_v3 = vpop.eup %7140 }
 0x241   :  { %v913_v9 = vmul.f32 %v7141_v3, %v842_v21  ;;  %vm918_vm4 = vweird.f32 %v7141_v3 }
 0x242   :  { %vm8155_vm8 = vmor %vm917_vm7, %vm918_vm4 }
 0x243   :  { %v836_v63 = vpop.xlane.xlu1 %835  ;;  %v914_v8 = vsub.f32 1.0, %v913_v9 }
 0x244   :  { %2192 = vmax.xlane.f32.xlu0 %v2191_v1  ;;  %7142 = vrcp.f32 %v836_v63  ;;  %v893_v37 = vand.u32 2147483648, %v836_v63  ;;  %v891_v11 = vand.u32 2147483647, %v836_v63  ;;  %vm887_vm3 = vweird.f32 %v836_v63 }
 0x245   :  { %v915_v46 = vmul.f32 %v7141_v3, %v914_v8 }
 0x246   :  { %v894_v8 = vor.u32 1.1754944e-38, %v893_v37  ;;  %vm892_vm6 = vcmp.eq.f32.partialorder %v891_v11, 8.507059e+37 }
 0x247   :  { %v916_v14 = vadd.f32 %v7141_v3, %v915_v46  ;;  %v7022_v46 = vpack.i.bf16 %v7807_v54, %v7821_v56 }
 0x24a   :  { %v7143_v10 = vpop.eup %7142 }
 0x24b   :  { %v839_v58 = vpop.xlane.xlu1 %838  ;;  %v883_v20 = vmul.f32 %v7143_v10, %v836_v63  ;;  %vm888_vm2 = vweird.f32 %v7143_v10 }
 0x24c   :  { %7144 = vrcp.f32 %v839_v58  ;;  %vm889_vm5 = vmor %vm887_vm3, %vm888_vm2  ;;  %v908_v11 = vand.u32 2147483648, %v839_v58  ;;  %vm902_vm11 = vweird.f32 %v839_v58 }
 0x24d   :  { %v884_v60 = vsub.f32 1.0, %v883_v20 }
 0x24f   :  { %3155 = vrot.lane.b32.xlu1 %v7654_v24, %s7558_s26  ;;  %v885_v18 = vmul.f32 %v7143_v10, %v884_v60  ;;  %v921_v60 = vand.u32 2147483647, %v842_v21  ;;  %v924_v21 = vor.u32 1.1754944e-38, %v923_v49 }
 0x250   :  { %v8149_v32 = vpop.xlane.xlu2 %847 }
 0x251   :  { %7146 = vrcp.f32 %v8149_v32  ;;  %v886_v1 = vadd.f32 %v7143_v10, %v885_v18  ;;  %v6970_v18 = vunpack.i.l.bf16 %v7937_v50  ;;  %vm922_vm10 = vcmp.eq.f32.partialorder %v921_v60, 8.507059e+37 }
 0x252   :  { %v7145_v9 = vpop.eup %7144  ;;  %vm947_vm15 = vweird.f32 %v8149_v32 }
 0x253   :  { %v8152_v20 = vpop.xlane.xlu1 %844  ;;  %v890_v19 = vsel %vm889_vm5, %v7143_v10, %v886_v1  ;;  %v898_v24 = vmul.f32 %v7145_v9, %v839_v58  ;;  %vm903_vm9 = vweird.f32 %v7145_v9  ;;  %v906_v1 = vand.u32 2147483647, %v839_v58 }
 0x254   :  { %7148 = vrcp.f32 %v8152_v20  ;;  %v895_v17 = vsel %vm892_vm6, %v894_v8, %v890_v19  ;;  %v920_v19 = vsel %vm8155_vm8, %v7141_v3, %v916_v14  ;;  %v6980_v3 = vunpack.i.l.bf16 %v7923_v12  ;;  %vm904_vm12 = vmor %vm902_vm11, %vm903_vm9 }
 0x255   :  { %v899_v63 = vsub.f32 1.0, %v898_v24  ;;  %v8162_v37 = vmul.f32 %v8043_v2, %v895_v17  ;;  %v925_v49 = vsel %vm922_vm10, %v924_v21, %v920_v19  ;;  %v909_v8 = vor.u32 1.1754944e-38, %v908_v11 }
 0x256   :  { %3157 = vrot.lane.b32.xlu2 %v7672_v29, %s7558_s26  ;;  %v8181_v29 = vpack.i.bf16 %v7866_v0, %v7882_v5  ;;  %vm907_vm13 = vcmp.eq.f32.partialorder %v906_v1, 8.507059e+37  ;;  %v953_v58 = vand.u32 2147483648, %v8149_v32  ;;  %v8185_v21 = vmul.f32 %v8033_v59, %v925_v49 }
 0x257   :  { %v7147_v10 = vpop.eup %7146  ;;  %3183 = vrot.lane.b32.xlu1 %v7661_v26, %s7558_s26  ;;  %v900_v24 = vmul.f32 %v7145_v9, %v899_v63  ;;  %6746 = vmatmul.msk.f32.vlgmr.msrb.gmra.mxu2 %vm305_vm1, %v8162_v37  ;;  %v6971_v1 = vunpack.i.h.bf16 %v7937_v50  ;;  %v938_v59 = vand.u32 2147483648, %v8152_v20  ;;  %vm932_vm4 = vweird.f32 %v8152_v20 }
 0x258   :  { %v943_v2 = vmul.f32 %v7147_v10, %v8149_v32  ;;  %7023 = vrot.lane.b32.xlu0 %v7022_v46, %s7556_s5  ;;  %1375 = vmatpush.msrb.mxu2 %v6970_v18  ;;  %10768 = vst [vmem:[#allocation87_spill] sm:$0xff] %v8181_v29  ;;  %vm948_vm14 = vweird.f32 %v7147_v10  ;;  %v954_v50 = vor.u32 1.1754944e-38, %v953_v58  ;;  %v6990_v58 = vunpack.i.l.bf16 %v7985_v6 }
 0x259   :  { %v901_v62 = vadd.f32 %v7145_v9, %v900_v24  ;;  %v951_v24 = vand.u32 2147483647, %v8149_v32  ;;  %vm8195_vm2 = vmor %vm947_vm15, %vm948_vm14  ;;  %v939_v49 = vor.u32 1.1754944e-38, %v938_v59 }
 0x25a   :  { %v7149_v17 = vpop.eup %7148  ;;  %v944_v14 = vsub.f32 1.0, %v943_v2 }
 0x25b   :  { %v928_v63 = vmul.f32 %v7149_v17, %v8152_v20  ;;  %v8177_v26 = vpop.xlane.xlu1 %2168  ;;  %v905_v46 = vsel %vm904_vm12, %v7145_v9, %v901_v62  ;;  %vm933_vm3 = vweird.f32 %v7149_v17  ;;  %vm952_vm5 = vcmp.eq.f32.partialorder %v951_v24, 8.507059e+37 }
 0x25c   :  { %v945_v60 = vmul.f32 %v7147_v10, %v944_v14  ;;  %v910_v19 = vsel %vm907_vm13, %v909_v8, %v905_v46  ;;  %v936_v14 = vand.u32 2147483647, %v8152_v20  ;;  %vm934_vm6 = vmor %vm932_vm4, %vm933_vm3 }
 0x25d   :  { %v929_v18 = vsub.f32 1.0, %v928_v63  ;;  %v8192_v9 = vmul.f32 %v8053_v15, %v910_v19 }
 0x25e   :  { %v946_v11 = vadd.f32 %v7147_v10, %v945_v60  ;;  %3297 = vrot.lane.b32.xlu2 %v7739_v41, %s7558_s26  ;;  %vm937_vm7 = vcmp.eq.f32.partialorder %v936_v14, 8.507059e+37  ;;  %v6991_v14 = vunpack.i.h.bf16 %v7985_v6 }
 0x25f   :  { %v930_v62 = vmul.f32 %v7149_v17, %v929_v18  ;;  %7028 = vrot.lane.b32.xlu1 %v8181_v29, %s7556_s5  ;;  %6747 = vmatmul.msk.f32.vlgmr.msrb.gmra.mxu3 %vm305_vm1, %v8192_v9 }
 0x260   :  { %v950_v32 = vsel %vm8195_vm2, %v7147_v10, %v946_v11  ;;  %6748 = vmatmul.msk.f32.vlgmr.msra.gmra.mxu2 %vm305_vm1, %v8185_v21  ;;  %1401 = vmatpush.msrb.mxu3 %v6971_v1 }
 0x261   :  { %v931_v15 = vadd.f32 %v7149_v17, %v930_v62  ;;  %1427 = vmatpush.msra.mxu2 %v6980_v3  ;;  %3185 = vrot.lane.b32.xlu0 %v7684_v31, %s7558_s26  ;;  %v955_v63 = vsel %vm952_vm5, %v954_v50, %v950_v32  ;;  %v6981_v3 = vunpack.i.h.bf16 %v7923_v12 }
 0x262   :  { %v8218_v20 = vmul.f32 %v8057_v23, %v955_v63 }
 0x263   :  { %v935_v10 = vsel %vm934_vm6, %v7149_v17, %v931_v15  ;;  %v851_v8 = vpop.xlane.xlu1 %850 }
 0x264   :  { %7150 = vrcp.f32 %v851_v8  ;;  %v940_v46 = vsel %vm937_vm7, %v939_v49, %v935_v10  ;;  %v968_v18 = vand.u32 2147483648, %v851_v8  ;;  %v966_v11 = vand.u32 2147483647, %v851_v8 }
 0x265   :  { %v8215_v60 = vmul.f32 %v8059_v13, %v940_v46  ;;  %v8228_v13 = vpop.xlane.xlu0 %2153  ;;  %vm962_vm9 = vweird.f32 %v851_v8 }
 0x266   :  { %3493 = vrot.lane.b32.xlu2 %v7833_v57, %s7558_s26  ;;  %v969_v1 = vor.u32 1.1754944e-38, %v968_v18  ;;  %vm967_vm11 = vcmp.eq.f32.partialorder %v966_v11, 8.507059e+37 }
 0x267   :  { %3241 = vrot.lane.b32.xlu1 %v7712_v36, %s7558_s26  ;;  %6749 = vmatmul.msk.f32.vlgmr.msra.gmra.mxu3 %vm305_vm1, %v8215_v60 }
 0x268   :  { %6750 = vmatmul.msk.f32.vlgmr.msrb.gmra.mxu2 %vm305_vm1, %v8218_v20  ;;  %1453 = vmatpush.msra.mxu3 %v6981_v3 }
 0x269   :  { %1479 = vmatpush.msrb.mxu2 %v6990_v58  ;;  %3269 = vrot.lane.b32.xlu0 %v7725_v39, %s7558_s26  ;;  %v1143_v39 = vsel %vm305_vm1, %v8215_v60, 0.0 }
 0x26a   :  { %v7151_v23 = vpop.eup %7150 }
 0x26b   :  { %v958_v12 = vmul.f32 %v7151_v23, %v851_v8  ;;  %vm963_vm8 = vweird.f32 %v7151_v23 }
 0x26c   :  { %vm964_vm10 = vmor %vm962_vm9, %vm963_vm8 }
 0x26d   :  { %v959_v17 = vsub.f32 1.0, %v958_v12  ;;  %v8238_v2 = vpop.xlane.xlu0 %2156 }
 0x26e   :  { %3407 = vrot.lane.b32.xlu2 %v7763_v44, %s7558_s26 }
 0x26f   :  { %3379 = vrot.lane.b32.xlu1 %v7751_v42, %s7558_s26  ;;  %v960_v19 = vmul.f32 %v7151_v23, %v959_v17 }
 0x271   :  { %v961_v24 = vadd.f32 %v7151_v23, %v960_v19  ;;  %3267 = vrot.lane.b32.xlu0 %v7698_v33, %s7558_s26 }
 0x273   :  { %v965_v62 = vsel %vm964_vm10, %v7151_v23, %v961_v24 }
 0x274   :  { %v970_v59 = vsel %vm967_vm11, %v969_v1, %v965_v62 }
 0x275   :  { %v8243_v32 = vmul.f32 %v8074_v7, %v970_v59  ;;  %v8252_v50 = vpop.xlane.xlu0 %2165 }
 0x276   :  { %3351 = vrot.lane.b32.xlu2 %v7737_v40, %s7558_s26 }
 0x277   :  { %3409 = vrot.lane.b32.xlu1 %v7796_v52, %s7558_s26  ;;  %6751 = vmatmul.msk.f32.vlgmr.msrb.gmra.mxu3 %vm305_vm1, %v8243_v32 }
 0x278   :  { %1505 = vmatpush.msrb.mxu3 %v6991_v14 }
 0x279   :  { %3381 = vrot.lane.b32.xlu0 %v7780_v48, %s7558_s26 }
 0x27c   :  { %v8258_v7 = vpop.xlane.xlu1 %2180 }
 0x27d   :  { %v8262_v6 = vpop.xlane.xlu0 %865 }
 0x27e   :  { %3465 = vrot.lane.b32.xlu2 %v7821_v56, %s7558_s26  ;;  %vm1037_vm7 = vweird.f32 %v8262_v6  ;;  %v1144_v56 = vrot.slane %v1143_v39, 4 }
 0x27f   :  { %3353 = vrot.lane.b32.xlu1 %v7765_v45, %s7558_s26 }
 0x281   :  { %3295 = vrot.lane.b32.xlu0 %v7710_v35, %s7558_s26 }
 0x284   :  { %v8270_v10 = vpop.xlane.xlu1 %868 }
 0x286   :  { %3463 = vrot.lane.b32.xlu2 %v7794_v51, %s7558_s26 }
 0x287   :  { %3211 = vrot.lane.b32.xlu1 %v7670_v28, %s7558_s26 }
 0x289   :  { %v854_v15 = vpop.xlane.xlu2 %853  ;;  %3239 = vrot.lane.b32.xlu0 %v7682_v30, %s7558_s26 }
 0x28a   :  { %7152 = vrcp.f32 %v854_v15  ;;  %v983_v23 = vand.u32 2147483648, %v854_v15  ;;  %v981_v17 = vand.u32 2147483647, %v854_v15  ;;  %vm977_vm13 = vweird.f32 %v854_v15 }
 0x28c   :  { %v8272_v49 = vpop.permute.xlu0 %7018  ;;  %v8281_v18 = vpop.xlane.xlu1 %2189  ;;  %v984_v24 = vor.u32 1.1754944e-38, %v983_v23  ;;  %vm982_vm15 = vcmp.eq.f32.partialorder %v981_v17, 8.507059e+37 }
 0x28d   :  { %v7021_v8 = vunpack.i.h.bf16 %v8272_v49 }
 0x28e   :  { %3435 = vrot.lane.b32.xlu2 %v7778_v47, %s7558_s26 }
 0x28f   :  { %3325 = vrot.lane.b32.xlu1 %v7753_v43, %s7558_s26  ;;  %2835 = vmatpush.msra.mxu0 %v7021_v8  ;;  %v1136_v43 = vsel %vm305_vm1, %v8185_v21, 0.0 }
 0x290   :  { %v7153_v63 = vpop.eup %7152 }
 0x291   :  { %v973_v46 = vmul.f32 %v7153_v63, %v854_v15  ;;  %v857_v3 = vpop.xlane.xlu2 %856  ;;  %3213 = vrot.lane.b32.xlu0 %v7700_v34, %s7558_s26  ;;  %vm978_vm12 = vweird.f32 %v7153_v63  ;;  %v6995_v15 = vunpack.i.l.bf16 %v8026_v4 }
 0x292   :  { %7154 = vrcp.f32 %v857_v3  ;;  %vm979_vm14 = vmor %vm977_vm13, %vm978_vm12  ;;  %vm992_vm3 = vweird.f32 %v857_v3 }
 0x293   :  { %v974_v58 = vsub.f32 1.0, %v973_v46  ;;  %7156 = vrcp.f32 %v8262_v6 }
 0x294   :  { %v8296_v17 = vpop.xlane.xlu1 %874  ;;  %7158 = vrcp.f32 %v8270_v10 }
 0x295   :  { %v975_v12 = vmul.f32 %v7153_v63, %v974_v58 }
 0x297   :  { %v976_v19 = vadd.f32 %v7153_v63, %v975_v12  ;;  %3323 = vrot.lane.b32.xlu1 %v7723_v38, %s7558_s26  ;;  %v996_v12 = vand.u32 2147483647, %v857_v3 }
 0x298   :  { %v7155_v11 = vpop.eup %7154 }
 0x299   :  { %v980_v1 = vsel %vm979_vm14, %v7153_v63, %v976_v19  ;;  %v988_v62 = vmul.f32 %v7155_v11, %v857_v3  ;;  %v8285_v59 = vpop.xlane.xlu2 %2177  ;;  %3491 = vrot.lane.b32.xlu0 %v7805_v53, %s7558_s26  ;;  %vm993_vm2 = vweird.f32 %v7155_v11  ;;  %v998_v63 = vand.u32 2147483648, %v857_v3 }
 0x29a   :  { %v985_v14 = vsel %vm982_vm15, %v984_v24, %v980_v1  ;;  %vm994_vm4 = vmor %vm992_vm3, %vm993_vm2  ;;  %v8300_v24 = vpop.eup %7156  ;;  %vm997_vm5 = vcmp.eq.f32.partialorder %v996_v12, 8.507059e+37  ;;  %v2200_v3 = vsub.f32 %v8070_v16, %v8252_v50 }
 0x29b   :  { %v989_v8 = vsub.f32 1.0, %v988_v62  ;;  %v8290_v46 = vmul.f32 %v8095_v22, %v985_v14  ;;  %v999_v1 = vor.u32 1.1754944e-38, %v998_v63  ;;  %v1033_v14 = vmul.f32 %v8300_v24, %v8262_v6 }
 0x29c   :  { %vm1038_vm9 = vweird.f32 %v8300_v24 }
 0x29d   :  { %v990_v58 = vmul.f32 %v7155_v11, %v989_v8  ;;  %6752 = vmatmul.msk.f32.vlgmr.msra.gmra.mxu2 %vm305_vm1, %v8290_v46  ;;  %v6996_v8 = vunpack.i.h.bf16 %v8026_v4  ;;  %v1034_v12 = vsub.f32 1.0, %v1033_v14  ;;  %vm8370_vm12 = vmor %vm1037_vm7, %vm1038_vm9 }
 0x29e   :  { %1531 = vmatpush.msra.mxu2 %v6995_v15 }
 0x29f   :  { %v991_v23 = vadd.f32 %v7155_v11, %v990_v58  ;;  %3577 = vrot.lane.b32.xlu1 %v7882_v5, %s7558_s26  ;;  %v8317_v58 = vpop.eup %7158 }
 0x2a0   :  { %v1048_v4 = vmul.f32 %v8317_v58, %v8270_v10  ;;  %vm1053_vm2 = vweird.f32 %v8317_v58 }
 0x2a1   :  { %v995_v22 = vsel %vm994_vm4, %v7155_v11, %v991_v23  ;;  %v860_v19 = vpop.xlane.xlu2 %859  ;;  %3521 = vrot.lane.b32.xlu0 %v7852_v61, %s7558_s26  ;;  %v8313_v15 = vpop.xlane.xlu1 %877  ;;  %v2222_v23 = vmul.f32 1.442695, %v2200_v3  ;;  %v1035_v3 = vmul.f32 %v8300_v24, %v1034_v12  ;;  %v1041_v12 = vand.u32 2147483647, %v8262_v6 }
 0x2a2   :  { %7160 = vrcp.f32 %v860_v19  ;;  %v1000_v62 = vsel %vm997_vm5, %v999_v1, %v995_v22  ;;  %v10771_v1 = vld [vmem:[#allocation70_spill] sm:$0xff]  ;;  %v1011_v5 = vand.u32 2147483647, %v860_v19  ;;  %vm1007_vm8 = vweird.f32 %v860_v19 }
 0x2a3   :  { %v8310_v11 = vmul.f32 %v8105_v25, %v1000_v62  ;;  %v2208_v25 = vsub.f32 %v8097_v27, %v8281_v18  ;;  %v7005_v51 = vunpack.i.l.bf16 %v10771_v1  ;;  %v10772_v27 = vld [vmem:[#allocation74_spill] sm:$0xff]  ;;  %vm8381_vm14 = vcmp.eq.f32.partialorder %v1041_v12, 8.507059e+37 }
 0x2a4   :  { %v2197_v18 = vsub.f32 %v10772_v27, %v8238_v2  ;;  %vm1012_vm11 = vcmp.eq.f32.partialorder %v1011_v5, 8.507059e+37  ;;  %v10777_v5 = vld [vmem:[#allocation81_spill] sm:$0xff]  ;;  %vm1052_vm5 = vweird.f32 %v8270_v10 }
 0x2a5   :  { %6753 = vmatmul.msk.f32.vlgmr.msra.gmra.mxu3 %vm305_vm1, %v8310_v11  ;;  %v2238_v38 = vmul.f32 1.442695, %v2208_v25  ;;  %v1171_v21 = vsel %vm305_vm1, %v8310_v11, 0.0 }
 0x2a6   :  { %1557 = vmatpush.msra.mxu3 %v6996_v8  ;;  %v1013_v8 = vand.u32 2147483648, %v860_v19 }
 0x2a8   :  { %v7161_v63 = vpop.eup %7160  ;;  %v1014_v62 = vor.u32 1.1754944e-38, %v1013_v8 }
 0x2a9   :  { %v8319_v16 = vpop.xlane.xlu2 %862  ;;  %v1003_v50 = vmul.f32 %v7161_v63, %v860_v19  ;;  %3519 = vrot.lane.b32.xlu0 %v7819_v55, %s7558_s26  ;;  %vm1008_vm6 = vweird.f32 %v7161_v63  ;;  %v1049_v55 = vsub.f32 1.0, %v1048_v4  ;;  %v8347_v2 = vpop.xlane.xlu1 %880  ;;  %v1036_v19 = vadd.f32 %v8300_v24, %v1035_v3 }
 0x2aa   :  { %7162 = vrcp.f32 %v8319_v16  ;;  %vm8342_vm10 = vmor %vm1007_vm8, %vm1008_vm6  ;;  %vm1022_vm15 = vweird.f32 %v8319_v16 }
 0x2ab   :  { %7164 = vrcp.f32 %v8296_v17  ;;  %v1004_v22 = vsub.f32 1.0, %v1003_v50  ;;  %v1050_v57 = vmul.f32 %v8317_v58, %v1049_v55  ;;  %v1026_v55 = vand.u32 2147483647, %v8319_v16  ;;  %vm8408_vm6 = vmor %vm1052_vm5, %vm1053_vm2 }
 0x2ac   :  { %7166 = vpow2.f32 %v2222_v23  ;;  %vm1097_vm2 = vweird.f32 %v8313_v15 }
 0x2ad   :  { %7168 = vrcp.f32 %v8313_v15  ;;  %v1005_v14 = vmul.f32 %v7161_v63, %v1004_v22  ;;  %v1043_v22 = vand.u32 2147483648, %v8262_v6  ;;  %vm1027_vm4 = vcmp.eq.f32.partialorder %v1026_v55, 8.507059e+37  ;;  %v10783_v55 = vld [vmem:[#allocation83_spill] sm:$0xff] }
 0x2af   :  { %v1006_v50 = vadd.f32 %v7161_v63, %v1005_v14  ;;  %v1044_v45 = vor.u32 1.1754944e-38, %v1043_v22 }
 0x2b0   :  { %v7163_v47 = vpop.eup %7162 }
 0x2b1   :  { %v8336_v23 = vpop.eup %7164  ;;  %v1018_v25 = vmul.f32 %v7163_v47, %v8319_v16  ;;  %v8349_v27 = vpop.xlane.xlu2 %871  ;;  %v1010_v14 = vsel %vm8342_vm10, %v7161_v63, %v1006_v50  ;;  %3437 = vrot.lane.b32.xlu0 %v7807_v54, %s7558_s26  ;;  %v1028_v63 = vand.u32 2147483648, %v8319_v16  ;;  %vm1023_vm13 = vweird.f32 %v7163_v47 }
 0x2b2   :  { %7170 = vrcp.f32 %v8349_v27  ;;  %v8357_v53 = vpop.eup %7166  ;;  %v1078_v3 = vmul.f32 %v8336_v23, %v8296_v17  ;;  %v1015_v8 = vsel %vm1012_vm11, %v1014_v62, %v1010_v14  ;;  %v1040_v62 = vsel %vm8370_vm12, %v8300_v24, %v1036_v19  ;;  %vm1024_vm3 = vmor %vm1022_vm15, %vm1023_vm13 }
 0x2b3   :  { %7172 = vpow2.f32 %v2238_v38  ;;  %v1019_v44 = vsub.f32 1.0, %v1018_v25  ;;  %v8360_v52 = vpop.eup %7168  ;;  %v8376_v4 = vmul.f32 %v10777_v5, %v1015_v8  ;;  %v2216_v25 = vmul.f32 1.442695, %v2197_v18 }
 0x2b4   :  { %7174 = vrcp.f32 %v8347_v2  ;;  %v2260_v6 = vsel %vm305_vm1, %v8357_v53, 0.0  ;;  %v1051_v24 = vadd.f32 %v8317_v58, %v1050_v57  ;;  %v1079_v12 = vsub.f32 1.0, %v1078_v3  ;;  %v10780_v57 = vld [vmem:[#allocation75_spill] sm:$0xff] }
 0x2b5   :  { %v1020_v38 = vmul.f32 %v7163_v47, %v1019_v44  ;;  %v1093_v44 = vmul.f32 %v8360_v52, %v8313_v15  ;;  %6754 = vmatmul.msk.f32.vlgmr.msrb.gmra.mxu2 %vm305_vm1, %v8376_v4  ;;  %v1029_v19 = vor.u32 1.1754944e-38, %v1028_v63  ;;  %v1045_v50 = vsel %vm8381_vm14, %v1044_v45, %v1040_v62 }
 0x2b6   :  { %1583 = vmatpush.msrb.mxu2 %v7005_v51  ;;  %v2201_v5 = vsub.f32 %v10780_v57, %v8177_v26  ;;  %v1058_v3 = vand.u32 2147483648, %v8270_v10  ;;  %v1055_v26 = vsel %vm8408_vm6, %v8317_v58, %v1051_v24  ;;  %v1080_v14 = vmul.f32 %v8336_v23, %v1079_v12 }
 0x2b7   :  { %v1021_v35 = vadd.f32 %v7163_v47, %v1020_v38  ;;  %2261 = vadd.xlane.f32.xlu2 %v2260_v6  ;;  %v1094_v51 = vsub.f32 1.0, %v1093_v44  ;;  %v1073_v6 = vand.u32 2147483648, %v8349_v27  ;;  %v1071_v44 = vand.u32 2147483647, %v8349_v27 }
 0x2b8   :  { %v7171_v18 = vpop.eup %7170  ;;  %7176 = vpow2.f32 %v2216_v25  ;;  %v1059_v58 = vor.u32 1.1754944e-38, %v1058_v3  ;;  %v10786_v24 = vunpack.i.h.bf16 %v10771_v1  ;;  %vm1067_vm9 = vweird.f32 %v8349_v27 }
 0x2b9   :  { %v8395_v22 = vpop.eup %7172  ;;  %v1025_v8 = vsel %vm1024_vm3, %v7163_v47, %v1021_v35  ;;  %v1063_v16 = vmul.f32 %v7171_v18, %v8349_v27  ;;  %v1056_v47 = vand.u32 2147483647, %v8270_v10  ;;  %vm1068_vm7 = vweird.f32 %v7171_v18 }
 0x2ba   :  { %v8400_v38 = vpop.eup %7174  ;;  %v1030_v63 = vsel %vm1027_vm4, %v1029_v19, %v1025_v8  ;;  %v10784_v19 = vld [vmem:[#allocation76_spill] sm:$0xff]  ;;  %v2284_v12 = vsel %vm305_vm1, %v8395_v22, 0.0  ;;  %vm1083_vm10 = vweird.f32 %v8336_v23  ;;  %vm1069_vm11 = vmor %vm1067_vm9, %vm1068_vm7  ;;  %v1074_v1 = vor.u32 1.1754944e-38, %v1073_v6 }
 0x2bb   :  { %v1064_v45 = vsub.f32 1.0, %v1063_v16  ;;  %v8414_v62 = vmul.f32 %v10783_v55, %v1030_v63  ;;  %v8422_v8 = vmul.f32 %v10784_v19, %v1045_v50  ;;  %v1108_v57 = vmul.f32 %v8400_v38, %v8347_v2  ;;  %v10785_v16 = vld [vmem:[#allocation72_spill] sm:$0xff] }
 0x2bc   :  { %v7010_v63 = vunpack.i.l.bf16 %v10785_v16  ;;  %vm1057_vm8 = vcmp.eq.f32.partialorder %v1056_v47, 8.507059e+37  ;;  %v1095_v50 = vmul.f32 %v8360_v52, %v1094_v51  ;;  %v1081_v3 = vadd.f32 %v8336_v23, %v1080_v14 }
 0x2bd   :  { %v1065_v10 = vmul.f32 %v7171_v18, %v1064_v45  ;;  %6755 = vmatmul.msk.f32.vlgmr.msrb.gmra.mxu3 %vm305_vm1, %v8414_v62  ;;  %6756 = vmatmul.msk.f32.vlgmr.msra.gmra.mxu2 %vm305_vm1, %v8422_v8  ;;  %v2224_v45 = vmul.f32 1.442695, %v2201_v5  ;;  %v1060_v25 = vsel %vm1057_vm8, %v1059_v58, %v1055_v26  ;;  %v1109_v47 = vsub.f32 1.0, %v1108_v57  ;;  %v10788_v26 = vld [vmem:[#allocation85_spill] sm:$0xff]  ;;  %v10801_v57 = vld [vmem:[#allocation82_spill] sm:$0xff] }
 0x2be   :  { %1609 = vmatpush.msrb.mxu3 %v10786_v24  ;;  %1635 = vmatpush.msra.mxu2 %v7010_v63  ;;  %vm1072_vm12 = vcmp.eq.f32.partialorder %v1071_v44, 8.507059e+37  ;;  %vm1082_vm13 = vweird.f32 %v8296_v17  ;;  %v1086_v27 = vand.u32 2147483647, %v8296_v17  ;;  %v1088_v51 = vand.u32 2147483648, %v8296_v17  ;;  %v8452_v14 = vpop.eup %7176 }
 0x2bf   :  { %v1066_v35 = vadd.f32 %v7171_v18, %v1065_v10  ;;  %2285 = vadd.xlane.f32.xlu2 %v2284_v12  ;;  %v1096_v5 = vadd.f32 %v8360_v52, %v1095_v50  ;;  %vm1098_vm14 = vweird.f32 %v8360_v52  ;;  %v10787_v10 = vld [vmem:[#allocation78_spill] sm:$0xff]  ;;  %vm8457_vm15 = vmor %vm1082_vm13, %vm1083_vm10  ;;  %v1103_v17 = vand.u32 2147483648, %v8313_v15  ;;  %v10794_v50 = vld [vmem:[#allocation77_spill] sm:$0xff] }
 0x2c0   :  { %v8447_v6 = vmul.f32 %v10787_v10, %v1060_v25  ;;  %v1085_v44 = vsel %vm8457_vm15, %v8336_v23, %v1081_v3  ;;  %v1101_v58 = vand.u32 2147483647, %v8313_v15  ;;  %v1110_v24 = vmul.f32 %v8400_v38, %v1109_v47  ;;  %vm8470_vm3 = vmor %vm1097_vm2, %vm1098_vm14 }
 0x2c1   :  { %v1070_v55 = vsel %vm1069_vm11, %v7171_v18, %v1066_v35  ;;  %v7011_v18 = vunpack.i.h.bf16 %v10785_v16  ;;  %v1089_v16 = vor.u32 1.1754944e-38, %v1088_v51  ;;  %7178 = vpow2.f32 %v2224_v45 }
 0x2c2   :  { %v1075_v19 = vsel %vm1072_vm12, %v1074_v1, %v1070_v55  ;;  %v2205_v35 = vsub.f32 %v10794_v50, %v8258_v7  ;;  %vm1087_vm4 = vcmp.eq.f32.partialorder %v1086_v27, 8.507059e+37  ;;  %v1100_v15 = vsel %vm8470_vm3, %v8360_v52, %v1096_v5  ;;  %v10795_v1 = vld [vmem:[#allocation53_spill] sm:$0xff] }
 0x2c3   :  { %v8450_v63 = vmul.f32 %v10788_v26, %v1075_v19  ;;  %v1104_v23 = vor.u32 1.1754944e-38, %v1103_v17  ;;  %v2251_v25 = vsel %vm305_vm1, %v8452_v14, 0.0  ;;  %v1090_v3 = vsel %vm1087_vm4, %v1089_v16, %v1085_v44  ;;  %v10796_v7 = vld [vmem:[#allocation73_spill] sm:$0xff]  ;;  %v10797_v19 = vld [vmem:[#allocation79_spill] sm:$0xff]  ;;  %v2193_v26 = vpop.xlane.xlu0 %2192  ;;  %v10804_v16 = vld [vmem:[#allocation86_spill] sm:$0xff] }
 0x2c4   :  { %vm1102_vm5 = vcmp.eq.f32.partialorder %v1101_v58, 8.507059e+37  ;;  %v1111_v45 = vadd.f32 %v8400_v38, %v1110_v24  ;;  %vm1113_vm6 = vweird.f32 %v8400_v38  ;;  %v2196_v52 = vsub.f32 %v10796_v7, %v8228_v13  ;;  %v8509_v58 = vpop.permute.xlu1 %3155  ;;  %v10803_v24 = vld [vmem:[#allocation56_spill] sm:$0xff] }
 0x2c5   :  { %10789 = vst [vmem:[#allocation70_spill] sm:$0xff] %v8450_v63  ;;  %6757 = vmatmul.msk.f32.vlgmr.msra.gmra.mxu3 %vm305_vm1, %v8447_v6  ;;  %6758 = vmatmul.msk.f32.vlgmr.msrb.gmra.mxu2 %vm305_vm1, %v8450_v63  ;;  %v1118_v47 = vand.u32 2147483648, %v8347_v2  ;;  %v1105_v55 = vsel %vm1102_vm5, %v1104_v23, %v1100_v15  ;;  %v2232_v27 = vmul.f32 1.442695, %v2205_v35  ;;  %vm1112_vm7 = vweird.f32 %v8347_v2  ;;  %v10806_v15 = vld [vmem:[#allocation80_spill] sm:$0xff] }
 0x2c6   :  { %1661 = vmatpush.msra.mxu3 %v7011_v18  ;;  %6762 = vmatpush.xpose.msk.msrb.mxu2 %vm305_vm1, %v10795_v1  ;;  %v1116_v51 = vand.u32 2147483647, %v8347_v2  ;;  %v8493_v5 = vmul.f32 %v10797_v19, %v1090_v3  ;;  %vm8495_vm8 = vmor %vm1112_vm7, %vm1113_vm6  ;;  %v8507_v17 = vmul.f32 %v10801_v57, %v1105_v55  ;;  %v2214_v2 = vmul.f32 1.442695, %v2196_v52  ;;  %10802 = vst [vmem:[#allocation81_spill] sm:$0xff] %v8509_v58  ;;  %v10808_v52 = vld [vmem:[#allocation57_spill] sm:$0xff] }
 0x2c7   :  { %v8499_v18 = vpop.eup %7178  ;;  %v1115_v13 = vsel %vm8495_vm8, %v8400_v38, %v1111_v45  ;;  %v1119_v44 = vor.u32 1.1754944e-38, %v1118_v47  ;;  %7180 = vpow2.f32 %v2232_v27  ;;  %v2209_v12 = vsub.f32 %v10804_v16, %v2193_v26  ;;  %v10805_v38 = vld [vmem:[#allocation54_spill] sm:$0xff]  ;;  %v10809_v47 = vld [vmem:[#allocation47_spill] sm:$0xff] }
 0x2c8   :  { %10798 = vst [vmem:[#allocation74_spill] sm:$0xff] %v8493_v5  ;;  %vm1117_vm9 = vcmp.eq.f32.partialorder %v1116_v51, 8.507059e+37  ;;  %v2263_v50 = vsel %vm305_vm1, %v8499_v18, 0.0  ;;  %7182 = vpow2.f32 %v2214_v2  ;;  %v2204_v23 = vsub.f32 %v10806_v15, %v8285_v59  ;;  %v10811_v51 = vld [vmem:[#allocation68_spill] sm:$0xff]  ;;  %v10813_v2 = vld [vmem:[#allocation51_spill] sm:$0xff] }
 0x2c9   :  { %2252 = vadd.xlane.f32.xlu1 %v2251_v25  ;;  %v1120_v35 = vsel %vm1117_vm9, %v1119_v44, %v1115_v13  ;;  %v2240_v1 = vmul.f32 1.442695, %v2209_v12  ;;  %v10807_v25 = vld [vmem:[#allocation84_spill] sm:$0xff]  ;;  %v8545_v13 = vpop.permute.xlu2 %3157  ;;  %v10814_v44 = vld [vmem:[#allocation69_spill] sm:$0xff]  ;;  %v1172_v58 = vrot.slane %v1171_v21, 4 }
 0x2ca   :  { %v8523_v3 = vmul.f32 %v10807_v25, %v1120_v35  ;;  %v2230_v7 = vmul.f32 1.442695, %v2204_v23  ;;  %10812 = vst [vmem:[#allocation83_spill] sm:$0xff] %v8545_v13  ;;  %v10816_v12 = vld [vmem:[#allocation64_spill] sm:$0xff]  ;;  %v10818_v25 = vld [vmem:[#allocation58_spill] sm:$0xff] }
 0x2cb   :  { %7184 = vpow2.f32 %v2240_v1  ;;  %v8537_v27 = vpop.permute.xlu0 %7023  ;;  %v1173_v63 = vadd.f32 %v1172_v58, %v1171_v21 }
 0x2cc   :  { %v8535_v59 = vpop.permute.xlu1 %3183  ;;  %7186 = vpow2.f32 %v2230_v7  ;;  %v10819_v7 = vld [vmem:[#allocation50_spill] sm:$0xff] }
 0x2cd   :  { %6759 = vmatmul.msk.f32.vlgmr.msrb.gmra.mxu3 %vm305_vm1, %v8493_v5  ;;  %6760 = vmatmul.msk.f32.vlgmr.msra.gmra.mxu2 %vm305_vm1, %v8507_v17  ;;  %v8525_v45 = vpop.eup %7180  ;;  %10810 = vst [vmem:[#allocation75_spill] sm:$0xff] %v8535_v59 }
 0x2ce   :  { %6764 = vmatpush.xpose.msk.msrb.mxu3 %vm305_vm1, %v10803_v24  ;;  %6770 = vmatpush.xpose.msk.msra.mxu2 %vm305_vm1, %v10805_v38  ;;  %v8533_v55 = vpop.eup %7182  ;;  %v2275_v19 = vsel %vm305_vm1, %v8525_v45, 0.0  ;;  %v10815_v24 = vld [vmem:[#allocation55_spill] sm:$0xff] }
 0x2cf   :  { %v2248_v26 = vsel %vm305_vm1, %v8533_v55, 0.0 }
 0x2d1   :  { %2264 = vadd.xlane.f32.xlu1 %v2263_v50  ;;  %v8548_v57 = vpop.eup %7184 }
 0x2d2   :  { %v8556_v16 = vpop.eup %7186  ;;  %v2287_v38 = vsel %vm305_vm1, %v8548_v57, 0.0 }
 0x2d3   :  { %v8564_v35 = vpop.permute.xlu0 %3185  ;;  %v2272_v1 = vsel %vm305_vm1, %v8556_v16, 0.0 }
 0x2d4   :  { %v8562_v50 = vpop.permute.xlu1 %7028  ;;  %10817 = vst [vmem:[#allocation76_spill] sm:$0xff] %v8564_v35  ;;  %v1174_v35 = vrot.slane %v1173_v63, 2 }
 0x2d5   :  { %6761 = vmatmul.msk.f32.vlgmr.msra.gmra.mxu3 %vm305_vm1, %v8523_v3  ;;  %6763 = vmatmul.msk.f32.vlgmr.msrb.gmra.mxu2 %vm305_vm1, %v10809_v47  ;;  %v8573_v47 = vpop.permute.xlu2 %3297 }
 0x2d6   :  { %6772 = vmatpush.xpose.msk.msra.mxu3 %vm305_vm1, %v10808_v52  ;;  %6778 = vmatpush.xpose.msk.msrb.mxu2 %vm305_vm1, %v10811_v51  ;;  %v6960_v52 = vunpack.i.l.bf16 %v10819_v7  ;;  %10820 = vst [vmem:[#allocation72_spill] sm:$0xff] %v8573_v47  ;;  %v10821_v51 = vld [vmem:[#allocation71_spill] sm:$0xff] }
 0x2d9   :  { %2276 = vadd.xlane.f32.xlu1 %v2275_v19  ;;  %v10822_v19 = vld [vmem:[#allocation59_spill] sm:$0xff] }
 0x2da   :  { %v1273_v10 = vpop.f32.mrf.mxu2 }
 0x2db   :  { %1666 = vst.msk [vmem:[#allocation2] sm:$0xff] %vm305_vm1, %v1273_v10  ;;  %2249 = vadd.xlane.f32.xlu0 %v2248_v26 }
 0x2dd   :  { %6765 = vmatmul.msk.f32.vlgmr.msrb.gmra.mxu3 %vm305_vm1, %v10813_v2  ;;  %6771 = vmatmul.msk.f32.vlgmr.msra.gmra.mxu2 %vm305_vm1, %v10815_v24  ;;  %v6961_v2 = vunpack.i.h.bf16 %v10819_v7  ;;  %v8583_v24 = vpop.permute.xlu0 %3269  ;;  %v10828_v7 = vld [vmem:[#allocation62_spill] sm:$0xff] }
 0x2de   :  { %6780 = vmatpush.xpose.msk.msrb.mxu3 %vm305_vm1, %v10814_v44  ;;  %6786 = vmatpush.xpose.msk.msra.mxu2 %vm305_vm1, %v10816_v12  ;;  %v8581_v44 = vpop.permute.xlu1 %3241  ;;  %10823 = vst [vmem:[#allocation78_spill] sm:$0xff] %v8583_v24  ;;  %v10824_v12 = vld [vmem:[#allocation61_spill] sm:$0xff] }
 0x2e1   :  { %2288 = vadd.xlane.f32.xlu1 %v2287_v38  ;;  %v10825_v38 = vld [vmem:[#allocation63_spill] sm:$0xff] }
 0x2e2   :  { %v1299_v15 = vpop.f32.mrf.mxu3 }
 0x2e3   :  { %v1325_v23 = vpop.f32.mrf.mxu2  ;;  %1667 = vst.msk [vmem:[#allocation2 + $0x8] sm:$0xff] %vm305_vm1, %v1299_v15  ;;  %2273 = vadd.xlane.f32.xlu0 %v2272_v1  ;;  %v6975_v15 = vunpack.i.l.bf16 %v10825_v38  ;;  %v8591_v1 = vpop.permute.xlu2 %3493 }
 0x2e4   :  { %1668 = vst.msk [vmem:[#allocation2 + $0x10] sm:$0xff] %vm305_vm1, %v1325_v23  ;;  %v10826_v23 = vld [vmem:[#allocation60_spill] sm:$0xff] }
 0x2e5   :  { %6773 = vmatmul.msk.f32.vlgmr.msra.gmra.mxu3 %vm305_vm1, %v10818_v25  ;;  %6779 = vmatmul.msk.f32.vlgmr.msrb.gmra.mxu2 %vm305_vm1, %v10822_v19  ;;  %10827 = vst [vmem:[#allocation85_spill] sm:$0xff] %v8591_v1  ;;  %v6976_v25 = vunpack.i.h.bf16 %v10825_v38 }
 0x2e6   :  { %6788 = vmatpush.xpose.msk.msra.mxu3 %vm305_vm1, %v10821_v51  ;;  %2679 = vmatpush.msrb.mxu2 %v6960_v52  ;;  %v8596_v52 = vpop.permute.xlu1 %3379  ;;  %v8598_v51 = vpop.permute.xlu0 %3267 }
 0x2e7   :  { %10829 = vst [vmem:[#allocation77_spill] sm:$0xff] %v8596_v52 }
 0x2e8   :  { %10830 = vst [vmem:[#allocation53_spill] sm:$0xff] %v8598_v51 }
 0x2ea   :  { %v1351_v10 = vpop.f32.mrf.mxu3 }
 0x2eb   :  { %v1377_v26 = vpop.f32.mrf.mxu2  ;;  %1669 = vst.msk [vmem:[#allocation2 + $0x18] sm:$0xff] %vm305_vm1, %v1351_v10  ;;  %v8600_v19 = vpop.permute.xlu2 %3407 }
 0x2ec   :  { %1670 = vst.msk [vmem:[#allocation2 + $0x20] sm:$0xff] %vm305_vm1, %v1377_v26 }
 0x2ed   :  { %6781 = vmatmul.msk.f32.vlgmr.msrb.gmra.mxu3 %vm305_vm1, %v10824_v12  ;;  %6787 = vmatmul.msk.f32.vlgmr.msra.gmra.mxu2 %vm305_vm1, %v10826_v23  ;;  %10831 = vst [vmem:[#allocation73_spill] sm:$0xff] %v8600_v19 }
 0x2ee   :  { %2705 = vmatpush.msrb.mxu3 %v6961_v2  ;;  %2783 = vmatpush.msra.mxu2 %v6975_v15  ;;  %v8603_v26 = vpop.permute.xlu1 %3409  ;;  %v8605_v2 = vpop.permute.xlu0 %3381 }
 0x2ef   :  { %10832 = vst [vmem:[#allocation79_spill] sm:$0xff] %v8603_v26 }
 0x2f0   :  { %10833 = vst [vmem:[#allocation82_spill] sm:$0xff] %v8605_v2 }
 0x2f3   :  { %v8607_v12 = vpop.permute.xlu2 %3351 }
 0x2f5   :  { %6789 = vmatmul.msk.f32.vlgmr.msra.gmra.mxu3 %vm305_vm1, %v10828_v7 }
 0x2f6   :  { %2809 = vmatpush.msra.mxu3 %v6976_v25  ;;  %v8609_v38 = vpop.permute.xlu1 %3353  ;;  %v8611_v15 = vpop.permute.xlu0 %3295 }
 0x2f7   :  { %10834 = vst [vmem:[#allocation56_spill] sm:$0xff] %v8611_v15  ;;  %v1145_v15 = vadd.f32 %v1144_v56, %v1143_v39  ;;  %v1199_v39 = vsel %vm305_vm1, %v8447_v6, 0.0 }
 0x2f9   :  { %v1146_v47 = vrot.slane %v1145_v15, 2 }
 0x2fa   :  { %v1403_v10 = vpop.f32.mrf.mxu3 }
 0x2fb   :  { %1671 = vst.msk [vmem:[#allocation2 + $0x28] sm:$0xff] %vm305_vm1, %v1403_v10  ;;  %v8613_v23 = vpop.permute.xlu2 %3465  ;;  %v1147_v6 = vadd.f32 %v1146_v47, %v1145_v15 }
 0x2fd   :  { %v1148_v21 = vrot.slane %v1147_v6, 1 }
 0x2fe   :  { %v8615_v25 = vpop.permute.xlu1 %3211  ;;  %v8617_v7 = vpop.permute.xlu0 %3239 }
 0x303   :  { %v8619_v28 = vpop.permute.xlu2 %3463 }
 0x306   :  { %v8621_v42 = vpop.permute.xlu1 %3325  ;;  %v8623_v10 = vpop.permute.xlu0 %3213 }
 0x30b   :  { %v8626_v30 = vpop.permute.xlu2 %3435 }
 0x30e   :  { %v8628_v54 = vpop.permute.xlu1 %3323  ;;  %v8630_v61 = vpop.permute.xlu0 %3491 }
 0x30f   :  { %10835 = vst [vmem:[#allocation86_spill] sm:$0xff] %v8630_v61  ;;  %v1137_v61 = vrot.slane %v1136_v43, 4 }
 0x311   :  { %v1138_v51 = vadd.f32 %v1137_v61, %v1136_v43  ;;  %v1200_v61 = vrot.slane %v1199_v39, 4 }
 0x313   :  { %v1139_v43 = vrot.slane %v1138_v51, 2  ;;  %v1201_v58 = vadd.f32 %v1200_v61, %v1199_v39 }
 0x315   :  { %v1202_v39 = vrot.slane %v1201_v58, 2 }
 0x316   :  { %v8641_v52 = vpop.permute.xlu0 %3521  ;;  %v8644_v26 = vpop.permute.xlu1 %3577 }
 0x317   :  { %10836 = vst [vmem:[#allocation54_spill] sm:$0xff] %v8641_v52 }
 0x320   :  { %v1429_v29 = vpop.f32.mrf.mxu2 }
 0x321   :  { %1672 = vst.msk [vmem:[#allocation2 + $0x30] sm:$0xff] %vm305_vm1, %v1429_v29  ;;  %v1164_v29 = vsel %vm305_vm1, %v8290_v46, 0.0 }
 0x328   :  { %v1455_v31 = vpop.f32.mrf.mxu3 }
 0x329   :  { %1673 = vst.msk [vmem:[#allocation2 + $0x38] sm:$0xff] %vm305_vm1, %v1455_v31  ;;  %v1165_v31 = vrot.slane %v1164_v29, 4 }
 0x32a   :  { %v2262_v36 = vpop.xlane.xlu2 %2261 }
 0x32b   :  { %7188 = vrcp.f32 %v2262_v36  ;;  %v2391_v1 = vand.u32 2147483648, %v2262_v36  ;;  %v2389_v46 = vand.u32 2147483647, %v2262_v36  ;;  %v1166_v2 = vadd.f32 %v1165_v31, %v1164_v29 }
 0x32c   :  { %vm2385_vm11 = vweird.f32 %v2262_v36 }
 0x32d   :  { %v2392_v24 = vor.u32 1.1754944e-38, %v2391_v1  ;;  %vm2390_vm13 = vcmp.eq.f32.partialorder %v2389_v46, 8.507059e+37 }
 0x331   :  { %v7189_v48 = vpop.eup %7188 }
 0x332   :  { %v2381_v41 = vmul.f32 %v7189_v48, %v2262_v36  ;;  %v8639_v19 = vpop.xlane.xlu2 %2285  ;;  %vm2386_vm10 = vweird.f32 %v7189_v48 }
 0x333   :  { %7190 = vrcp.f32 %v8639_v19  ;;  %vm2387_vm12 = vmor %vm2385_vm11, %vm2386_vm10  ;;  %v2511_v46 = vand.u32 2147483648, %v8639_v19  ;;  %vm2505_vm15 = vweird.f32 %v8639_v19 }
 0x334   :  { %v2382_v60 = vsub.f32 1.0, %v2381_v41  ;;  %v1220_v41 = vsel %vm305_vm1, %v8507_v17, 0.0 }
 0x335   :  { %v1221_v17 = vrot.slane %v1220_v41, 4 }
 0x336   :  { %v2383_v59 = vmul.f32 %v7189_v48, %v2382_v60 }
 0x338   :  { %v2384_v56 = vadd.f32 %v7189_v48, %v2383_v59  ;;  %v1481_v60 = vpop.f32.mrf.mxu2  ;;  %v1167_v59 = vrot.slane %v1166_v2, 2 }
 0x339   :  { %v7191_v52 = vpop.eup %7190  ;;  %1674 = vst.msk [vmem:[#allocation2 + $0x40] sm:$0xff] %vm305_vm1, %v1481_v60 }
 0x33a   :  { %v2388_v5 = vsel %vm2387_vm12, %v7189_v48, %v2384_v56  ;;  %v2501_v11 = vmul.f32 %v7191_v52, %v8639_v19  ;;  %v8659_v48 = vpop.permute.xlu0 %3519  ;;  %vm2506_vm14 = vweird.f32 %v7191_v52 }
 0x33b   :  { %v2393_v29 = vsel %vm2390_vm13, %v2392_v24, %v2388_v5  ;;  %10837 = vst [vmem:[#allocation80_spill] sm:$0xff] %v8659_v48  ;;  %v2509_v5 = vand.u32 2147483647, %v8639_v19  ;;  %v8666_v24 = vadd.f32 %v1139_v43, %v1138_v51  ;;  %vm2507_vm2 = vmor %vm2505_vm15, %vm2506_vm14  ;;  %v2512_v48 = vor.u32 1.1754944e-38, %v2511_v46 }
 0x33c   :  { %v2502_v36 = vsub.f32 1.0, %v2501_v11  ;;  %v8654_v31 = vpop.xlane.xlu1 %2252  ;;  %v8657_v1 = vmul.f32 %v8357_v53, %v2393_v29  ;;  %v1192_v53 = vsel %vm305_vm1, %v8422_v8, 0.0  ;;  %v1168_v29 = vadd.f32 %v1167_v59, %v1166_v2 }
 0x33d   :  { %7192 = vrcp.f32 %v8654_v31  ;;  %v1193_v51 = vrot.slane %v1192_v53, 4  ;;  %vm2510_vm3 = vcmp.eq.f32.partialorder %v2509_v5, 8.507059e+37  ;;  %v8674_v2 = vadd.f32 %v1148_v21, %v1147_v6 }
 0x33e   :  { %v2503_v56 = vmul.f32 %v7191_v52, %v2502_v36  ;;  %v2572_v47 = vsel %vm305_vm1, %v8657_v1, 0.0  ;;  %v1222_v36 = vadd.f32 %v1221_v17, %v1220_v41  ;;  %v1169_v46 = vrot.slane %v1168_v29, 1 }
 0x33f   :  { %v2573_v15 = vrot.slane %v2572_v47, 4  ;;  %v1175_v5 = vadd.f32 %v1174_v35, %v1173_v63  ;;  %v1227_v21 = vsel %vm305_vm1, %v8523_v3, 0.0  ;;  %v2344_v63 = vand.u32 2147483647, %v8654_v31 }
 0x340   :  { %v2504_v11 = vadd.f32 %v7191_v52, %v2503_v56  ;;  %v1507_v60 = vpop.f32.mrf.mxu3  ;;  %v1533_v34 = vpop.f32.mrf.mxu2  ;;  %vm2340_vm5 = vweird.f32 %v8654_v31 }
 0x341   :  { %1675 = vst.msk [vmem:[#allocation2 + $0x48] sm:$0xff] %vm305_vm1, %v1507_v60  ;;  %v2574_v40 = vadd.f32 %v2573_v15, %v2572_v47  ;;  %v8683_v47 = vadd.f32 %v1193_v51, %v1192_v53  ;;  %v8687_v15 = vadd.f32 %v1202_v39, %v1201_v58  ;;  %v1176_v58 = vrot.slane %v1175_v5, 1 }
 0x342   :  { %v2508_v43 = vsel %vm2507_vm2, %v7191_v52, %v2504_v11  ;;  %1676 = vst.msk [vmem:[#allocation2 + $0x50] sm:$0xff] %vm305_vm1, %v1533_v34  ;;  %v1223_v52 = vrot.slane %v1222_v36, 2  ;;  %v8691_v11 = vpop.permute.xlu0 %3437  ;;  %vm2345_vm7 = vcmp.eq.f32.partialorder %v2344_v63, 8.507059e+37 }
 0x343   :  { %v7193_v8 = vpop.eup %7192  ;;  %v2575_v61 = vrot.slane %v2574_v40, 2  ;;  %v2513_v56 = vsel %vm2510_vm3, %v2512_v48, %v2508_v43 }
 0x344   :  { %v2336_v41 = vmul.f32 %v7193_v8, %v8654_v31  ;;  %v8677_v59 = vpop.xlane.xlu1 %2264  ;;  %v8680_v17 = vmul.f32 %v8395_v22, %v2513_v56  ;;  %v2346_v22 = vand.u32 2147483648, %v8654_v31  ;;  %vm2341_vm4 = vweird.f32 %v7193_v8 }
 0x345   :  { %7194 = vrcp.f32 %v8677_v59  ;;  %v2576_v6 = vadd.f32 %v2575_v61, %v2574_v40  ;;  %v1170_v40 = vadd.f32 %v1169_v46, %v1168_v29  ;;  %v1224_v39 = vadd.f32 %v1223_v52, %v1222_v36  ;;  %vm2342_vm6 = vmor %vm2340_vm5, %vm2341_vm4 }
 0x346   :  { %v2337_v34 = vsub.f32 1.0, %v2336_v41  ;;  %v2628_v48 = vsel %vm305_vm1, %v8680_v17, 0.0  ;;  %v1228_v61 = vrot.slane %v1227_v21, 4  ;;  %v2347_v33 = vor.u32 1.1754944e-38, %v2346_v22 }
 0x347   :  { %v2629_v60 = vrot.slane %v2628_v48, 4  ;;  %v2577_v53 = vrot.slane %v2576_v6, 1  ;;  %v2404_v63 = vand.u32 2147483647, %v8677_v59  ;;  %vm2400_vm9 = vweird.f32 %v8677_v59 }
 0x348   :  { %v2338_v43 = vmul.f32 %v7193_v8, %v2337_v34  ;;  %v1559_v35 = vpop.f32.mrf.mxu3  ;;  %v1585_v3 = vpop.f32.mrf.mxu2 }
 0x349   :  { %1677 = vst.msk [vmem:[#allocation2 + $0x58] sm:$0xff] %vm305_vm1, %v1559_v35  ;;  %v2630_v51 = vadd.f32 %v2629_v60, %v2628_v48  ;;  %v2578_v41 = vadd.f32 %v2577_v53, %v2576_v6  ;;  %v8707_v6 = vadd.f32 %v1176_v58, %v1175_v5  ;;  %v1225_v60 = vrot.slane %v1224_v39, 1 }
 0x34a   :  { %v2339_v56 = vadd.f32 %v7193_v8, %v2338_v43  ;;  %1678 = vst.msk [vmem:[#allocation2 + $0x60] sm:$0xff] %vm305_vm1, %v1585_v3  ;;  %v8709_v43 = vadd.f32 %v1228_v61, %v1227_v21  ;;  %vm2405_vm11 = vcmp.eq.f32.partialorder %v2404_v63, 8.507059e+37 }
 0x34b   :  { %v7195_v19 = vpop.eup %7194  ;;  %v2631_v48 = vrot.slane %v2630_v51, 2  ;;  %v8704_v31 = vadd.f32 %v2578_v41, %v1170_v40  ;;  %v2406_v40 = vand.u32 2147483648, %v8677_v59  ;;  %v1226_v3 = vadd.f32 %v1225_v60, %v1224_v39 }
 0x34c   :  { %v2343_v29 = vsel %vm2342_vm6, %v7193_v8, %v2339_v56  ;;  %v2396_v36 = vmul.f32 %v7195_v19, %v8677_v59  ;;  %v8702_v52 = vpop.xlane.xlu1 %2276  ;;  %v7025_v8 = vunpack.i.l.bf16 %v8537_v27  ;;  %vm2401_vm8 = vweird.f32 %v7195_v19 }
 0x34d   :  { %10838 = vst [vmem:[#allocation84_spill] sm:$0xff] %v8704_v31  ;;  %v2348_v46 = vsel %vm2345_vm7, %v2347_v33, %v2343_v29  ;;  %7196 = vrcp.f32 %v8702_v52  ;;  %v2632_v53 = vadd.f32 %v2631_v48, %v2630_v51  ;;  %v2464_v58 = vand.u32 2147483647, %v8702_v52  ;;  %vm2402_vm10 = vmor %vm2400_vm9, %vm2401_vm8 }
 0x34e   :  { %v2349_v22 = vmul.f32 %v8452_v14, %v2348_v46  ;;  %v2397_v35 = vsub.f32 1.0, %v2396_v36  ;;  %v8715_v56 = vpop.xlane.xlu0 %2249  ;;  %v7030_v51 = vunpack.i.l.bf16 %v8562_v50  ;;  %v2466_v48 = vand.u32 2147483648, %v8702_v52 }
 0x34f   :  { %7198 = vrcp.f32 %v8715_v56  ;;  %v2633_v36 = vrot.slane %v2632_v53, 1  ;;  %vm2460_vm12 = vweird.f32 %v8702_v52  ;;  %vm8730_vm13 = vcmp.eq.f32.partialorder %v2464_v58, 8.507059e+37 }
 0x350   :  { %v2551_v33 = vsel %vm305_vm1, %v2349_v22, 0.0  ;;  %v2398_v5 = vmul.f32 %v7195_v19, %v2397_v35  ;;  %v1611_v21 = vpop.f32.mrf.mxu3  ;;  %6797 = vmatmul.msk.f32.vlgmr.msra.gmra.mxu1 %vm305_vm1, %v2349_v22  ;;  %v1637_v29 = vpop.f32.mrf.mxu2  ;;  %v2407_v22 = vor.u32 1.1754944e-38, %v2406_v40  ;;  %vm2325_vm15 = vweird.f32 %v8715_v56 }
 0x351   :  { %v2552_v61 = vrot.slane %v2551_v33, 4  ;;  %1679 = vst.msk [vmem:[#allocation2 + $0x68] sm:$0xff] %vm305_vm1, %v1611_v21  ;;  %2965 = vmatpush.msra.mxu1 %v7025_v8  ;;  %v2634_v8 = vadd.f32 %v2633_v36, %v2632_v53 }
 0x352   :  { %v2399_v41 = vadd.f32 %v7195_v19, %v2398_v5  ;;  %1680 = vst.msk [vmem:[#allocation2 + $0x70] sm:$0xff] %vm305_vm1, %v1637_v29 }
 0x353   :  { %v7197_v46 = vpop.eup %7196  ;;  %v2553_v35 = vadd.f32 %v2552_v61, %v2551_v33  ;;  %v2329_v61 = vand.u32 2147483647, %v8715_v56  ;;  %v8743_v53 = vadd.f32 %v2634_v8, %v1226_v3 }
 0x354   :  { %v2403_v21 = vsel %vm2402_vm10, %v7195_v19, %v2399_v41  ;;  %v2456_v39 = vmul.f32 %v7197_v46, %v8702_v52  ;;  %v8734_v59 = vpop.xlane.xlu1 %2288  ;;  %v2467_v19 = vor.u32 1.1754944e-38, %v2466_v48  ;;  %v2331_v41 = vand.u32 2147483648, %v8715_v56 }
 0x355   :  { %v2554_v5 = vrot.slane %v2553_v35, 2  ;;  %v2408_v33 = vsel %vm2405_vm11, %v2407_v22, %v2403_v21  ;;  %7200 = vrcp.f32 %v8734_v59  ;;  %v7199_v63 = vpop.eup %7198  ;;  %vm2461_vm14 = vweird.f32 %v7197_v46  ;;  %10841 = vst [vmem:[#allocation57_spill] sm:$0xff] %v8743_v53 }
 0x356   :  { %v2409_v40 = vmul.f32 %v8499_v18, %v2408_v33  ;;  %v2457_v29 = vsub.f32 1.0, %v2456_v39  ;;  %v2321_v34 = vmul.f32 %v7199_v63, %v8715_v56  ;;  %v8741_v13 = vpop.xlane.xlu0 %2273  ;;  %v2524_v22 = vand.u32 2147483647, %v8734_v59  ;;  %vm2462_vm4 = vmor %vm2460_vm12, %vm2461_vm14 }
 0x357   :  { %v2555_v58 = vadd.f32 %v2554_v5, %v2553_v35  ;;  %v2526_v21 = vand.u32 2147483648, %v8734_v59  ;;  %7202 = vrcp.f32 %v8741_v13  ;;  %vm8750_vm2 = vcmp.eq.f32.partialorder %v2329_v61, 8.507059e+37 }
 0x358   :  { %v2458_v36 = vmul.f32 %v7197_v46, %v2457_v29  ;;  %v1663_v18 = vpop.f32.mrf.mxu3  ;;  %6801 = vmatmul.msk.f32.vlgmr.msrb.gmra.mxu1 %vm305_vm1, %v2409_v40  ;;  %v2322_v39 = vsub.f32 1.0, %v2321_v34  ;;  %v2332_v8 = vor.u32 1.1754944e-38, %v2331_v41  ;;  %vm2520_vm3 = vweird.f32 %v8734_v59  ;;  %v1707_v5 = vpop.f32.mrf.mxu2 }
 0x359   :  { %v2556_v48 = vrot.slane %v2555_v58, 1  ;;  %1681 = vst.msk [vmem:[#allocation2 + $0x78] sm:$0xff] %vm305_vm1, %v1663_v18  ;;  %3069 = vmatpush.msrb.mxu1 %v7030_v51  ;;  %v2579_v33 = vsel %vm305_vm1, %v2409_v40, 0.0  ;;  %vm2326_vm5 = vweird.f32 %v7199_v63  ;;  %v8760_v61 = vmul.f32 0.35355338, %v1707_v5 }
 0x35a   :  { %v2459_v3 = vadd.f32 %v7197_v46, %v2458_v36  ;;  %v2323_v34 = vmul.f32 %v7199_v63, %v2322_v39  ;;  %vm8763_vm6 = vcmp.eq.f32.partialorder %v2524_v22, 8.507059e+37  ;;  %v2527_v36 = vor.u32 1.1754944e-38, %v2526_v21  ;;  %vm2327_vm7 = vmor %vm2325_vm15, %vm2326_vm5 }
 0x35b   :  { %v7201_v29 = vpop.eup %7200  ;;  %v2557_v14 = vadd.f32 %v2556_v48, %v2555_v58  ;;  %v2146_v52 = vsel %vm305_vm1, %v8760_v61, -inf  ;;  %v2580_v39 = vrot.slane %v2579_v33, 4  ;;  %vm2445_vm8 = vweird.f32 %v8741_v13 }
 0x35c   :  { %v2463_v53 = vsel %vm2462_vm4, %v7197_v46, %v2459_v3  ;;  %v2516_v51 = vmul.f32 %v7201_v29, %v8734_v59  ;;  %v2324_v18 = vadd.f32 %v7199_v63, %v2323_v34  ;;  %2147 = vmax.xlane.f32.xlu1 %v2146_v52  ;;  %vm2521_vm9 = vweird.f32 %v7201_v29 }
 0x35d   :  { %v2468_v40 = vsel %vm8730_vm13, %v2467_v19, %v2463_v53  ;;  %v7203_v31 = vpop.eup %7202  ;;  %v8776_v58 = vadd.f32 %v2557_v14, %v8674_v2  ;;  %v2449_v53 = vand.u32 2147483647, %v8741_v13  ;;  %v2581_v22 = vadd.f32 %v2580_v39, %v2579_v33  ;;  %vm2522_vm11 = vmor %vm2520_vm3, %vm2521_vm9 }
 0x35e   :  { %v2469_v5 = vmul.f32 %v8525_v45, %v2468_v40  ;;  %v2517_v46 = vsub.f32 1.0, %v2516_v51  ;;  %v2328_v60 = vsel %vm2327_vm7, %v7199_v63, %v2324_v18  ;;  %v2441_v19 = vmul.f32 %v7203_v31, %v8741_v13 }
 0x35f   :  { %10846 = vst [vmem:[#allocation47_spill] sm:$0xff] %v8776_v58  ;;  %v2333_v56 = vsel %vm8750_vm2, %v2332_v8, %v2328_v60  ;;  %vm2446_vm10 = vweird.f32 %v7203_v31  ;;  %v2451_v33 = vand.u32 2147483648, %v8741_v13  ;;  %v2582_v40 = vrot.slane %v2581_v22, 2 }
 0x360   :  { %v2607_v21 = vsel %vm305_vm1, %v2469_v5, 0.0  ;;  %v2518_v48 = vmul.f32 %v7201_v29, %v2517_v46  ;;  %v1735_v45 = vpop.f32.mrf.mxu3  ;;  %6805 = vmatmul.msk.f32.vlgmr.msra.gmra.mxu1 %vm305_vm1, %v2469_v5  ;;  %v2442_v34 = vsub.f32 1.0, %v2441_v19  ;;  %v2334_v14 = vmul.f32 %v8533_v55, %v2333_v56  ;;  %v1819_v51 = vpop.f32.mrf.mxu2  ;;  %vm2447_vm12 = vmor %vm2445_vm8, %vm2446_vm10 }
 0x361   :  { %v2608_v3 = vrot.slane %v2607_v21, 4  ;;  %v8784_v2 = vmul.f32 0.35355338, %v1735_v45  ;;  %6816 = vmatpush.xpose.msk.msra.mxu1 %vm305_vm1, %v8581_v44  ;;  %v8793_v8 = vmul.f32 0.35355338, %v1819_v51  ;;  %v10847_v39 = vunpack.i.h.bf16 %v8537_v27 }
 0x362   :  { %v2519_v63 = vadd.f32 %v7201_v29, %v2518_v48  ;;  %v2443_v35 = vmul.f32 %v7203_v31, %v2442_v34  ;;  %v2544_v52 = vsel %vm305_vm1, %v2334_v14, 0.0  ;;  %6796 = vmatmul.msk.f32.vlgmr.msrb.gmra.mxu0 %vm305_vm1, %v2334_v14  ;;  %v2583_v46 = vadd.f32 %v2582_v40, %v2581_v22 }
 0x363   :  { %v2609_v18 = vadd.f32 %v2608_v3, %v2607_v21  ;;  %v2545_v55 = vrot.slane %v2544_v52, 4  ;;  %2939 = vmatpush.msrb.mxu0 %v10847_v39  ;;  %v2149_v5 = vsel %vm305_vm1, %v8784_v2, -inf  ;;  %v2158_v21 = vsel %vm305_vm1, %v8793_v8, -inf }
 0x364   :  { %v2523_v44 = vsel %vm2522_vm11, %v7201_v29, %v2519_v63  ;;  %v2444_v19 = vadd.f32 %v7203_v31, %v2443_v35  ;;  %2150 = vmax.xlane.f32.xlu2 %v2149_v5  ;;  %v2452_v27 = vor.u32 1.1754944e-38, %v2451_v33  ;;  %2159 = vmax.xlane.f32.xlu0 %v2158_v21  ;;  %v2584_v45 = vrot.slane %v2583_v46, 1 }
 0x365   :  { %v2610_v60 = vrot.slane %v2609_v18, 2  ;;  %v2528_v59 = vsel %vm8763_vm6, %v2527_v36, %v2523_v44  ;;  %v2546_v29 = vadd.f32 %v2545_v55, %v2544_v52  ;;  %vm2450_vm13 = vcmp.eq.f32.partialorder %v2449_v53, 8.507059e+37 }
 0x366   :  { %v2529_v48 = vmul.f32 %v8548_v57, %v2528_v59  ;;  %v2448_v56 = vsel %vm2447_vm12, %v7203_v31, %v2444_v19  ;;  %v1230_v41 = vrot.slane %v8709_v43, 2  ;;  %v2585_v14 = vadd.f32 %v2584_v45, %v2583_v46 }
 0x367   :  { %v2611_v22 = vadd.f32 %v2610_v60, %v2609_v18  ;;  %v2547_v36 = vrot.slane %v2546_v29, 2  ;;  %v2453_v34 = vsel %vm2450_vm13, %v2452_v27, %v2448_v56  ;;  %v10848_v53 = vrot.slane %v8687_v15, 1 }
 0x368   :  { %v1847_v3 = vpop.f32.mrf.mxu3  ;;  %6809 = vmatmul.msk.f32.vlgmr.msrb.gmra.mxu1 %vm305_vm1, %v2529_v48  ;;  %v2635_v57 = vsel %vm305_vm1, %v2529_v48, 0.0  ;;  %v2454_v33 = vmul.f32 %v8556_v16, %v2453_v34  ;;  %v7031_v40 = vunpack.i.h.bf16 %v8562_v50  ;;  %v1931_v35 = vpop.f32.mrf.mxu2  ;;  %v8822_v52 = vadd.f32 %v2585_v14, %v8707_v6 }
 0x369   :  { %v2612_v63 = vrot.slane %v2611_v22, 1  ;;  %v8812_v13 = vmul.f32 0.35355338, %v1847_v3  ;;  %6824 = vmatpush.xpose.msk.msrb.mxu1 %vm305_vm1, %v8609_v38  ;;  %v2636_v31 = vrot.slane %v2635_v57, 4  ;;  %v1205_v51 = vadd.f32 %v10848_v53, %v8687_v15 }
 0x36a   :  { %v2548_v18 = vadd.f32 %v2547_v36, %v2546_v29  ;;  %v8824_v44 = vmul.f32 0.35355338, %v1931_v35  ;;  %6800 = vmatmul.msk.f32.vlgmr.msra.gmra.mxu0 %vm305_vm1, %v8657_v1  ;;  %v2600_v38 = vsel %vm305_vm1, %v2454_v33, 0.0  ;;  %v1231_v15 = vadd.f32 %v1230_v41, %v8709_v43 }
 0x36b   :  { %v2161_v16 = vsel %vm305_vm1, %v8812_v13, -inf  ;;  %v2613_v55 = vadd.f32 %v2612_v63, %v2611_v22  ;;  %3043 = vmatpush.msra.mxu0 %v7031_v40  ;;  %v2601_v50 = vrot.slane %v2600_v38, 4  ;;  %v2637_v5 = vadd.f32 %v2636_v31, %v2635_v57 }
 0x36c   :  { %v2549_v39 = vrot.slane %v2548_v18, 1  ;;  %2162 = vmax.xlane.f32.xlu1 %v2161_v16  ;;  %v10849_v6 = vrot.slane %v8666_v24, 1  ;;  %v2170_v1 = vsel %vm305_vm1, %v8824_v44, -inf  ;;  %v10851_v59 = vrot.slane %v8683_v47, 2 }
 0x36d   :  { %v8837_v60 = vadd.f32 %v2613_v55, %v1205_v51  ;;  %2171 = vmax.xlane.f32.xlu2 %v2170_v1  ;;  %v2602_v48 = vadd.f32 %v2601_v50, %v2600_v38  ;;  %v2638_v27 = vrot.slane %v2637_v5, 2  ;;  %v1232_v45 = vrot.slane %v1231_v15, 1 }
 0x36e   :  { %v1142_v46 = vadd.f32 %v10849_v6, %v8666_v24  ;;  %v1196_v19 = vadd.f32 %v10851_v59, %v8683_v47  ;;  %v2550_v21 = vadd.f32 %v2549_v39, %v2548_v18 }
 0x36f   :  { %10850 = vst [vmem:[#allocation68_spill] sm:$0xff] %v8837_v60  ;;  %v2603_v24 = vrot.slane %v2602_v48, 2  ;;  %v2639_v22 = vadd.f32 %v2638_v27, %v2637_v5  ;;  %v1233_v57 = vadd.f32 %v1232_v45, %v1231_v15 }
 0x370   :  { %v8842_v29 = vadd.f32 %v2550_v21, %v1142_v46  ;;  %v1959_v43 = vpop.f32.mrf.mxu3  ;;  %6817 = vmatmul.msk.f32.vlgmr.msra.gmra.mxu1 %vm305_vm1, %v8617_v7  ;;  %v1197_v41 = vrot.slane %v1196_v19, 1  ;;  %v2043_v47 = vpop.f32.mrf.mxu2 }
 0x371   :  { %v8846_v56 = vmul.f32 0.35355338, %v1959_v43  ;;  %6832 = vmatpush.xpose.msk.msra.mxu1 %vm305_vm1, %v8613_v23  ;;  %v2604_v36 = vadd.f32 %v2603_v24, %v2602_v48  ;;  %v2640_v3 = vrot.slane %v2639_v22, 1  ;;  %v8850_v34 = vmul.f32 0.35355338, %v2043_v47  ;;  %v10858_v47 = vld [vmem:[#allocation20_spill] sm:$0xff] }
 0x372   :  { %6804 = vmatmul.msk.f32.vlgmr.msrb.gmra.mxu0 %vm305_vm1, %v2454_v33  ;;  %v1198_v31 = vadd.f32 %v1197_v41, %v1196_v19 }
 0x373   :  { %v2173_v14 = vsel %vm305_vm1, %v8846_v56, -inf  ;;  %v2605_v7 = vrot.slane %v2604_v36, 1  ;;  %6814 = vmatpush.xpose.msk.msrb.mxu0 %vm305_vm1, %v8623_v10  ;;  %v2641_v63 = vadd.f32 %v2640_v3, %v2639_v22  ;;  %v2182_v23 = vsel %vm305_vm1, %v8850_v34, -inf  ;;  %v10855_v22 = vld [vmem:[#allocation18_spill] sm:$0xff] }
 0x374   :  { %2174 = vmax.xlane.f32.xlu1 %v2173_v14 }
 0x375   :  { %v2606_v53 = vadd.f32 %v2605_v7, %v2604_v36  ;;  %2183 = vmax.xlane.f32.xlu2 %v2182_v23  ;;  %v8859_v51 = vadd.f32 %v2641_v63, %v1233_v57 }
 0x377   :  { %v8861_v40 = vadd.f32 %v2606_v53, %v1198_v31 }
 0x378   :  { %v2071_v33 = vpop.f32.mrf.mxu3  ;;  %6825 = vmatmul.msk.f32.vlgmr.msrb.gmra.mxu1 %vm305_vm1, %v8607_v12 }
 0x379   :  { %v8865_v18 = vmul.f32 0.35355338, %v2071_v33  ;;  %6840 = vmatpush.xpose.msk.msrb.mxu1 %vm305_vm1, %v8644_v26 }
 0x37a   :  { %6808 = vmatmul.msk.f32.vlgmr.msra.gmra.mxu0 %vm305_vm1, %v8680_v17 }
 0x37b   :  { %v2185_v10 = vsel %vm305_vm1, %v8865_v18, -inf  ;;  %6822 = vmatpush.xpose.msk.msra.mxu0 %vm305_vm1, %v8621_v42 }
 0x37d   :  { %2186 = vmax.xlane.f32.xlu2 %v2185_v10 }
 0x380   :  { %6833 = vmatmul.msk.f32.vlgmr.msra.gmra.mxu1 %vm305_vm1, %v8619_v28 }
 0x382   :  { %6815 = vmatmul.msk.f32.vlgmr.msrb.gmra.mxu0 %vm305_vm1, %v8615_v25 }
 0x383   :  { %6830 = vmatpush.xpose.msk.msrb.mxu0 %vm305_vm1, %v8691_v11 }
 0x38a   :  { %6823 = vmatmul.msk.f32.vlgmr.msra.gmra.mxu0 %vm305_vm1, %v8628_v54 }
 0x392   :  { %6831 = vmatmul.msk.f32.vlgmr.msrb.gmra.mxu0 %vm305_vm1, %v8626_v30 }
 0x3cf   :  { %v2148_v26 = vpop.xlane.xlu1 %2147 }
 0x3d0   :  { %v2194_v12 = vsub.f32 %v8760_v61, %v2148_v26 }
 0x3d2   :  { %v2210_v42 = vmul.f32 1.442695, %v2194_v12 }
 0x3d4   :  { %7204 = vpow2.f32 %v2210_v42 }
 0x3d7   :  { %v2151_v17 = vpop.xlane.xlu2 %2150  ;;  %v2160_v35 = vpop.xlane.xlu0 %2159 }
 0x3d8   :  { %v2195_v28 = vsub.f32 %v8784_v2, %v2151_v17  ;;  %v2198_v25 = vsub.f32 %v8793_v8, %v2160_v35 }
 0x3da   :  { %v2212_v16 = vmul.f32 1.442695, %v2195_v28  ;;  %v8888_v38 = vpop.eup %7204  ;;  %v2218_v11 = vmul.f32 1.442695, %v2198_v25 }
 0x3db   :  { %v2242_v54 = vsel %vm305_vm1, %v8888_v38, 0.0 }
 0x3dc   :  { %7206 = vpow2.f32 %v2212_v16  ;;  %2243 = vadd.xlane.f32.xlu2 %v2242_v54 }
 0x3dd   :  { %7208 = vpow2.f32 %v2218_v11 }
 0x3df   :  { %v2163_v30 = vpop.xlane.xlu1 %2162 }
 0x3e0   :  { %v2199_v61 = vsub.f32 %v8812_v13, %v2163_v30  ;;  %v2172_v55 = vpop.xlane.xlu2 %2171 }
 0x3e1   :  { %v2202_v39 = vsub.f32 %v8824_v44, %v2172_v55  ;;  %v8903_v44 = vpop.f32.mrf.mxu1 }
 0x3e2   :  { %v2220_v2 = vmul.f32 1.442695, %v2199_v61  ;;  %v8894_v50 = vpop.eup %7206  ;;  %10852 = vst [vmem:[#allocation51_spill] sm:$0xff] %v8903_v44 }
 0x3e3   :  { %v8896_v8 = vpop.eup %7208  ;;  %v2226_v15 = vmul.f32 1.442695, %v2202_v39  ;;  %v2245_v5 = vsel %vm305_vm1, %v8894_v50, 0.0 }
 0x3e4   :  { %7210 = vpow2.f32 %v2220_v2  ;;  %2246 = vadd.xlane.f32.xlu0 %v2245_v5  ;;  %v2254_v6 = vsel %vm305_vm1, %v8896_v8, 0.0 }
 0x3e5   :  { %7212 = vpow2.f32 %v2226_v15  ;;  %2255 = vadd.xlane.f32.xlu1 %v2254_v6  ;;  %v1122_v6 = vsel %vm305_vm1, %v8162_v37, 0.0 }
 0x3e7   :  { %v2175_v13 = vpop.xlane.xlu1 %2174 }
 0x3e8   :  { %v2203_v46 = vsub.f32 %v8846_v56, %v2175_v13  ;;  %v8925_v56 = vpop.f32.mrf.mxu0  ;;  %v2184_v14 = vpop.xlane.xlu2 %2183  ;;  %v1129_v13 = vsel %vm305_vm1, %v8192_v9, 0.0 }
 0x3e9   :  { %v8915_v43 = vpop.f32.mrf.mxu1  ;;  %10856 = vst [vmem:[#allocation64_spill] sm:$0xff] %v8925_v56  ;;  %v2206_v7 = vsub.f32 %v8850_v34, %v2184_v14 }
 0x3ea   :  { %v8905_v1 = vpop.eup %7210  ;;  %v2228_v59 = vmul.f32 1.442695, %v2203_v46  ;;  %10853 = vst [vmem:[#allocation69_spill] sm:$0xff] %v8915_v43 }
 0x3eb   :  { %v2257_v19 = vsel %vm305_vm1, %v8905_v1, 0.0  ;;  %v8909_v21 = vpop.eup %7212  ;;  %v2234_v63 = vmul.f32 1.442695, %v2206_v7  ;;  %v1157_v7 = vsel %vm305_vm1, %v8243_v32, 0.0 }
 0x3ec   :  { %7214 = vpow2.f32 %v2228_v59  ;;  %2258 = vadd.xlane.f32.xlu2 %v2257_v19  ;;  %v2266_v48 = vsel %vm305_vm1, %v8909_v21, 0.0  ;;  %v1123_v59 = vrot.slane %v1122_v6, 4  ;;  %v1130_v19 = vrot.slane %v1129_v13, 4 }
 0x3ed   :  { %2267 = vadd.xlane.f32.xlu0 %v2266_v48  ;;  %7216 = vpow2.f32 %v2234_v63  ;;  %v1150_v48 = vsel %vm305_vm1, %v8218_v20, 0.0  ;;  %v1158_v9 = vrot.slane %v1157_v7, 4 }
 0x3ee   :  { %v1151_v14 = vrot.slane %v1150_v48, 4 }
 0x3f0   :  { %v8931_v36 = vpop.f32.mrf.mxu0  ;;  %v2187_v31 = vpop.xlane.xlu2 %2186 }
 0x3f1   :  { %v8919_v45 = vpop.f32.mrf.mxu1  ;;  %10859 = vst [vmem:[#allocation50_spill] sm:$0xff] %v8931_v36  ;;  %v2207_v53 = vsub.f32 %v8865_v18, %v2187_v31  ;;  %v1152_v31 = vadd.f32 %v1151_v14, %v1150_v48 }
 0x3f2   :  { %v8913_v27 = vpop.eup %7214  ;;  %10854 = vst [vmem:[#allocation55_spill] sm:$0xff] %v8919_v45 }
 0x3f3   :  { %v2269_v24 = vsel %vm305_vm1, %v8913_v27, 0.0  ;;  %v2236_v33 = vmul.f32 1.442695, %v2207_v53  ;;  %v8939_v26 = vpop.eup %7216 }
 0x3f4   :  { %v2278_v34 = vsel %vm305_vm1, %v8939_v26, 0.0 }
 0x3f5   :  { %2270 = vadd.xlane.f32.xlu0 %v2269_v24  ;;  %7218 = vpow2.f32 %v2236_v33  ;;  %v1124_v24 = vadd.f32 %v1123_v59, %v1122_v6  ;;  %v1178_v33 = vsel %vm305_vm1, %v8376_v4, 0.0 }
 0x3f7   :  { %v1125_v63 = vrot.slane %v1124_v24, 2 }
 0x3f8   :  { %v8934_v57 = vpop.f32.mrf.mxu0 }
 0x3f9   :  { %v8927_v41 = vpop.f32.mrf.mxu1  ;;  %10860 = vst [vmem:[#allocation71_spill] sm:$0xff] %v8934_v57  ;;  %v1126_v53 = vadd.f32 %v1125_v63, %v1124_v24 }
 0x3fa   :  { %10857 = vst [vmem:[#allocation58_spill] sm:$0xff] %v8927_v41 }
 0x3fb   :  { %v8947_v28 = vpop.eup %7218 }
 0x3fc   :  { %v2281_v25 = vsel %vm305_vm1, %v8947_v28, 0.0 }
 0x3fe   :  { %3549 = vrot.lane.b32.xlu1 %v7866_v0, %s7558_s26 }
 0x400   :  { %v8937_v10 = vpop.f32.mrf.mxu0 }
 0x401   :  { %v3264_v3 = vpop.f32.mrf.mxu1  ;;  %10861 = vst [vmem:[#allocation59_spill] sm:$0xff] %v8937_v10 }
 0x402   :  { %v8949_v18 = vmul.f32 0.35355338, %v3264_v3  ;;  %v1131_v3 = vadd.f32 %v1130_v19, %v1129_v13  ;;  %v10863_v13 = vld [vmem:[#allocation67_spill] sm:$0xff] }
 0x404   :  { %3547 = vrot.lane.b32.xlu2 %v10855_v22, %s7558_s26  ;;  %v3628_v16 = vsel %vm305_vm1, %v8949_v18, -inf }
 0x408   :  { %v3236_v35 = vpop.f32.mrf.mxu0 }
 0x409   :  { %3575 = vrot.lane.b32.xlu0 %v10858_v47, %s7558_s26  ;;  %v3376_v23 = vpop.f32.mrf.mxu1  ;;  %v8957_v54 = vmul.f32 0.35355338, %v3236_v35  ;;  %v1179_v35 = vrot.slane %v1178_v33, 4 }
 0x40a   :  { %v8955_v11 = vmul.f32 0.35355338, %v3376_v23  ;;  %v1132_v23 = vrot.slane %v1131_v3, 2 }
 0x40b   :  { %v3625_v55 = vsel %vm305_vm1, %v8957_v54, -inf  ;;  %v8991_v59 = vadd.f32 %v1179_v35, %v1178_v33 }
 0x40c   :  { %v3640_v61 = vsel %vm305_vm1, %v8955_v11, -inf }
 0x410   :  { %v3348_v30 = vpop.f32.mrf.mxu0 }
 0x411   :  { %v3488_v12 = vpop.f32.mrf.mxu1  ;;  %v8963_v39 = vmul.f32 0.35355338, %v3348_v30 }
 0x412   :  { %v8941_v42 = vmul.f32 0.35355338, %v3488_v12  ;;  %v1133_v12 = vadd.f32 %v1132_v23, %v1131_v3 }
 0x413   :  { %v3637_v2 = vsel %vm305_vm1, %v8963_v39, -inf }
 0x414   :  { %v3652_v17 = vsel %vm305_vm1, %v8941_v42, -inf }
 0x418   :  { %v3460_v15 = vpop.f32.mrf.mxu0 }
 0x419   :  { %v8967_v5 = vmul.f32 0.35355338, %v3460_v15  ;;  %v10862_v15 = vld [vmem:[#allocation65_spill] sm:$0xff] }
 0x41a   :  { %v6985_v6 = vunpack.i.l.bf16 %v10862_v15 }
 0x41b   :  { %v3649_v46 = vsel %vm305_vm1, %v8967_v5, -inf }
 0x428   :  { %2279 = vadd.xlane.f32.xlu1 %v2278_v34  ;;  %v1153_v34 = vrot.slane %v1152_v31, 2 }
 0x42d   :  { %3653 = vmax.xlane.f32.xlu2 %v3652_v17  ;;  %v1159_v17 = vadd.f32 %v1158_v9, %v1157_v7  ;;  %v10866_v7 = vld [vmem:[#allocation25_spill] sm:$0xff] }
 0x430   :  { %2282 = vadd.xlane.f32.xlu1 %v2281_v25 }
 0x433   :  { %3629 = vmax.xlane.f32.xlu0 %v3628_v16  ;;  %v1127_v16 = vrot.slane %v1126_v53, 1 }
 0x435   :  { %v8994_v3 = vadd.f32 %v1127_v16, %v1126_v53 }
 0x438   :  { %3641 = vmax.xlane.f32.xlu1 %v3640_v61  ;;  %v1134_v61 = vrot.slane %v1133_v12, 1 }
 0x43a   :  { %v8996_v14 = vadd.f32 %v1134_v61, %v1133_v12  ;;  %v9011_v12 = vsel %vm305_vm1, %v8414_v62, 0.0 }
 0x43b   :  { %3626 = vmax.xlane.f32.xlu0 %v3625_v55  ;;  %v8986_v55 = vadd.f32 %v1153_v34, %v1152_v31 }
 0x440   :  { %3638 = vmax.xlane.f32.xlu1 %v3637_v2  ;;  %v1160_v2 = vrot.slane %v1159_v17, 2 }
 0x442   :  { %v8999_v63 = vadd.f32 %v1160_v2, %v1159_v17 }
 0x448   :  { %3650 = vmax.xlane.f32.xlu1 %v3649_v46 }
 0x44f   :  { %v2244_v37 = vpop.xlane.xlu2 %2243 }
 0x450   :  { %7220 = vrcp.f32 %v2244_v37  ;;  %v2301_v24 = vand.u32 2147483648, %v2244_v37  ;;  %vm2295_vm15 = vweird.f32 %v2244_v37  ;;  %v2299_v33 = vand.u32 2147483647, %v2244_v37 }
 0x452   :  { %vm2300_vm3 = vcmp.eq.f32.partialorder %v2299_v33, 8.507059e+37 }
 0x456   :  { %v7221_v20 = vpop.eup %7220 }
 0x457   :  { %v8981_v25 = vpop.xlane.xlu0 %2246  ;;  %v2291_v30 = vmul.f32 %v7221_v20, %v2244_v37  ;;  %vm2296_vm14 = vweird.f32 %v7221_v20 }
 0x458   :  { %v8983_v32 = vpop.xlane.xlu1 %2255  ;;  %7222 = vrcp.f32 %v8981_v25  ;;  %vm9014_vm2 = vmor %vm2295_vm15, %vm2296_vm14  ;;  %vm2310_vm4 = vweird.f32 %v8981_v25 }
 0x459   :  { %7224 = vrcp.f32 %v8983_v32  ;;  %v2292_v4 = vsub.f32 1.0, %v2291_v30  ;;  %v2302_v30 = vor.u32 1.1754944e-38, %v2301_v24  ;;  %v2359_v62 = vand.u32 2147483647, %v8983_v32 }
 0x45a   :  { %vm2355_vm6 = vweird.f32 %v8983_v32 }
 0x45b   :  { %v2293_v48 = vmul.f32 %v7221_v20, %v2292_v4  ;;  %v2361_v4 = vand.u32 2147483648, %v8983_v32  ;;  %vm9042_vm8 = vcmp.eq.f32.partialorder %v2359_v62, 8.507059e+37 }
 0x45d   :  { %v2294_v9 = vadd.f32 %v7221_v20, %v2293_v48  ;;  %v2314_v48 = vand.u32 2147483647, %v8981_v25 }
 0x45e   :  { %v9001_v23 = vpop.eup %7222 }
 0x45f   :  { %v9004_v34 = vpop.xlane.xlu2 %2258  ;;  %v9006_v35 = vpop.eup %7224  ;;  %v2306_v16 = vmul.f32 %v9001_v23, %v8981_v25  ;;  %v2298_v37 = vsel %vm9014_vm2, %v7221_v20, %v2294_v9  ;;  %v2316_v9 = vand.u32 2147483648, %v8981_v25  ;;  %vm2311_vm5 = vweird.f32 %v9001_v23 }
 0x460   :  { %7226 = vrcp.f32 %v9004_v34  ;;  %v2351_v61 = vmul.f32 %v9006_v35, %v8983_v32  ;;  %v9026_v2 = vpop.xlane.xlu0 %2267  ;;  %vm2356_vm7 = vweird.f32 %v9006_v35  ;;  %vm9047_vm9 = vcmp.eq.f32.partialorder %v2314_v48, 8.507059e+37  ;;  %vm9052_vm10 = vmor %vm2310_vm4, %vm2311_vm5 }
 0x461   :  { %v2307_v15 = vsub.f32 1.0, %v2306_v16  ;;  %7228 = vrcp.f32 %v9026_v2  ;;  %7033 = vrot.lane.b32.xlu1 %v10866_v7, %s7559_s27  ;;  %v2303_v16 = vsel %vm2300_vm3, %v2302_v30, %v2298_v37  ;;  %vm9063_vm11 = vmor %vm2355_vm6, %vm2356_vm7  ;;  %vm2370_vm12 = vweird.f32 %v9004_v34 }
 0x462   :  { %v2352_v24 = vsub.f32 1.0, %v2351_v61  ;;  %v2304_v7 = vmul.f32 %v8888_v38, %v2303_v16  ;;  %v2362_v61 = vor.u32 1.1754944e-38, %v2361_v4  ;;  %v2376_v32 = vand.u32 2147483648, %v9004_v34 }
 0x463   :  { %v2308_v17 = vmul.f32 %v9001_v23, %v2307_v15  ;;  %vm2415_vm13 = vweird.f32 %v9026_v2 }
 0x464   :  { %v2353_v31 = vmul.f32 %v9006_v35, %v2352_v24  ;;  %v2317_v24 = vor.u32 1.1754944e-38, %v2316_v9  ;;  %v2530_v62 = vsel %vm305_vm1, %v2304_v7, 0.0  ;;  %6794 = vmatmul.msk.f32.vlgmr.msrb.gmra.mxu2 %vm305_vm1, %v2304_v7  ;;  %v2374_v9 = vand.u32 2147483647, %v9004_v34 }
 0x465   :  { %v2309_v15 = vadd.f32 %v9001_v23, %v2308_v17  ;;  %v2531_v17 = vrot.slane %v2530_v62, 4  ;;  %2887 = vmatpush.msrb.mxu2 %v6985_v6  ;;  %v10875_v6 = vld [vmem:[#allocation66_spill] sm:$0xff] }
 0x466   :  { %v7227_v20 = vpop.eup %7226  ;;  %v2354_v37 = vadd.f32 %v9006_v35, %v2353_v31  ;;  %vm9100_vm3 = vcmp.eq.f32.partialorder %v2374_v9, 8.507059e+37 }
 0x467   :  { %v2366_v38 = vmul.f32 %v7227_v20, %v9004_v34  ;;  %v9059_v4 = vpop.eup %7228  ;;  %v2313_v31 = vsel %vm9052_vm10, %v9001_v23, %v2309_v15  ;;  %v2419_v23 = vand.u32 2147483647, %v9026_v2  ;;  %v2532_v15 = vadd.f32 %v2531_v17, %v2530_v62 }
 0x468   :  { %v2358_v16 = vsel %vm9063_vm11, %v9006_v35, %v2354_v37  ;;  %v2411_v53 = vmul.f32 %v9059_v4, %v9026_v2  ;;  %v9078_v46 = vpop.xlane.xlu0 %2270  ;;  %vm2371_vm14 = vweird.f32 %v7227_v20  ;;  %v2318_v37 = vsel %vm9047_vm9, %v2317_v24, %v2313_v31 }
 0x469   :  { %v2367_v7 = vsub.f32 1.0, %v2366_v38  ;;  %7230 = vrcp.f32 %v9078_v46  ;;  %7048 = vrot.lane.b32.xlu1 %v10875_v6, %s7559_s27  ;;  %v2421_v38 = vand.u32 2147483648, %v9026_v2  ;;  %v2533_v48 = vrot.slane %v2532_v15, 2  ;;  %vm9096_vm2 = vmor %vm2370_vm12, %vm2371_vm14 }
 0x46a   :  { %v2412_v35 = vsub.f32 1.0, %v2411_v53  ;;  %v2319_v19 = vmul.f32 %v8894_v50, %v2318_v37  ;;  %v2363_v41 = vsel %vm9042_vm8, %v2362_v61, %v2358_v16  ;;  %vm2416_vm15 = vweird.f32 %v9059_v4 }
 0x46b   :  { %v2368_v30 = vmul.f32 %v7227_v20, %v2367_v7  ;;  %v2364_v7 = vmul.f32 %v8896_v8, %v2363_v41  ;;  %v2377_v50 = vor.u32 1.1754944e-38, %v2376_v32  ;;  %v2534_v33 = vadd.f32 %v2533_v48, %v2532_v15  ;;  %vm9117_vm4 = vmor %vm2415_vm13, %vm2416_vm15 }
 0x46c   :  { %v2413_v17 = vmul.f32 %v9059_v4, %v2412_v35  ;;  %v2537_v61 = vsel %vm305_vm1, %v2319_v19, 0.0  ;;  %6795 = vmatmul.msk.f32.vlgmr.msrb.gmra.mxu3 %vm305_vm1, %v2319_v19  ;;  %v10880_v31 = vunpack.i.l.bf16 %v10863_v13  ;;  %vm9121_vm5 = vcmp.eq.f32.partialorder %v2419_v23, 8.507059e+37 }
 0x46d   :  { %v2369_v62 = vadd.f32 %v7227_v20, %v2368_v30  ;;  %v2538_v41 = vrot.slane %v2537_v61, 4  ;;  %v2558_v34 = vsel %vm305_vm1, %v2364_v7, 0.0  ;;  %6798 = vmatmul.msk.f32.vlgmr.msra.gmra.mxu2 %vm305_vm1, %v2364_v7  ;;  %v2535_v16 = vrot.slane %v2534_v33, 1 }
 0x46e   :  { %v2414_v8 = vadd.f32 %v9059_v4, %v2413_v17  ;;  %2913 = vmatpush.msrb.mxu3 %v10880_v31  ;;  %v2559_v32 = vrot.slane %v2558_v34, 4  ;;  %v10885_v15 = vunpack.i.h.bf16 %v10863_v13  ;;  %v2422_v35 = vor.u32 1.1754944e-38, %v2421_v38  ;;  %v10886_v13 = vld [vmem:[#allocation26_spill] sm:$0xff] }
 0x46f   :  { %v2373_v24 = vsel %vm9096_vm2, %v7227_v20, %v2369_v62  ;;  %v7231_v9 = vpop.eup %7230  ;;  %v2539_v48 = vadd.f32 %v2538_v41, %v2537_v61  ;;  %v2536_v62 = vadd.f32 %v2535_v16, %v2534_v33  ;;  %v2434_v17 = vand.u32 2147483647, %v9078_v46  ;;  %v3548_v61 = vpop.permute.xlu2 %3547 }
 0x470   :  { %2991 = vmatpush.msra.mxu2 %v10885_v15  ;;  %v2378_v30 = vsel %vm9100_vm3, %v2377_v50, %v2373_v24  ;;  %v2418_v2 = vsel %vm9117_vm4, %v9059_v4, %v2414_v8  ;;  %v2426_v37 = vmul.f32 %v7231_v9, %v9078_v46  ;;  %v3550_v23 = vpop.permute.xlu1 %3549  ;;  %v2560_v7 = vadd.f32 %v2559_v32, %v2558_v34 }
 0x471   :  { %6838 = vmatpush.xpose.msk.msra.mxu0 %vm305_vm1, %v3550_v23  ;;  %4740 = vrot.lane.b32.xlu1 %v10886_v13, %s7560_s28  ;;  %v2379_v53 = vmul.f32 %v8905_v1, %v2378_v30  ;;  %v2436_v4 = vand.u32 2147483648, %v9078_v46  ;;  %v2540_v38 = vrot.slane %v2539_v48, 2  ;;  %v2423_v50 = vsel %vm9121_vm5, %v2422_v35, %v2418_v2 }
 0x472   :  { %v2427_v25 = vsub.f32 1.0, %v2426_v37  ;;  %v9142_v33 = vadd.f32 %v2536_v62, %v8994_v3  ;;  %v2561_v24 = vrot.slane %v2560_v7, 2  ;;  %v2424_v41 = vmul.f32 %v8909_v21, %v2423_v50 }
 0x473   :  { %v2565_v8 = vsel %vm305_vm1, %v2379_v53, 0.0  ;;  %vm2431_vm6 = vweird.f32 %v7231_v9  ;;  %v2541_v31 = vadd.f32 %v2540_v38, %v2539_v48  ;;  %v10887_v19 = vrot.slane %v8991_v59, 2  ;;  %v10890_v48 = vld [vmem:[#allocation83_spill] sm:$0xff] }
 0x474   :  { %v2428_v34 = vmul.f32 %v7231_v9, %v2427_v25  ;;  %v2566_v1 = vrot.slane %v2565_v8, 4  ;;  %6839 = vmatmul.msk.f32.vlgmr.msra.gmra.mxu0 %vm305_vm1, %v3548_v61  ;;  %vm2430_vm7 = vweird.f32 %v9078_v46  ;;  %v2562_v3 = vadd.f32 %v2561_v24, %v2560_v7  ;;  %6799 = vmatmul.msk.f32.vlgmr.msra.gmra.mxu3 %vm305_vm1, %v2379_v53  ;;  %v10891_v53 = vld [vmem:[#allocation27_spill] sm:$0xff] }
 0x475   :  { %v1182_v20 = vadd.f32 %v10887_v19, %v8991_v59  ;;  %v2586_v16 = vsel %vm305_vm1, %v2424_v41, 0.0  ;;  %v2542_v15 = vrot.slane %v2541_v31, 1  ;;  %6802 = vmatmul.msk.f32.vlgmr.msrb.gmra.mxu2 %vm305_vm1, %v2424_v41  ;;  %v10888_v2 = vunpack.i.l.bf16 %v8272_v49  ;;  %vm2432_vm8 = vmor %vm2430_vm7, %vm2431_vm6 }
 0x476   :  { %v2429_v32 = vadd.f32 %v7231_v9, %v2428_v34  ;;  %v2567_v21 = vadd.f32 %v2566_v1, %v2565_v8  ;;  %v2587_v30 = vrot.slane %v2586_v16, 4  ;;  %v10889_v35 = vrot.slane %v9011_v12, 4  ;;  %6810 = vmatpush.xpose.msk.msrb.mxu2 %vm305_vm1, %v10890_v48 }
 0x477   :  { %3017 = vmatpush.msra.mxu3 %v10888_v2  ;;  %vm2435_vm9 = vcmp.eq.f32.partialorder %v2434_v17, 8.507059e+37  ;;  %v2437_v46 = vor.u32 1.1754944e-38, %v2436_v4  ;;  %v2563_v37 = vrot.slane %v2562_v3, 1  ;;  %v2543_v62 = vadd.f32 %v2542_v15, %v2541_v31 }
 0x478   :  { %v1187_v59 = vadd.f32 %v10889_v35, %v9011_v12  ;;  %v2433_v23 = vsel %vm2432_vm8, %v7231_v9, %v2429_v32  ;;  %v2568_v7 = vrot.slane %v2567_v21, 2  ;;  %v2588_v13 = vadd.f32 %v2587_v30, %v2586_v16 }
 0x479   :  { %4686 = vrot.lane.b32.xlu1 %v10891_v53, %s7560_s28  ;;  %v2438_v49 = vsel %vm2435_vm9, %v2437_v46, %v2433_v23  ;;  %v10892_v25 = vrot.slane %v8986_v55, 1  ;;  %v1162_v38 = vrot.slane %v8999_v63, 1  ;;  %v2564_v17 = vadd.f32 %v2563_v37, %v2562_v3  ;;  %v10894_v3 = vld [vmem:[#allocation76_spill] sm:$0xff] }
 0x47a   :  { %v9169_v4 = vadd.f32 %v2543_v62, %v8996_v14  ;;  %v2569_v50 = vadd.f32 %v2568_v7, %v2567_v21  ;;  %v2589_v61 = vrot.slane %v2588_v13, 2  ;;  %v2439_v9 = vmul.f32 %v8913_v27, %v2438_v49  ;;  %v10895_v46 = vld [vmem:[#allocation32_spill] sm:$0xff] }
 0x47b   :  { %v1156_v12 = vadd.f32 %v10892_v25, %v8986_v55  ;;  %v1188_v24 = vrot.slane %v1187_v59, 2  ;;  %v3576_v8 = vpop.permute.xlu0 %3575  ;;  %v1183_v34 = vrot.slane %v1182_v20, 1  ;;  %v1163_v27 = vadd.f32 %v1162_v38, %v8999_v63 }
 0x47c   :  { %v2590_v31 = vadd.f32 %v2589_v61, %v2588_v13  ;;  %v2593_v1 = vsel %vm305_vm1, %v2439_v9, 0.0  ;;  %6841 = vmatmul.msk.f32.vlgmr.msrb.gmra.mxu1 %vm305_vm1, %v3576_v8  ;;  %v2570_v55 = vrot.slane %v2569_v50, 1  ;;  %6803 = vmatmul.msk.f32.vlgmr.msrb.gmra.mxu3 %vm305_vm1, %v2439_v9 }
 0x47d   :  { %v9172_v41 = vadd.f32 %v2564_v17, %v1156_v12  ;;  %v2594_v19 = vrot.slane %v2593_v1, 4  ;;  %6812 = vmatpush.xpose.msk.msrb.mxu3 %vm305_vm1, %v10894_v3  ;;  %v1189_v32 = vadd.f32 %v1188_v24, %v1187_v59  ;;  %v1184_v21 = vadd.f32 %v1183_v34, %v1182_v20  ;;  %v10898_v59 = vld [vmem:[#allocation70_spill] sm:$0xff] }
 0x47e   :  { %v2591_v14 = vrot.slane %v2590_v31, 1  ;;  %v2571_v16 = vadd.f32 %v2570_v55, %v2569_v50  ;;  %v1206_v20 = vsel %vm305_vm1, %v10898_v59, 0.0 }
 0x47f   :  { %10893 = vst [vmem:[#allocation61_spill] sm:$0xff] %v9172_v41  ;;  %v2595_v15 = vadd.f32 %v2594_v19, %v2593_v1  ;;  %v1190_v48 = vrot.slane %v1189_v32, 1  ;;  %v1207_v38 = vrot.slane %v1206_v20, 4 }
 0x480   :  { %v2592_v30 = vadd.f32 %v2591_v14, %v2590_v31  ;;  %v9180_v2 = vadd.f32 %v2571_v16, %v1163_v27  ;;  %v10899_v16 = vld [vmem:[#allocation74_spill] sm:$0xff] }
 0x481   :  { %v2596_v35 = vrot.slane %v2595_v15, 2  ;;  %4824 = vrot.lane.b32.xlu1 %v10895_v46, %s7560_s28  ;;  %v1191_v7 = vadd.f32 %v1190_v48, %v1189_v32  ;;  %v1208_v31 = vadd.f32 %v1207_v38, %v1206_v20  ;;  %v1213_v32 = vsel %vm305_vm1, %v10899_v16, 0.0  ;;  %v10903_v16 = vld [vmem:[#allocation72_spill] sm:$0xff] }
 0x482   :  { %v9184_v37 = vadd.f32 %v2592_v30, %v1184_v21  ;;  %v1214_v48 = vrot.slane %v1213_v32, 4 }
 0x483   :  { %v2597_v23 = vadd.f32 %v2596_v35, %v2595_v15  ;;  %v1209_v30 = vrot.slane %v1208_v31, 2 }
 0x484   :  { %10896 = vst [vmem:[#allocation63_spill] sm:$0xff] %v9184_v37  ;;  %v1215_v38 = vadd.f32 %v1214_v48, %v1213_v32  ;;  %v10905_v48 = vld [vmem:[#allocation53_spill] sm:$0xff] }
 0x485   :  { %v2598_v62 = vrot.slane %v2597_v23, 1  ;;  %v1210_v20 = vadd.f32 %v1209_v30, %v1208_v31 }
 0x487   :  { %v2599_v13 = vadd.f32 %v2598_v62, %v2597_v23 }
 0x489   :  { %v9186_v53 = vadd.f32 %v2599_v13, %v1191_v7 }
 0x48b   :  { %10897 = vst [vmem:[#allocation60_spill] sm:$0xff] %v9186_v53 }
 0x49b   :  { %v2280_v63 = vpop.xlane.xlu1 %2279 }
 0x49c   :  { %7232 = vrcp.f32 %v2280_v63  ;;  %v2481_v50 = vand.u32 2147483648, %v2280_v63  ;;  %v2479_v8 = vand.u32 2147483647, %v2280_v63  ;;  %vm2475_vm11 = vweird.f32 %v2280_v63 }
 0x49e   :  { %v2482_v14 = vor.u32 1.1754944e-38, %v2481_v50  ;;  %vm2480_vm13 = vcmp.eq.f32.partialorder %v2479_v8, 8.507059e+37 }
 0x4a0   :  { %v3654_v61 = vpop.xlane.xlu2 %3653 }
 0x4a1   :  { %v3678_v55 = vsub.f32 %v8941_v42, %v3654_v61 }
 0x4a2   :  { %v7233_v49 = vpop.eup %7232 }
 0x4a3   :  { %v2471_v25 = vmul.f32 %v7233_v49, %v2280_v63  ;;  %v2283_v12 = vpop.xlane.xlu1 %2282  ;;  %vm2476_vm10 = vweird.f32 %v7233_v49  ;;  %v3705_v35 = vmul.f32 1.442695, %v3678_v55  ;;  %v10900_v63 = vld [vmem:[#allocation78_spill] sm:$0xff]  ;;  %v10901_v55 = vld [vmem:[#allocation81_spill] sm:$0xff] }
 0x4a4   :  { %7234 = vrcp.f32 %v2283_v12  ;;  %vm2477_vm12 = vmor %vm2475_vm11, %vm2476_vm10  ;;  %v2496_v23 = vand.u32 2147483648, %v2283_v12  ;;  %v2494_v7 = vand.u32 2147483647, %v2283_v12  ;;  %vm2490_vm15 = vweird.f32 %v2283_v12 }
 0x4a5   :  { %v2472_v17 = vsub.f32 1.0, %v2471_v25 }
 0x4a6   :  { %v3630_v9 = vpop.xlane.xlu0 %3629  ;;  %vm2495_vm3 = vcmp.eq.f32.partialorder %v2494_v7, 8.507059e+37 }
 0x4a7   :  { %v2473_v24 = vmul.f32 %v7233_v49, %v2472_v17  ;;  %v3670_v34 = vsub.f32 %v8949_v18, %v3630_v9  ;;  %v2497_v17 = vor.u32 1.1754944e-38, %v2496_v23 }
 0x4a9   :  { %v2474_v1 = vadd.f32 %v7233_v49, %v2473_v24  ;;  %v3689_v19 = vmul.f32 1.442695, %v3670_v34  ;;  %v1211_v24 = vrot.slane %v1210_v20, 1 }
 0x4aa   :  { %v7235_v3 = vpop.eup %7234 }
 0x4ab   :  { %v2478_v27 = vsel %vm2477_vm12, %v7233_v49, %v2474_v1  ;;  %7236 = vpow2.f32 %v3689_v19  ;;  %v2486_v15 = vmul.f32 %v7235_v3, %v2283_v12  ;;  %vm2491_vm14 = vweird.f32 %v7235_v3  ;;  %v9206_v12 = vpop.xlane.xlu1 %3641 }
 0x4ac   :  { %v2483_v21 = vsel %vm2480_vm13, %v2482_v14, %v2478_v27  ;;  %7238 = vpow2.f32 %v3705_v35  ;;  %vm2492_vm2 = vmor %vm2490_vm15, %vm2491_vm14  ;;  %v1216_v1 = vrot.slane %v1215_v38, 2  ;;  %v1212_v32 = vadd.f32 %v1211_v24, %v1210_v20 }
 0x4ad   :  { %v2484_v18 = vmul.f32 %v8939_v26, %v2483_v21  ;;  %v2487_v46 = vsub.f32 1.0, %v2486_v15  ;;  %v3674_v56 = vsub.f32 %v8955_v11, %v9206_v12 }
 0x4ae   :  { %v1217_v21 = vadd.f32 %v1216_v1, %v1215_v38  ;;  %v10911_v38 = vld [vmem:[#allocation56_spill] sm:$0xff] }
 0x4af   :  { %v2614_v42 = vsel %vm305_vm1, %v2484_v18, 0.0  ;;  %6806 = vmatmul.msk.f32.vlgmr.msra.gmra.mxu2 %vm305_vm1, %v2484_v18  ;;  %v2488_v62 = vmul.f32 %v7235_v3, %v2487_v46  ;;  %v10915_v1 = vld [vmem:[#allocation80_spill] sm:$0xff] }
 0x4b0   :  { %v2615_v13 = vrot.slane %v2614_v42, 4  ;;  %6818 = vmatpush.xpose.msk.msra.mxu2 %vm305_vm1, %v10900_v63  ;;  %v1218_v23 = vrot.slane %v1217_v21, 1 }
 0x4b1   :  { %v9199_v59 = vpop.eup %7236  ;;  %v2489_v49 = vadd.f32 %v7235_v3, %v2488_v62  ;;  %v10907_v62 = vld [vmem:[#allocation85_spill] sm:$0xff] }
 0x4b2   :  { %v2616_v26 = vadd.f32 %v2615_v13, %v2614_v42  ;;  %v3724_v25 = vsel %vm305_vm1, %v9199_v59, 0.0  ;;  %v9204_v31 = vpop.eup %7238  ;;  %v10906_v42 = vld [vmem:[#allocation75_spill] sm:$0xff]  ;;  %v1219_v20 = vadd.f32 %v1218_v23, %v1217_v21 }
 0x4b3   :  { %3725 = vadd.xlane.f32.xlu1 %v3724_v25  ;;  %v2493_v50 = vsel %vm2492_vm2, %v7235_v3, %v2489_v49  ;;  %v10902_v3 = vld [vmem:[#allocation82_spill] sm:$0xff]  ;;  %v9226_v7 = vpop.xlane.xlu1 %3638  ;;  %v10908_v13 = vld [vmem:[#allocation79_spill] sm:$0xff]  ;;  %v10910_v25 = vld [vmem:[#allocation77_spill] sm:$0xff] }
 0x4b4   :  { %v2617_v61 = vrot.slane %v2616_v26, 2  ;;  %v2498_v9 = vsel %vm2495_vm3, %v2497_v17, %v2493_v50  ;;  %v10912_v17 = vld [vmem:[#allocation54_spill] sm:$0xff]  ;;  %v10917_v21 = vld [vmem:[#allocation39_spill] sm:$0xff] }
 0x4b5   :  { %v2499_v34 = vmul.f32 %v8947_v28, %v2498_v9  ;;  %v3748_v28 = vsel %vm305_vm1, %v9204_v31, 0.0  ;;  %v10914_v9 = vld [vmem:[#allocation73_spill] sm:$0xff]  ;;  %v10922_v23 = vld [vmem:[#allocation31_spill] sm:$0xff] }
 0x4b6   :  { %v2618_v8 = vadd.f32 %v2617_v61, %v2616_v26  ;;  %v10913_v61 = vld [vmem:[#allocation86_spill] sm:$0xff] }
 0x4b7   :  { %6811 = vmatmul.msk.f32.vlgmr.msrb.gmra.mxu2 %vm305_vm1, %v10901_v55  ;;  %v2621_v14 = vsel %vm305_vm1, %v2499_v34, 0.0  ;;  %6807 = vmatmul.msk.f32.vlgmr.msra.gmra.mxu3 %vm305_vm1, %v2499_v34 }
 0x4b8   :  { %v2619_v19 = vrot.slane %v2618_v8, 1  ;;  %6826 = vmatpush.xpose.msk.msrb.mxu2 %vm305_vm1, %v10902_v3  ;;  %v2622_v27 = vrot.slane %v2621_v14, 4  ;;  %6820 = vmatpush.xpose.msk.msra.mxu3 %vm305_vm1, %v10903_v16 }
 0x4ba   :  { %v2620_v15 = vadd.f32 %v2619_v19, %v2618_v8  ;;  %v2623_v30 = vadd.f32 %v2622_v27, %v2621_v14 }
 0x4bb   :  { %3749 = vadd.xlane.f32.xlu1 %v3748_v28  ;;  %v9238_v50 = vpop.xlane.xlu1 %3650 }
 0x4bc   :  { %v9218_v35 = vadd.f32 %v2620_v15, %v1212_v32  ;;  %v2624_v18 = vrot.slane %v2623_v30, 2  ;;  %v10916_v15 = vld [vmem:[#allocation33_spill] sm:$0xff] }
 0x4be   :  { %10904 = vst [vmem:[#allocation62_spill] sm:$0xff] %v9218_v35  ;;  %v2625_v46 = vadd.f32 %v2624_v18, %v2623_v30  ;;  %v9256_v30 = vpack.i.bf16 %v10917_v21, %v10916_v15  ;;  %v10919_v18 = vld [vmem:[#allocation35_spill] sm:$0xff] }
 0x4bf   :  { %6819 = vmatmul.msk.f32.vlgmr.msra.gmra.mxu2 %vm305_vm1, %v10905_v48  ;;  %6813 = vmatmul.msk.f32.vlgmr.msrb.gmra.mxu3 %vm305_vm1, %v10906_v42  ;;  %v10923_v42 = vld [vmem:[#allocation29_spill] sm:$0xff] }
 0x4c0   :  { %6834 = vmatpush.xpose.msk.msra.mxu2 %vm305_vm1, %v10907_v62  ;;  %6828 = vmatpush.xpose.msk.msrb.mxu3 %vm305_vm1, %v10908_v13  ;;  %v2626_v63 = vrot.slane %v2625_v46, 1  ;;  %10918 = vst [vmem:[#allocation20_spill] sm:$0xff] %v9256_v30  ;;  %v7037_v62 = vpack.i.bf16 %v10923_v42, %v10922_v23  ;;  %v10924_v13 = vld [vmem:[#allocation17_spill] sm:$0xff] }
 0x4c2   :  { %v2627_v49 = vadd.f32 %v2626_v63, %v2625_v46  ;;  %v10920_v46 = vld [vmem:[#allocation45_spill] sm:$0xff]  ;;  %v10925_v63 = vld [vmem:[#allocation48_spill] sm:$0xff] }
 0x4c3   :  { %v9262_v48 = vpack.i.bf16 %v10920_v46, %v10919_v18 }
 0x4c4   :  { %v9230_v26 = vadd.f32 %v2627_v49, %v1219_v20  ;;  %v10926_v20 = vld [vmem:[#allocation24_spill] sm:$0xff]  ;;  %v10927_v49 = vld [vmem:[#allocation22_spill] sm:$0xff] }
 0x4c5   :  { %10921 = vst [vmem:[#allocation65_spill] sm:$0xff] %v9262_v48 }
 0x4c6   :  { %10909 = vst [vmem:[#allocation18_spill] sm:$0xff] %v9230_v26 }
 0x4c7   :  { %6827 = vmatmul.msk.f32.vlgmr.msrb.gmra.mxu2 %vm305_vm1, %v10910_v25  ;;  %6821 = vmatmul.msk.f32.vlgmr.msra.gmra.mxu3 %vm305_vm1, %v10911_v38  ;;  %v10928_v25 = vld [vmem:[#allocation19_spill] sm:$0xff]  ;;  %v10929_v38 = vld [vmem:[#allocation49_spill] sm:$0xff] }
 0x4c8   :  { %6836 = vmatpush.xpose.msk.msra.mxu3 %vm305_vm1, %v10912_v17  ;;  %v10930_v17 = vld [vmem:[#allocation43_spill] sm:$0xff] }
 0x4cf   :  { %6835 = vmatmul.msk.f32.vlgmr.msra.gmra.mxu2 %vm305_vm1, %v10913_v61  ;;  %6829 = vmatmul.msk.f32.vlgmr.msrb.gmra.mxu3 %vm305_vm1, %v10914_v9  ;;  %v9281_v61 = vpack.i.bf16 %v10930_v17, %v10929_v38  ;;  %v10932_v9 = vld [vmem:[#allocation23_spill] sm:$0xff] }
 0x4d1   :  { %10931 = vst [vmem:[#allocation67_spill] sm:$0xff] %v9281_v61 }
 0x4d3   :  { %v7034_v24 = vpop.permute.xlu1 %7033 }
 0x4d4   :  { %v7036_v8 = vunpack.i.h.bf16 %v7034_v24  ;;  %v7035_v34 = vunpack.i.l.bf16 %v7034_v24  ;;  %v10933_v24 = vld [vmem:[#allocation87_spill] sm:$0xff] }
 0x4d6   :  { %4152 = vmatpush.msrb.mxu2 %v7035_v34  ;;  %4178 = vmatpush.msrb.mxu3 %v7036_v8  ;;  %v10935_v34 = vld [vmem:[#allocation34_spill] sm:$0xff] }
 0x4d7   :  { %6837 = vmatmul.msk.f32.vlgmr.msra.gmra.mxu3 %vm305_vm1, %v10915_v1 }
 0x4db   :  { %v9246_v55 = vpop.permute.xlu1 %7048 }
 0x4dc   :  { %v7050_v19 = vunpack.i.l.bf16 %v9246_v55 }
 0x4de   :  { %4204 = vmatpush.msrb.mxu0 %v7050_v19 }
 0x4e3   :  { %v9291_v8 = vpop.permute.xlu1 %4740 }
 0x4e4   :  { %10934 = vst [vmem:[#allocation25_spill] sm:$0xff] %v9291_v8 }
 0x4e7   :  { %v9301_v19 = vpop.f32.mrf.mxu2 }
 0x4e8   :  { %10936 = vst [vmem:[#allocation26_spill] sm:$0xff] %v9301_v19 }
 0x4eb   :  { %v9299_v1 = vpop.permute.xlu1 %4686 }
 0x4f1   :  { %v3572_v14 = vpop.f32.mrf.mxu0 }
 0x4f2   :  { %v3617_v3 = vmul.f32 0.35355338, %v3572_v14  ;;  %v10937_v14 = vld [vmem:[#allocation21_spill] sm:$0xff] }
 0x4f4   :  { %v3661_v27 = vsel %vm305_vm1, %v3617_v3, -inf }
 0x4f5   :  { %3662 = vmax.xlane.f32.xlu0 %v3661_v27  ;;  %v9305_v27 = vpop.f32.mrf.mxu3 }
 0x4f6   :  { %10938 = vst [vmem:[#allocation83_spill] sm:$0xff] %v9305_v27 }
 0x4f9   :  { %v3600_v16 = vpop.f32.mrf.mxu1 }
 0x4fa   :  { %v9250_v28 = vmul.f32 0.35355338, %v3600_v16  ;;  %v9309_v16 = vpop.permute.xlu1 %4824 }
 0x4fc   :  { %v3664_v32 = vsel %vm305_vm1, %v9250_v28, -inf }
 0x4fd   :  { %3665 = vmax.xlane.f32.xlu2 %v3664_v32  ;;  %v9311_v32 = vpop.f32.mrf.mxu2 }
 0x4fe   :  { %10939 = vst [vmem:[#allocation27_spill] sm:$0xff] %v9311_v32 }
 0x509   :  { %7043 = vrot.lane.b32.xlu0 %v9256_v30, %s7559_s27 }
 0x511   :  { %7058 = vrot.lane.b32.xlu0 %v9262_v48, %s7559_s27 }
 0x515   :  { %7038 = vrot.lane.b32.xlu2 %v7037_v62, %s7559_s27  ;;  %v9315_v62 = vpop.f32.mrf.mxu3 }
 0x516   :  { %10941 = vst [vmem:[#allocation76_spill] sm:$0xff] %v9315_v62  ;;  %v10946_v62 = vld [vmem:[#allocation41_spill] sm:$0xff] }
 0x519   :  { %4628 = vrot.lane.b32.xlu0 %v10924_v13, %s7560_s28 }
 0x51d   :  { %7053 = vrot.lane.b32.xlu2 %v10925_v63, %s7559_s27 }
 0x521   :  { %4658 = vrot.lane.b32.xlu0 %v10926_v20, %s7560_s28 }
 0x525   :  { %4630 = vrot.lane.b32.xlu2 %v10927_v49, %s7560_s28 }
 0x526   :  { %v3726_v13 = vpop.xlane.xlu1 %3725 }
 0x527   :  { %7240 = vrcp.f32 %v3726_v13  ;;  %vm3813_vm5 = vweird.f32 %v3726_v13 }
 0x529   :  { %4656 = vrot.lane.b32.xlu0 %v10928_v25, %s7560_s28  ;;  %v9317_v25 = vpop.f32.mrf.mxu2 }
 0x52a   :  { %10942 = vst [vmem:[#allocation32_spill] sm:$0xff] %v9317_v25 }
 0x52d   :  { %7063 = vrot.lane.b32.xlu2 %v9281_v61, %s7559_s27 }
 0x52e   :  { %v9436_v6 = vpop.xlane.xlu1 %3749 }
 0x52f   :  { %vm3933_vm12 = vweird.f32 %v9436_v6 }
 0x531   :  { %4712 = vrot.lane.b32.xlu0 %v10932_v9, %s7560_s28  ;;  %v10943_v9 = vld [vmem:[#allocation37_spill] sm:$0xff] }
 0x532   :  { %v9325_v10 = vpop.f32.mrf.mxu2 }
 0x533   :  { %10945 = vst [vmem:[#allocation74_spill] sm:$0xff] %v9325_v10 }
 0x535   :  { %7068 = vrot.lane.b32.xlu2 %v10933_v24, %s7559_s27  ;;  %v3627_v24 = vpop.xlane.xlu0 %3626 }
 0x539   :  { %4854 = vrot.lane.b32.xlu0 %v10917_v21, %s7560_s28  ;;  %v10940_v21 = vld [vmem:[#allocation28_spill] sm:$0xff] }
 0x53d   :  { %4742 = vrot.lane.b32.xlu2 %v10922_v23, %s7560_s28 }
 0x541   :  { %4852 = vrot.lane.b32.xlu0 %v10935_v34, %s7560_s28  ;;  %v7241_v34 = vpop.eup %7240 }
 0x542   :  { %v3809_v32 = vmul.f32 %v7241_v34, %v3726_v13  ;;  %vm3814_vm4 = vweird.f32 %v7241_v34 }
 0x543   :  { %vm3815_vm6 = vmor %vm3813_vm5, %vm3814_vm4 }
 0x544   :  { %v3810_v44 = vsub.f32 1.0, %v3809_v32  ;;  %v3819_v32 = vand.u32 2147483648, %v3726_v13 }
 0x545   :  { %4714 = vrot.lane.b32.xlu2 %v10923_v42, %s7560_s28 }
 0x549   :  { %4684 = vrot.lane.b32.xlu0 %v10937_v14, %s7560_s28  ;;  %v9323_v14 = vpop.f32.mrf.mxu3 }
 0x54a   :  { %10944 = vst [vmem:[#allocation70_spill] sm:$0xff] %v9323_v14  ;;  %v3180_v14 = vpop.f32.mrf.mxu2 }
 0x54d   :  { %4770 = vrot.lane.b32.xlu2 %v10916_v15, %s7560_s28  ;;  %v3673_v15 = vsub.f32 %v8963_v39, %v9226_v7  ;;  %v3811_v39 = vmul.f32 %v7241_v34, %v3810_v44  ;;  %v3697_v7 = vmul.f32 1.442695, %v3674_v56 }
 0x555   :  { %4768 = vrot.lane.b32.xlu2 %v10940_v21, %s7560_s28  ;;  %v3695_v21 = vmul.f32 1.442695, %v3673_v15  ;;  %v3812_v15 = vadd.f32 %v7241_v34, %v3811_v39 }
 0x557   :  { %7242 = vpow2.f32 %v3695_v21  ;;  %v3816_v56 = vsel %vm3815_vm6, %v7241_v34, %v3812_v15  ;;  %v3669_v34 = vsub.f32 %v8957_v54, %v3627_v24  ;;  %v7051_v15 = vunpack.i.h.bf16 %v9246_v55 }
 0x559   :  { %v3687_v54 = vmul.f32 1.442695, %v3669_v34 }
 0x55d   :  { %4826 = vrot.lane.b32.xlu2 %v10943_v9, %s7560_s28  ;;  %v9331_v9 = vpop.f32.mrf.mxu3  ;;  %v9333_v43 = vpop.eup %7242 }
 0x55e   :  { %10947 = vst [vmem:[#allocation78_spill] sm:$0xff] %v9331_v9  ;;  %v3733_v12 = vsel %vm305_vm1, %v9333_v43, 0.0 }
 0x565   :  { %4882 = vrot.lane.b32.xlu2 %v10946_v62, %s7560_s28  ;;  %v3817_v62 = vand.u32 2147483647, %v3726_v13  ;;  %v3208_v44 = vpop.f32.mrf.mxu3 }
 0x567   :  { %vm3818_vm7 = vcmp.eq.f32.partialorder %v3817_v62, 8.507059e+37 }
 0x568   :  { %v3663_v57 = vpop.xlane.xlu0 %3662 }
 0x569   :  { %v3681_v25 = vsub.f32 %v3617_v3, %v3663_v57 }
 0x56b   :  { %v3711_v27 = vmul.f32 1.442695, %v3681_v25 }
 0x56d   :  { %7244 = vpow2.f32 %v3711_v27  ;;  %v3820_v27 = vor.u32 1.1754944e-38, %v3819_v32 }
 0x56e   :  { %7246 = vpow2.f32 %v3697_v7 }
 0x56f   :  { %v3821_v13 = vsel %vm3818_vm7, %v3820_v27, %v3816_v56 }
 0x570   :  { %v3666_v10 = vpop.xlane.xlu2 %3665  ;;  %v9347_v60 = vmul.f32 %v9199_v59, %v3821_v13 }
 0x571   :  { %v3682_v11 = vsub.f32 %v9250_v28, %v3666_v10  ;;  %v9344_v10 = vmul.f32 0.35355338, %v3208_v44  ;;  %v3292_v28 = vpop.f32.mrf.mxu2 }
 0x572   :  { %10948 = vst [vmem:[#allocation81_spill] sm:$0xff] %v9347_v60 }
 0x573   :  { %v9338_v57 = vpop.eup %7244  ;;  %3734 = vadd.xlane.f32.xlu0 %v3733_v12  ;;  %v3713_v25 = vmul.f32 1.442695, %v3682_v11  ;;  %v3622_v59 = vsel %vm305_vm1, %v9344_v10, -inf  ;;  %v3320_v12 = vpop.f32.mrf.mxu3 }
 0x574   :  { %v3757_v3 = vsel %vm305_vm1, %v9338_v57, 0.0  ;;  %v9342_v21 = vpop.eup %7246  ;;  %v9362_v24 = vmul.f32 0.35355338, %v3320_v12 }
 0x575   :  { %3758 = vadd.xlane.f32.xlu1 %v3757_v3  ;;  %7248 = vpow2.f32 %v3713_v25  ;;  %v3736_v32 = vsel %vm305_vm1, %v9342_v21, 0.0  ;;  %v3677_v3 = vsub.f32 %v8967_v5, %v9238_v50 }
 0x576   :  { %7250 = vpow2.f32 %v3687_v54  ;;  %v3634_v13 = vsel %vm305_vm1, %v9362_v24, -inf }
 0x578   :  { %v7039_v39 = vpop.permute.xlu2 %7038 }
 0x579   :  { %v7041_v7 = vunpack.i.h.bf16 %v7039_v39  ;;  %v7040_v9 = vunpack.i.l.bf16 %v7039_v39  ;;  %v9370_v39 = vmul.f32 0.35355338, %v3180_v14 }
 0x57b   :  { %4230 = vmatpush.msra.mxu1 %v7041_v7  ;;  %4256 = vmatpush.msra.mxu2 %v7040_v9  ;;  %v9353_v62 = vpop.permute.xlu0 %7043  ;;  %v9360_v55 = vpop.eup %7248  ;;  %v3703_v7 = vmul.f32 1.442695, %v3677_v3 }
 0x57c   :  { %3737 = vadd.xlane.f32.xlu0 %v3736_v32  ;;  %v7045_v11 = vunpack.i.l.bf16 %v9353_v62  ;;  %6845 = vmatmul.msk.f32.vlgmr.msra.gmra.mxu1 %vm305_vm1, %v9347_v60  ;;  %v3404_v9 = vpop.f32.mrf.mxu2  ;;  %v3760_v44 = vsel %vm305_vm1, %v9360_v55, 0.0  ;;  %v9372_v34 = vpop.eup %7250  ;;  %v3619_v32 = vsel %vm305_vm1, %v9370_v39, -inf }
 0x57d   :  { %4334 = vmatpush.msrb.mxu1 %v7051_v15  ;;  %3623 = vmax.xlane.f32.xlu1 %v3622_v59  ;;  %v3432_v15 = vpop.f32.mrf.mxu3  ;;  %7252 = vpow2.f32 %v3703_v7  ;;  %v3721_v50 = vsel %vm305_vm1, %v9372_v34, 0.0  ;;  %v9398_v7 = vmul.f32 0.35355338, %v3404_v9 }
 0x57e   :  { %4282 = vmatpush.msra.mxu3 %v7045_v11  ;;  %7254 = vrcp.f32 %v9436_v6 }
 0x583   :  { %v7059_v56 = vpop.permute.xlu0 %7058  ;;  %v9380_v59 = vpop.eup %7252 }
 0x584   :  { %3761 = vadd.xlane.f32.xlu0 %v3760_v44  ;;  %v7061_v27 = vunpack.i.h.bf16 %v7059_v56  ;;  %v7060_v25 = vunpack.i.l.bf16 %v7059_v56  ;;  %v3516_v5 = vpop.f32.mrf.mxu2  ;;  %v3745_v54 = vsel %vm305_vm1, %v9380_v59, 0.0  ;;  %v9388_v56 = vmul.f32 0.35355338, %v3292_v28  ;;  %v9441_v63 = vpop.eup %7254 }
 0x585   :  { %3635 = vmax.xlane.f32.xlu1 %v3634_v13  ;;  %v9378_v11 = vmul.f32 0.35355338, %v3516_v5  ;;  %v3544_v12 = vpop.f32.mrf.mxu3  ;;  %v9396_v13 = vpop.permute.xlu2 %7053  ;;  %v3643_v28 = vsel %vm305_vm1, %v9398_v7, -inf  ;;  %v9404_v5 = vmul.f32 0.35355338, %v3432_v15  ;;  %v10955_v15 = vld [vmem:[#allocation42_spill] sm:$0xff]  ;;  %v3929_v23 = vmul.f32 %v9441_v63, %v9436_v6 }
 0x586   :  { %4308 = vmatpush.msra.mxu0 %v7060_v25  ;;  %4438 = vmatpush.msra.mxu1 %v7061_v27  ;;  %v9386_v44 = vmul.f32 0.35355338, %v3544_v12  ;;  %v3631_v27 = vsel %vm305_vm1, %v9388_v56, -inf  ;;  %v10949_v25 = vld [vmem:[#allocation36_spill] sm:$0xff]  ;;  %vm3934_vm3 = vweird.f32 %v9441_v63 }
 0x587   :  { %v3655_v14 = vsel %vm305_vm1, %v9378_v11, -inf  ;;  %v3646_v12 = vsel %vm305_vm1, %v9404_v5, -inf }
 0x588   :  { %v3658_v3 = vsel %vm305_vm1, %v9386_v44, -inf }
 0x58c   :  { %3620 = vmax.xlane.f32.xlu0 %v3619_v32  ;;  %v9400_v32 = vpop.permute.xlu0 %4628 }
 0x58d   :  { %10950 = vst [vmem:[#allocation82_spill] sm:$0xff] %v9400_v32 }
 0x58e   :  { %3722 = vadd.xlane.f32.xlu2 %v3721_v50  ;;  %v9406_v50 = vpop.permute.xlu2 %4630 }
 0x58f   :  { %10951 = vst [vmem:[#allocation72_spill] sm:$0xff] %v9406_v50 }
 0x594   :  { %3656 = vmax.xlane.f32.xlu0 %v3655_v14  ;;  %v9408_v14 = vpop.permute.xlu0 %4658 }
 0x595   :  { %10952 = vst [vmem:[#allocation53_spill] sm:$0xff] %v9408_v14 }
 0x596   :  { %3746 = vadd.xlane.f32.xlu2 %v3745_v54  ;;  %v10953_v54 = vld [vmem:[#allocation46_spill] sm:$0xff]  ;;  %v9414_v9 = vpop.permute.xlu2 %7063 }
 0x59c   :  { %3659 = vmax.xlane.f32.xlu0 %v3658_v3  ;;  %v9416_v3 = vpop.permute.xlu0 %4656 }
 0x59d   :  { %10954 = vst [vmem:[#allocation75_spill] sm:$0xff] %v9416_v3 }
 0x59e   :  { %3632 = vmax.xlane.f32.xlu2 %v3631_v27  ;;  %4880 = vrot.lane.b32.xlu1 %v10949_v25, %s7560_s28  ;;  %v9418_v27 = vpop.permute.xlu2 %7068 }
 0x5a4   :  { %v9420_v25 = vpop.permute.xlu0 %4712 }
 0x5a6   :  { %3644 = vmax.xlane.f32.xlu2 %v3643_v28  ;;  %v9424_v28 = vpop.permute.xlu2 %4742 }
 0x5a7   :  { %10956 = vst [vmem:[#allocation85_spill] sm:$0xff] %v9424_v28 }
 0x5ac   :  { %v9426_v36 = vpop.permute.xlu0 %4854 }
 0x5ad   :  { %10957 = vst [vmem:[#allocation79_spill] sm:$0xff] %v9426_v36  ;;  %v3930_v36 = vsub.f32 1.0, %v3929_v23 }
 0x5ae   :  { %3647 = vmax.xlane.f32.xlu2 %v3646_v12  ;;  %v9428_v45 = vpop.permute.xlu2 %4714 }
 0x5b0   :  { %4966 = vrot.lane.b32.xlu0 %v10953_v54, %s7560_s28 }
 0x5b4   :  { %v9430_v12 = vpop.permute.xlu0 %4852 }
 0x5b5   :  { %10958 = vst [vmem:[#allocation77_spill] sm:$0xff] %v9430_v12 }
 0x5b6   :  { %v9432_v54 = vpop.permute.xlu2 %4770 }
 0x5b7   :  { %10959 = vst [vmem:[#allocation56_spill] sm:$0xff] %v9432_v54 }
 0x5bc   :  { %v9434_v61 = vpop.permute.xlu0 %4684 }
 0x5be   :  { %v9438_v19 = vpop.permute.xlu2 %4768 }
 0x5bf   :  { %10960 = vst [vmem:[#allocation54_spill] sm:$0xff] %v9438_v19 }
 0x5c6   :  { %4964 = vrot.lane.b32.xlu2 %v10955_v15, %s7560_s28  ;;  %v9445_v20 = vpop.permute.xlu2 %4826 }
 0x5e6   :  { %v3735_v58 = vpop.xlane.xlu0 %3734 }
 0x5e7   :  { %7256 = vrcp.f32 %v3735_v58  ;;  %v3864_v26 = vand.u32 2147483648, %v3735_v58  ;;  %v3862_v35 = vand.u32 2147483647, %v3735_v58  ;;  %vm3858_vm9 = vweird.f32 %v3735_v58 }
 0x5e8   :  { %v3759_v15 = vpop.xlane.xlu1 %3758 }
 0x5e9   :  { %7258 = vrcp.f32 %v3759_v15  ;;  %v3984_v54 = vand.u32 2147483648, %v3759_v15  ;;  %v3982_v14 = vand.u32 2147483647, %v3759_v15  ;;  %vm3863_vm13 = vcmp.eq.f32.partialorder %v3862_v35, 8.507059e+37 }
 0x5ea   :  { %vm3978_vm14 = vweird.f32 %v3759_v15  ;;  %v3937_v35 = vand.u32 2147483647, %v9436_v6 }
 0x5eb   :  { %vm3983_vm2 = vcmp.eq.f32.partialorder %v3982_v14, 8.507059e+37 }
 0x5ec   :  { %vm9480_vm6 = vcmp.eq.f32.partialorder %v3937_v35, 8.507059e+37 }
 0x5ed   :  { %v7257_v30 = vpop.eup %7256 }
 0x5ee   :  { %v3854_v48 = vmul.f32 %v7257_v30, %v3735_v58  ;;  %vm3859_vm8 = vweird.f32 %v7257_v30  ;;  %v3985_v58 = vor.u32 1.1754944e-38, %v3984_v54 }
 0x5ef   :  { %v7259_v60 = vpop.eup %7258  ;;  %v9447_v42 = vpop.xlane.xlu0 %3737  ;;  %vm3860_vm11 = vmor %vm3858_vm9, %vm3859_vm8 }
 0x5f0   :  { %v3855_v49 = vsub.f32 1.0, %v3854_v48  ;;  %v3974_v12 = vmul.f32 %v7259_v60, %v3759_v15  ;;  %7260 = vrcp.f32 %v9447_v42  ;;  %v3624_v19 = vpop.xlane.xlu1 %3623  ;;  %vm3979_vm10 = vweird.f32 %v7259_v60  ;;  %vm9490_vm8 = vmor %vm3933_vm12, %vm3934_vm3 }
 0x5f1   :  { %v3668_v8 = vsub.f32 %v9344_v10, %v3624_v19  ;;  %v3865_v48 = vor.u32 1.1754944e-38, %v3864_v26  ;;  %v3931_v19 = vmul.f32 %v9441_v63, %v3930_v36  ;;  %vm3980_vm15 = vmor %vm3978_vm14, %vm3979_vm10  ;;  %v9462_v36 = vpop.permute.xlu2 %4882  ;;  %vm3873_vm5 = vweird.f32 %v9447_v42 }
 0x5f2   :  { %v3856_v3 = vmul.f32 %v7257_v30, %v3855_v49  ;;  %v3975_v53 = vsub.f32 1.0, %v3974_v12  ;;  %10961 = vst [vmem:[#allocation86_spill] sm:$0xff] %v9462_v36  ;;  %v3877_v12 = vand.u32 2147483647, %v9447_v42 }
 0x5f3   :  { %v3685_v32 = vmul.f32 1.442695, %v3668_v8  ;;  %v3932_v15 = vadd.f32 %v9441_v63, %v3931_v19  ;;  %v3939_v19 = vand.u32 2147483648, %v9436_v6  ;;  %v7070_v6 = vunpack.i.l.bf16 %v9418_v27 }
 0x5f4   :  { %v3857_v37 = vadd.f32 %v7257_v30, %v3856_v3  ;;  %v3976_v28 = vmul.f32 %v7259_v60, %v3975_v53  ;;  %v3879_v3 = vand.u32 2147483648, %v9447_v42  ;;  %vm3878_vm9 = vcmp.eq.f32.partialorder %v3877_v12, 8.507059e+37 }
 0x5f5   :  { %7262 = vpow2.f32 %v3685_v32 }
 0x5f6   :  { %v7261_v41 = vpop.eup %7260  ;;  %v3861_v50 = vsel %vm3860_vm11, %v7257_v30, %v3857_v37  ;;  %v3977_v49 = vadd.f32 %v7259_v60, %v3976_v28 }
 0x5f7   :  { %v3866_v23 = vsel %vm3863_vm13, %v3865_v48, %v3861_v50  ;;  %v3869_v8 = vmul.f32 %v7261_v41, %v9447_v42  ;;  %v9454_v53 = vpop.xlane.xlu0 %3761  ;;  %vm3874_vm4 = vweird.f32 %v7261_v41 }
 0x5f8   :  { %v9457_v10 = vmul.f32 %v9333_v43, %v3866_v23  ;;  %v3981_v26 = vsel %vm3980_vm15, %v7259_v60, %v3977_v49  ;;  %7264 = vrcp.f32 %v9454_v53  ;;  %v3636_v37 = vpop.xlane.xlu1 %3635  ;;  %vm3875_vm7 = vmor %vm3873_vm5, %vm3874_vm4  ;;  %v3997_v12 = vand.u32 2147483647, %v9454_v53 }
 0x5f9   :  { %v3986_v30 = vsel %vm3983_vm2, %v3985_v58, %v3981_v26  ;;  %v3870_v32 = vsub.f32 1.0, %v3869_v8  ;;  %v3672_v43 = vsub.f32 %v9362_v24, %v3636_v37  ;;  %v3880_v37 = vor.u32 1.1754944e-38, %v3879_v3 }
 0x5fa   :  { %v9465_v50 = vmul.f32 %v9338_v57, %v3986_v30  ;;  %v4045_v60 = vsel %vm305_vm1, %v9457_v10, 0.0  ;;  %vm3993_vm11 = vweird.f32 %v9454_v53  ;;  %vm3998_vm13 = vcmp.eq.f32.partialorder %v3997_v12, 8.507059e+37 }
 0x5fb   :  { %v9471_v14 = vpop.eup %7262  ;;  %v3871_v28 = vmul.f32 %v7261_v41, %v3870_v32  ;;  %v4046_v54 = vrot.slane %v4045_v60, 4  ;;  %v3693_v48 = vmul.f32 1.442695, %v3672_v43 }
 0x5fc   :  { %v4101_v57 = vsel %vm305_vm1, %v9465_v50, 0.0  ;;  %v3718_v49 = vsel %vm305_vm1, %v9471_v14, 0.0 }
 0x5fd   :  { %v4102_v24 = vrot.slane %v4101_v57, 4  ;;  %v3872_v23 = vadd.f32 %v7261_v41, %v3871_v28  ;;  %3719 = vadd.xlane.f32.xlu2 %v3718_v49  ;;  %v4047_v58 = vadd.f32 %v4046_v54, %v4045_v60  ;;  %7266 = vpow2.f32 %v3693_v48 }
 0x5fe   :  { %v7265_v8 = vpop.eup %7264  ;;  %v3936_v60 = vsel %vm9490_vm8, %v9441_v63, %v3932_v15 }
 0x5ff   :  { %v4103_v42 = vadd.f32 %v4102_v24, %v4101_v57  ;;  %v3876_v32 = vsel %vm3875_vm7, %v7261_v41, %v3872_v23  ;;  %v3989_v35 = vmul.f32 %v7265_v8, %v9454_v53  ;;  %v3621_v43 = vpop.xlane.xlu0 %3620  ;;  %v4048_v54 = vrot.slane %v4047_v58, 2 }
 0x600   :  { %v3881_v3 = vsel %vm3878_vm9, %v3880_v37, %v3876_v32  ;;  %v3667_v28 = vsub.f32 %v9370_v39, %v3621_v43  ;;  %v3999_v57 = vand.u32 2147483648, %v9454_v53  ;;  %vm3994_vm10 = vweird.f32 %v7265_v8 }
 0x601   :  { %v3882_v48 = vmul.f32 %v9342_v21, %v3881_v3  ;;  %v3990_v49 = vsub.f32 1.0, %v3989_v35  ;;  %v9501_v36 = vpop.xlane.xlu2 %3722  ;;  %v4104_v41 = vrot.slane %v4103_v42, 2  ;;  %v4049_v39 = vadd.f32 %v4048_v54, %v4047_v58  ;;  %vm3995_vm12 = vmor %vm3993_vm11, %vm3994_vm10 }
 0x602   :  { %v3683_v24 = vmul.f32 1.442695, %v3667_v28  ;;  %7268 = vrcp.f32 %v9501_v36  ;;  %v3940_v21 = vor.u32 1.1754944e-38, %v3939_v19  ;;  %v4000_v58 = vor.u32 1.1754944e-38, %v3999_v57 }
 0x603   :  { %v3991_v63 = vmul.f32 %v7265_v8, %v3990_v49  ;;  %6849 = vmatmul.msk.f32.vlgmr.msrb.gmra.mxu1 %vm305_vm1, %v3882_v48  ;;  %v4052_v15 = vsel %vm305_vm1, %v3882_v48, 0.0  ;;  %v9508_v23 = vpop.eup %7266  ;;  %v4105_v30 = vadd.f32 %v4104_v41, %v4103_v42  ;;  %v4050_v43 = vrot.slane %v4049_v39, 1 }
 0x604   :  { %7270 = vpow2.f32 %v3683_v24  ;;  %4542 = vmatpush.msrb.mxu1 %v7070_v6  ;;  %v4053_v37 = vrot.slane %v4052_v15, 4  ;;  %v3730_v35 = vsel %vm305_vm1, %v9508_v23, 0.0  ;;  %v3941_v3 = vsel %vm9480_vm6, %v3940_v21, %v3936_v60 }
 0x605   :  { %v3992_v32 = vadd.f32 %v7265_v8, %v3991_v63  ;;  %3731 = vadd.xlane.f32.xlu2 %v3730_v35  ;;  %v4106_v19 = vrot.slane %v4105_v30, 1  ;;  %v4051_v6 = vadd.f32 %v4050_v43, %v4049_v39  ;;  %v9517_v41 = vmul.f32 %v9204_v31, %v3941_v3  ;;  %v10966_v63 = vld [vmem:[#allocation84_spill] sm:$0xff] }
 0x606   :  { %v4054_v28 = vadd.f32 %v4053_v37, %v4052_v15  ;;  %v3802_v39 = vand.u32 2147483647, %v9501_v36  ;;  %v10967_v37 = vld [vmem:[#allocation57_spill] sm:$0xff]  ;;  %vm3798_vm15 = vweird.f32 %v9501_v36 }
 0x607   :  { %v3996_v54 = vsel %vm3995_vm12, %v7265_v8, %v3992_v32  ;;  %v4107_v53 = vadd.f32 %v4106_v19, %v4105_v30  ;;  %v9522_v57 = vadd.f32 %v4051_v6, %v10966_v63 }
 0x608   :  { %v7269_v42 = vpop.eup %7268  ;;  %v4001_v48 = vsel %vm3998_vm13, %v4000_v58, %v3996_v54  ;;  %v4055_v49 = vrot.slane %v4054_v28, 2  ;;  %vm3803_vm3 = vcmp.eq.f32.partialorder %v3802_v39, 8.507059e+37 }
 0x609   :  { %v4002_v24 = vmul.f32 %v9360_v55, %v4001_v48  ;;  %v3794_v26 = vmul.f32 %v7269_v42, %v9501_v36  ;;  %v3747_v60 = vpop.xlane.xlu2 %3746  ;;  %v3804_v55 = vand.u32 2147483648, %v9501_v36  ;;  %v9536_v30 = vadd.f32 %v4107_v53, %v10967_v37 }
 0x60a   :  { %v9524_v15 = vpop.eup %7270  ;;  %7272 = vrcp.f32 %v3747_v60  ;;  %v4056_v31 = vadd.f32 %v4055_v49, %v4054_v28  ;;  %vm3799_vm14 = vweird.f32 %v7269_v42  ;;  %v7066_v36 = vunpack.i.h.bf16 %v9414_v9 }
 0x60b   :  { %v3795_v8 = vsub.f32 1.0, %v3794_v26  ;;  %6853 = vmatmul.msk.f32.vlgmr.msra.gmra.mxu1 %vm305_vm1, %v9517_v41  ;;  %v3715_v12 = vsel %vm305_vm1, %v9524_v15, 0.0  ;;  %v4108_v21 = vsel %vm305_vm1, %v4002_v24, 0.0  ;;  %10968 = vst [vmem:[#allocation73_spill] sm:$0xff] %v9536_v30  ;;  %vm3800_vm2 = vmor %vm3798_vm15, %vm3799_vm14  ;;  %v3805_v54 = vor.u32 1.1754944e-38, %v3804_v55 }
 0x60c   :  { %6864 = vmatpush.xpose.msk.msra.mxu1 %vm305_vm1, %v9428_v45  ;;  %3716 = vadd.xlane.f32.xlu1 %v3715_v12  ;;  %v4057_v35 = vrot.slane %v4056_v31, 1  ;;  %v4109_v43 = vrot.slane %v4108_v21, 4  ;;  %vm3918_vm5 = vweird.f32 %v3747_v60 }
 0x60d   :  { %v3796_v32 = vmul.f32 %v7269_v42, %v3795_v8 }
 0x60e   :  { %v4058_v58 = vadd.f32 %v4057_v35, %v4056_v31  ;;  %v4110_v28 = vadd.f32 %v4109_v43, %v4108_v21  ;;  %v3924_v31 = vand.u32 2147483648, %v3747_v60  ;;  %v3922_v21 = vand.u32 2147483647, %v3747_v60 }
 0x60f   :  { %v3797_v3 = vadd.f32 %v7269_v42, %v3796_v32 }
 0x610   :  { %v7273_v19 = vpop.eup %7272  ;;  %v9540_v49 = vadd.f32 %v4058_v58, %v8822_v52  ;;  %v4111_v63 = vrot.slane %v4110_v28, 2  ;;  %v3925_v35 = vor.u32 1.1754944e-38, %v3924_v31  ;;  %vm3923_vm7 = vcmp.eq.f32.partialorder %v3922_v21, 8.507059e+37 }
 0x611   :  { %v3801_v6 = vsel %vm3800_vm2, %v7269_v42, %v3797_v3  ;;  %v3914_v45 = vmul.f32 %v7273_v19, %v3747_v60  ;;  %v3633_v48 = vpop.xlane.xlu2 %3632  ;;  %vm3919_vm4 = vweird.f32 %v7273_v19 }
 0x612   :  { %v3806_v53 = vsel %vm3803_vm3, %v3805_v54, %v3801_v6  ;;  %v3671_v26 = vsub.f32 %v9388_v56, %v3633_v48  ;;  %v4112_v42 = vadd.f32 %v4111_v63, %v4110_v28  ;;  %vm3920_vm6 = vmor %vm3918_vm5, %vm3919_vm4  ;;  %v7071_v48 = vunpack.i.h.bf16 %v9418_v27 }
 0x613   :  { %v3807_v8 = vmul.f32 %v9372_v34, %v3806_v53  ;;  %v3915_v12 = vsub.f32 1.0, %v3914_v45  ;;  %6857 = vmatmul.msk.f32.vlgmr.msrb.gmra.mxu1 %vm305_vm1, %v4002_v24  ;;  %v3657_v24 = vpop.xlane.xlu0 %3656 }
 0x614   :  { %v3691_v55 = vmul.f32 1.442695, %v3671_v26  ;;  %6872 = vmatpush.xpose.msk.msrb.mxu1 %vm305_vm1, %v9445_v20  ;;  %v4113_v34 = vrot.slane %v4112_v42, 1 }
 0x615   :  { %v4017_v52 = vsel %vm305_vm1, %v3807_v8, 0.0  ;;  %v3916_v39 = vmul.f32 %v7273_v19, %v3915_v12  ;;  %6844 = vmatmul.msk.f32.vlgmr.msrb.gmra.mxu0 %vm305_vm1, %v3807_v8 }
 0x616   :  { %v4018_v56 = vrot.slane %v4017_v52, 4  ;;  %7274 = vpow2.f32 %v3691_v55  ;;  %4412 = vmatpush.msrb.mxu0 %v7066_v36  ;;  %v4114_v43 = vadd.f32 %v4113_v34, %v4112_v42 }
 0x617   :  { %v3917_v37 = vadd.f32 %v7273_v19, %v3916_v39 }
 0x618   :  { %v4019_v32 = vadd.f32 %v4018_v56, %v4017_v52  ;;  %v9552_v6 = vadd.f32 %v4114_v43, %v8859_v51 }
 0x619   :  { %v3921_v20 = vsel %vm3920_vm6, %v7273_v19, %v3917_v37  ;;  %v3645_v3 = vpop.xlane.xlu2 %3644  ;;  %v3679_v19 = vsub.f32 %v9378_v11, %v3657_v24  ;;  %v10971_v37 = vld [vmem:[#allocation30_spill] sm:$0xff] }
 0x61a   :  { %v4020_v58 = vrot.slane %v4019_v32, 2  ;;  %v3926_v28 = vsel %vm3923_vm7, %v3925_v35, %v3921_v20  ;;  %v3675_v54 = vsub.f32 %v9398_v7, %v3645_v3  ;;  %v10973_v35 = vld [vmem:[#allocation40_spill] sm:$0xff]  ;;  %v9625_v20 = vpop.permute.xlu1 %4880  ;;  %v9627_v3 = vpop.f32.mrf.mxu1 }
 0x61b   :  { %v3927_v45 = vmul.f32 %v9380_v59, %v3926_v28  ;;  %6865 = vmatmul.msk.f32.vlgmr.msra.gmra.mxu1 %vm305_vm1, %v9420_v25  ;;  %v3707_v8 = vmul.f32 1.442695, %v3679_v19  ;;  %v3660_v12 = vpop.xlane.xlu0 %3659 }
 0x61c   :  { %v9557_v60 = vpop.eup %7274  ;;  %v4021_v53 = vadd.f32 %v4020_v58, %v4019_v32  ;;  %v3699_v26 = vmul.f32 1.442695, %v3675_v54  ;;  %v3680_v52 = vsub.f32 %v9386_v44, %v3660_v12  ;;  %v10972_v32 = vld [vmem:[#allocation44_spill] sm:$0xff] }
 0x61d   :  { %v4073_v63 = vsel %vm305_vm1, %v3927_v45, 0.0  ;;  %6848 = vmatmul.msk.f32.vlgmr.msra.gmra.mxu0 %vm305_vm1, %v9457_v10  ;;  %v3727_v51 = vsel %vm305_vm1, %v9557_v60, 0.0 }
 0x61e   :  { %v4022_v59 = vrot.slane %v4021_v53, 1  ;;  %v4074_v7 = vrot.slane %v4073_v63, 4  ;;  %7276 = vpow2.f32 %v3699_v26  ;;  %4516 = vmatpush.msra.mxu0 %v7071_v48  ;;  %3728 = vadd.xlane.f32.xlu0 %v3727_v51  ;;  %v3709_v21 = vmul.f32 1.442695, %v3680_v52 }
 0x61f   :  { %7278 = vpow2.f32 %v3707_v8 }
 0x620   :  { %v4023_v25 = vadd.f32 %v4022_v59, %v4021_v53  ;;  %v4075_v27 = vadd.f32 %v4074_v7, %v4073_v63 }
 0x621   :  { %v3648_v36 = vpop.xlane.xlu2 %3647 }
 0x622   :  { %v4076_v11 = vrot.slane %v4075_v27, 2  ;;  %v3676_v31 = vsub.f32 %v9404_v5, %v3648_v36  ;;  %v9568_v55 = vadd.f32 %v4023_v25, %v8842_v29  ;;  %v7055_v25 = vunpack.i.l.bf16 %v9396_v13 }
 0x623   :  { %6873 = vmatmul.msk.f32.vlgmr.msrb.gmra.mxu1 %vm305_vm1, %v9309_v16 }
 0x624   :  { %v9572_v10 = vpop.eup %7276  ;;  %v4077_v42 = vadd.f32 %v4076_v11, %v4075_v27  ;;  %v3701_v39 = vmul.f32 1.442695, %v3676_v31 }
 0x625   :  { %4938 = vrot.lane.b32.xlu1 %v10920_v46, %s7560_s28  ;;  %6852 = vmatmul.msk.f32.vlgmr.msrb.gmra.mxu0 %vm305_vm1, %v3927_v45  ;;  %v3739_v5 = vsel %vm305_vm1, %v9572_v10, 0.0  ;;  %v9582_v56 = vpop.eup %7278 }
 0x626   :  { %v4078_v29 = vrot.slane %v4077_v42, 1  ;;  %7280 = vpow2.f32 %v3701_v39  ;;  %6862 = vmatpush.xpose.msk.msrb.mxu0 %vm305_vm1, %v9299_v1  ;;  %3740 = vadd.xlane.f32.xlu0 %v3739_v5  ;;  %v3751_v1 = vsel %vm305_vm1, %v9582_v56, 0.0 }
 0x627   :  { %7282 = vpow2.f32 %v3709_v21 }
 0x628   :  { %v4079_v16 = vadd.f32 %v4078_v29, %v4077_v42 }
 0x62a   :  { %v9585_v44 = vadd.f32 %v4079_v16, %v8861_v40  ;;  %v10969_v40 = vld [vmem:[#allocation38_spill] sm:$0xff]  ;;  %v9637_v16 = vpop.permute.xlu0 %4966 }
 0x62c   :  { %v9587_v34 = vpop.eup %7280 }
 0x62d   :  { %4994 = vrot.lane.b32.xlu1 %v10929_v38, %s7560_s28  ;;  %6856 = vmatmul.msk.f32.vlgmr.msra.gmra.mxu0 %vm305_vm1, %v9465_v50  ;;  %v3742_v46 = vsel %vm305_vm1, %v9587_v34, 0.0  ;;  %v9597_v24 = vpop.eup %7282  ;;  %v10970_v50 = vld [vmem:[#allocation52_spill] sm:$0xff] }
 0x62e   :  { %3743 = vadd.xlane.f32.xlu2 %v3742_v46  ;;  %3752 = vadd.xlane.f32.xlu0 %v3751_v1  ;;  %v3754_v38 = vsel %vm305_vm1, %v9597_v24, 0.0 }
 0x635   :  { %4908 = vrot.lane.b32.xlu1 %v10969_v40, %s7560_s28  ;;  %6863 = vmatmul.msk.f32.vlgmr.msrb.gmra.mxu0 %vm305_vm1, %v9434_v61  ;;  %v9623_v61 = vpop.permute.xlu2 %4964 }
 0x636   :  { %3755 = vadd.xlane.f32.xlu0 %v3754_v38 }
 0x63d   :  { %5050 = vrot.lane.b32.xlu1 %v10970_v50, %s7560_s28 }
 0x646   :  { %4796 = vrot.lane.b32.xlu2 %v10971_v37, %s7560_s28 }
 0x64a   :  { %4798 = vrot.lane.b32.xlu0 %v10919_v18, %s7560_s28 }
 0x64e   :  { %4992 = vrot.lane.b32.xlu2 %v10972_v32, %s7560_s28 }
 0x652   :  { %4936 = vrot.lane.b32.xlu0 %v10973_v35, %s7560_s28 }
 0x656   :  { %5022 = vrot.lane.b32.xlu2 %v7866_v0, %s7560_s28 }
 0x65a   :  { %4910 = vrot.lane.b32.xlu0 %v10930_v17, %s7560_s28 }
 0x65e   :  { %5048 = vrot.lane.b32.xlu2 %v10858_v47, %s7560_s28 }
 0x662   :  { %5020 = vrot.lane.b32.xlu0 %v10855_v22, %s7560_s28 }
 0x670   :  { %v3720_v18 = vpop.xlane.xlu2 %3719 }
 0x671   :  { %7284 = vrcp.f32 %v3720_v18  ;;  %v3789_v17 = vand.u32 2147483648, %v3720_v18  ;;  %v3787_v47 = vand.u32 2147483647, %v3720_v18  ;;  %vm3783_vm9 = vweird.f32 %v3720_v18 }
 0x673   :  { %v3790_v22 = vor.u32 1.1754944e-38, %v3789_v17  ;;  %vm3788_vm11 = vcmp.eq.f32.partialorder %v3787_v47, 8.507059e+37 }
 0x677   :  { %v7285_v43 = vpop.eup %7284 }
 0x678   :  { %v3779_v58 = vmul.f32 %v7285_v43, %v3720_v18  ;;  %v3732_v28 = vpop.xlane.xlu2 %3731  ;;  %vm3784_vm8 = vweird.f32 %v7285_v43 }
 0x679   :  { %7286 = vrcp.f32 %v3732_v28  ;;  %vm3785_vm10 = vmor %vm3783_vm9, %vm3784_vm8  ;;  %v3849_v12 = vand.u32 2147483648, %v3732_v28  ;;  %v3847_v31 = vand.u32 2147483647, %v3732_v28  ;;  %vm3843_vm13 = vweird.f32 %v3732_v28 }
 0x67a   :  { %v3780_v54 = vsub.f32 1.0, %v3779_v58 }
 0x67b   :  { %vm3848_vm15 = vcmp.eq.f32.partialorder %v3847_v31, 8.507059e+37 }
 0x67c   :  { %v3781_v45 = vmul.f32 %v7285_v43, %v3780_v54 }
 0x67e   :  { %v3782_v48 = vadd.f32 %v7285_v43, %v3781_v45 }
 0x67f   :  { %v3717_v53 = vpop.xlane.xlu1 %3716  ;;  %v7287_v19 = vpop.eup %7286 }
 0x680   :  { %v3786_v26 = vsel %vm3785_vm10, %v7285_v43, %v3782_v48  ;;  %7288 = vrcp.f32 %v3717_v53  ;;  %v9629_v63 = vpop.f32.mrf.mxu1  ;;  %v3839_v59 = vmul.f32 %v7287_v19, %v3732_v28  ;;  %vm3844_vm12 = vweird.f32 %v7287_v19 }
 0x681   :  { %v3791_v51 = vsel %vm3788_vm11, %v3790_v22, %v3786_v26  ;;  %vm3845_vm14 = vmor %vm3843_vm13, %vm3844_vm12  ;;  %v3772_v38 = vand.u32 2147483647, %v3717_v53  ;;  %v3774_v37 = vand.u32 2147483648, %v3717_v53  ;;  %v7065_v43 = vunpack.i.l.bf16 %v9414_v9 }
 0x682   :  { %v3792_v7 = vmul.f32 %v9471_v14, %v3791_v51  ;;  %v3840_v8 = vsub.f32 1.0, %v3839_v59  ;;  %v3850_v14 = vor.u32 1.1754944e-38, %v3849_v12  ;;  %vm3768_vm3 = vweird.f32 %v3717_v53 }
 0x683   :  { %v3775_v45 = vor.u32 1.1754944e-38, %v3774_v37  ;;  %vm3773_vm5 = vcmp.eq.f32.partialorder %v3772_v38, 8.507059e+37 }
 0x684   :  { %v4010_v27 = vsel %vm305_vm1, %v3792_v7, 0.0  ;;  %6843 = vmatmul.msk.f32.vlgmr.msrb.gmra.mxu3 %vm305_vm1, %v3792_v7  ;;  %v3841_v11 = vmul.f32 %v7287_v19, %v3840_v8 }
 0x685   :  { %v4011_v36 = vrot.slane %v4010_v27, 4  ;;  %4386 = vmatpush.msrb.mxu3 %v7055_v25 }
 0x686   :  { %v7289_v42 = vpop.eup %7288  ;;  %v3842_v39 = vadd.f32 %v7287_v19, %v3841_v11 }
 0x687   :  { %v4012_v52 = vadd.f32 %v4011_v36, %v4010_v27  ;;  %v3764_v5 = vmul.f32 %v7289_v42, %v3717_v53  ;;  %vm3769_vm2 = vweird.f32 %v7289_v42  ;;  %v7046_v53 = vunpack.i.h.bf16 %v9353_v62 }
 0x688   :  { %v9635_v29 = vpop.f32.mrf.mxu1  ;;  %v3846_v46 = vsel %vm3845_vm14, %v7287_v19, %v3842_v39  ;;  %vm3770_vm4 = vmor %vm3768_vm3, %vm3769_vm2 }
 0x689   :  { %v4013_v21 = vrot.slane %v4012_v52, 2  ;;  %v3765_v1 = vsub.f32 1.0, %v3764_v5  ;;  %v3851_v40 = vsel %vm3848_vm15, %v3850_v14, %v3846_v46 }
 0x68a   :  { %v3852_v35 = vmul.f32 %v9508_v23, %v3851_v40 }
 0x68b   :  { %v4014_v32 = vadd.f32 %v4013_v21, %v4012_v52  ;;  %v3766_v18 = vmul.f32 %v7289_v42, %v3765_v1 }
 0x68c   :  { %v4038_v28 = vsel %vm305_vm1, %v3852_v35, 0.0  ;;  %6847 = vmatmul.msk.f32.vlgmr.msra.gmra.mxu3 %vm305_vm1, %v3852_v35 }
 0x68d   :  { %v4015_v58 = vrot.slane %v4014_v32, 1  ;;  %v3767_v54 = vadd.f32 %v7289_v42, %v3766_v18  ;;  %v4039_v17 = vrot.slane %v4038_v28, 4  ;;  %4490 = vmatpush.msra.mxu3 %v7065_v43 }
 0x68f   :  { %v4016_v47 = vadd.f32 %v4015_v58, %v4014_v32  ;;  %v3771_v48 = vsel %vm3770_vm4, %v7289_v42, %v3767_v54  ;;  %v4040_v22 = vadd.f32 %v4039_v17, %v4038_v28 }
 0x690   :  { %v3776_v23 = vsel %vm3773_vm5, %v3775_v45, %v3771_v48  ;;  %v9643_v19 = vpop.f32.mrf.mxu1 }
 0x691   :  { %10974 = vst [vmem:[#allocation80_spill] sm:$0xff] %v9643_v19  ;;  %v9646_v9 = vadd.f32 %v4016_v47, %v9169_v4  ;;  %v3777_v26 = vmul.f32 %v9524_v15, %v3776_v23  ;;  %v3729_v51 = vpop.xlane.xlu0 %3728  ;;  %v4041_v59 = vrot.slane %v4040_v22, 2  ;;  %v11006_v19 = vld [vmem:[#allocation65_spill] sm:$0xff] }
 0x692   :  { %7290 = vrcp.f32 %v3729_v51  ;;  %v9650_v7 = vpop.f32.mrf.mxu0  ;;  %v3834_v38 = vand.u32 2147483648, %v3729_v51  ;;  %v3832_v32 = vand.u32 2147483647, %v3729_v51  ;;  %vm3828_vm7 = vweird.f32 %v3729_v51 }
 0x693   :  { %v4003_v25 = vsel %vm305_vm1, %v3777_v26, 0.0  ;;  %6842 = vmatmul.msk.f32.vlgmr.msrb.gmra.mxu2 %vm305_vm1, %v3777_v26  ;;  %v4042_v27 = vadd.f32 %v4041_v59, %v4040_v22 }
 0x694   :  { %v4004_v8 = vrot.slane %v4003_v25, 4  ;;  %4360 = vmatpush.msrb.mxu2 %v7046_v53  ;;  %v3835_v54 = vor.u32 1.1754944e-38, %v3834_v38  ;;  %vm3833_vm9 = vcmp.eq.f32.partialorder %v3832_v32, 8.507059e+37 }
 0x695   :  { %v4043_v36 = vrot.slane %v4042_v27, 1 }
 0x696   :  { %v4005_v12 = vadd.f32 %v4004_v8, %v4003_v25 }
 0x697   :  { %v4939_v4 = vpop.permute.xlu1 %4938  ;;  %v4044_v62 = vadd.f32 %v4043_v36, %v4042_v27 }
 0x698   :  { %v7291_v11 = vpop.eup %7290  ;;  %v4006_v31 = vrot.slane %v4005_v12, 2  ;;  %v4737_v15 = vpop.f32.mrf.mxu1  ;;  %6880 = vmatpush.xpose.msk.msra.mxu1 %vm305_vm1, %v4939_v4 }
 0x699   :  { %v3824_v42 = vmul.f32 %v7291_v11, %v3729_v51  ;;  %v9655_v52 = vmul.f32 0.35355338, %v4737_v15  ;;  %v3741_v39 = vpop.xlane.xlu0 %3740  ;;  %v9662_v1 = vadd.f32 %v4044_v62, %v9180_v2  ;;  %vm3829_vm6 = vweird.f32 %v7291_v11 }
 0x69a   :  { %v4007_v5 = vadd.f32 %v4006_v31, %v4005_v12  ;;  %7292 = vrcp.f32 %v3741_v39  ;;  %v9657_v14 = vpop.f32.mrf.mxu0  ;;  %vm3830_vm8 = vmor %vm3828_vm7, %vm3829_vm6  ;;  %v3892_v59 = vand.u32 2147483647, %v3741_v39  ;;  %v3894_v25 = vand.u32 2147483648, %v3741_v39 }
 0x69b   :  { %v3825_v21 = vsub.f32 1.0, %v3824_v42  ;;  %v5101_v46 = vsel %vm305_vm1, %v9655_v52, -inf  ;;  %vm3888_vm11 = vweird.f32 %v3741_v39 }
 0x69c   :  { %v4008_v40 = vrot.slane %v4007_v5, 1  ;;  %5102 = vmax.xlane.f32.xlu1 %v5101_v46  ;;  %v3895_v31 = vor.u32 1.1754944e-38, %v3894_v25  ;;  %vm3893_vm13 = vcmp.eq.f32.partialorder %v3892_v59, 8.507059e+37 }
 0x69d   :  { %v3826_v37 = vmul.f32 %v7291_v11, %v3825_v21 }
 0x69e   :  { %v4009_v35 = vadd.f32 %v4008_v40, %v4007_v5 }
 0x69f   :  { %v3827_v18 = vadd.f32 %v7291_v11, %v3826_v37  ;;  %v9664_v43 = vpop.permute.xlu1 %4994 }
 0x6a0   :  { %v7293_v58 = vpop.eup %7292  ;;  %v9667_v28 = vadd.f32 %v4009_v35, %v9142_v33  ;;  %v4849_v17 = vpop.f32.mrf.mxu1  ;;  %v7056_v33 = vunpack.i.h.bf16 %v9396_v13 }
 0x6a1   :  { %v3831_v2 = vsel %vm3830_vm8, %v7291_v11, %v3827_v18  ;;  %v3884_v45 = vmul.f32 %v7293_v58, %v3741_v39  ;;  %v9669_v47 = vmul.f32 0.35355338, %v4849_v17  ;;  %v3744_v48 = vpop.xlane.xlu2 %3743  ;;  %v9671_v22 = vpop.xlane.xlu0 %3752  ;;  %vm3889_vm10 = vweird.f32 %v7293_v58 }
 0x6a2   :  { %v3836_v23 = vsel %vm3833_vm9, %v3835_v54, %v3831_v2  ;;  %7294 = vrcp.f32 %v3744_v48  ;;  %v9673_v26 = vpop.f32.mrf.mxu0  ;;  %vm3890_vm12 = vmor %vm3888_vm11, %vm3889_vm10  ;;  %v3907_v32 = vand.u32 2147483647, %v3744_v48  ;;  %v3909_v18 = vand.u32 2147483648, %v3744_v48 }
 0x6a3   :  { %10975 = vst [vmem:[#allocation33_spill] sm:$0xff] %v9673_v26  ;;  %v3837_v51 = vmul.f32 %v9557_v60, %v3836_v23  ;;  %v3885_v53 = vsub.f32 1.0, %v3884_v45  ;;  %7296 = vrcp.f32 %v9671_v22  ;;  %v5113_v12 = vsel %vm305_vm1, %v9669_v47, -inf }
 0x6a4   :  { %5114 = vmax.xlane.f32.xlu2 %v5113_v12  ;;  %v3954_v45 = vand.u32 2147483648, %v9671_v22  ;;  %vm3903_vm2 = vweird.f32 %v3744_v48  ;;  %vm9699_vm3 = vcmp.eq.f32.partialorder %v3907_v32, 8.507059e+37  ;;  %v3910_v12 = vor.u32 1.1754944e-38, %v3909_v18 }
 0x6a5   :  { %v4031_v8 = vsel %vm305_vm1, %v3837_v51, 0.0  ;;  %v3886_v27 = vmul.f32 %v7293_v58, %v3885_v53  ;;  %6846 = vmatmul.msk.f32.vlgmr.msra.gmra.mxu2 %vm305_vm1, %v3837_v51  ;;  %v10977_v53 = vld [vmem:[#allocation72_spill] sm:$0xff]  ;;  %vm3948_vm5 = vweird.f32 %v9671_v22 }
 0x6a6   :  { %v4032_v36 = vrot.slane %v4031_v8, 4  ;;  %4464 = vmatpush.msra.mxu2 %v7056_v33 }
 0x6a7   :  { %v3887_v60 = vadd.f32 %v7293_v58, %v3886_v27  ;;  %v9682_v4 = vpop.permute.xlu1 %4908 }
 0x6a8   :  { %v7295_v11 = vpop.eup %7294  ;;  %v4033_v13 = vadd.f32 %v4032_v36, %v4031_v8 }
 0x6a9   :  { %v7297_v15 = vpop.eup %7296  ;;  %v3891_v62 = vsel %vm3890_vm12, %v7293_v58, %v3887_v60  ;;  %v3899_v42 = vmul.f32 %v7295_v11, %v3744_v48  ;;  %v9684_v5 = vpop.xlane.xlu0 %3755  ;;  %v3952_v58 = vand.u32 2147483647, %v9671_v22  ;;  %vm3904_vm14 = vweird.f32 %v7295_v11 }
 0x6aa   :  { %v4034_v21 = vrot.slane %v4033_v13, 2  ;;  %v3896_v46 = vsel %vm3893_vm13, %v3895_v31, %v3891_v62  ;;  %v3944_v40 = vmul.f32 %v7297_v15, %v9671_v22  ;;  %v9687_v38 = vpop.f32.mrf.mxu0  ;;  %7298 = vrcp.f32 %v9684_v5  ;;  %vm3905_vm4 = vmor %vm3903_vm2, %vm3904_vm14 }
 0x6ab   :  { %10976 = vst [vmem:[#allocation39_spill] sm:$0xff] %v9687_v38  ;;  %v3897_v39 = vmul.f32 %v9572_v10, %v3896_v46  ;;  %v3900_v37 = vsub.f32 1.0, %v3899_v42  ;;  %vm3949_vm15 = vweird.f32 %v7297_v15  ;;  %v9695_v10 = vpop.permute.xlu2 %4796  ;;  %vm3953_vm7 = vcmp.eq.f32.partialorder %v3952_v58, 8.507059e+37 }
 0x6ac   :  { %v4035_v35 = vadd.f32 %v4034_v21, %v4033_v13  ;;  %v3945_v54 = vsub.f32 1.0, %v3944_v40  ;;  %vm3950_vm6 = vmor %vm3948_vm5, %vm3949_vm15  ;;  %v3955_v48 = vor.u32 1.1754944e-38, %v3954_v45  ;;  %vm3963_vm9 = vweird.f32 %v9684_v5 }
 0x6ad   :  { %v4059_v17 = vsel %vm305_vm1, %v3897_v39, 0.0  ;;  %v3901_v2 = vmul.f32 %v7295_v11, %v3900_v37  ;;  %6850 = vmatmul.msk.f32.vlgmr.msrb.gmra.mxu2 %vm305_vm1, %v3897_v39  ;;  %v3967_v37 = vand.u32 2147483647, %v9684_v5 }
 0x6ae   :  { %v4060_v23 = vrot.slane %v4059_v17, 4  ;;  %v3946_v51 = vmul.f32 %v7297_v15, %v3945_v54  ;;  %6858 = vmatpush.xpose.msk.msrb.mxu2 %vm305_vm1, %v10977_v53  ;;  %v4036_v8 = vrot.slane %v4035_v35, 1 }
 0x6af   :  { %v3902_v33 = vadd.f32 %v7295_v11, %v3901_v2  ;;  %v5051_v25 = vpop.permute.xlu1 %5050  ;;  %vm3968_vm11 = vcmp.eq.f32.partialorder %v3967_v37, 8.507059e+37  ;;  %v10986_v37 = vld [vmem:[#allocation79_spill] sm:$0xff] }
 0x6b0   :  { %v4061_v27 = vadd.f32 %v4060_v23, %v4059_v17  ;;  %v3947_v36 = vadd.f32 %v7297_v15, %v3946_v51  ;;  %6888 = vmatpush.xpose.msk.msrb.mxu1 %vm305_vm1, %v5051_v25  ;;  %v7299_v60 = vpop.eup %7298  ;;  %v4037_v31 = vadd.f32 %v4036_v8, %v4035_v35  ;;  %v10980_v35 = vld [vmem:[#allocation61_spill] sm:$0xff] }
 0x6b1   :  { %v3906_v13 = vsel %vm3905_vm4, %v7295_v11, %v3902_v33  ;;  %v3959_v46 = vmul.f32 %v7299_v60, %v9684_v5  ;;  %vm3964_vm8 = vweird.f32 %v7299_v60  ;;  %v10982_v33 = vld [vmem:[#allocation85_spill] sm:$0xff] }
 0x6b2   :  { %v4062_v62 = vrot.slane %v4061_v27, 2  ;;  %v3911_v42 = vsel %vm9699_vm3, %v3910_v12, %v3906_v13  ;;  %v3951_v21 = vsel %vm3950_vm6, %v7297_v15, %v3947_v36  ;;  %v4709_v40 = vpop.f32.mrf.mxu0  ;;  %v9715_v58 = vadd.f32 %v4037_v31, %v10980_v35  ;;  %vm3965_vm10 = vmor %vm3963_vm9, %vm3964_vm8  ;;  %v10983_v13 = vld [vmem:[#allocation63_spill] sm:$0xff] }
 0x6b3   :  { %v3912_v39 = vmul.f32 %v9587_v34, %v3911_v42  ;;  %v3956_v22 = vsel %vm3953_vm7, %v3955_v48, %v3951_v21  ;;  %v9711_v32 = vmul.f32 0.35355338, %v4709_v40  ;;  %v3960_v54 = vsub.f32 1.0, %v3959_v46 }
 0x6b4   :  { %v4063_v11 = vadd.f32 %v4062_v62, %v4061_v27  ;;  %v3957_v18 = vmul.f32 %v9582_v56, %v3956_v22  ;;  %v3969_v15 = vand.u32 2147483648, %v9684_v5  ;;  %v10981_v56 = vld [vmem:[#allocation53_spill] sm:$0xff]  ;;  %v4993_v27 = vpop.permute.xlu2 %4992 }
 0x6b5   :  { %v4066_v17 = vsel %vm305_vm1, %v3912_v39, 0.0  ;;  %6851 = vmatmul.msk.f32.vlgmr.msrb.gmra.mxu3 %vm305_vm1, %v3912_v39  ;;  %v5098_v34 = vsel %vm305_vm1, %v9711_v32, -inf  ;;  %v3961_v51 = vmul.f32 %v7299_v60, %v3960_v54 }
 0x6b6   :  { %v4064_v2 = vrot.slane %v4063_v11, 1  ;;  %v4067_v45 = vrot.slane %v4066_v17, 4  ;;  %v4087_v23 = vsel %vm305_vm1, %v3957_v18, 0.0  ;;  %6854 = vmatmul.msk.f32.vlgmr.msra.gmra.mxu2 %vm305_vm1, %v3957_v18  ;;  %6860 = vmatpush.xpose.msk.msrb.mxu3 %vm305_vm1, %v10981_v56  ;;  %v3970_v36 = vor.u32 1.1754944e-38, %v3969_v15  ;;  %v10984_v18 = vld [vmem:[#allocation82_spill] sm:$0xff] }
 0x6b7   :  { %v4088_v53 = vrot.slane %v4087_v23, 4  ;;  %6866 = vmatpush.xpose.msk.msra.mxu2 %vm305_vm1, %v10982_v33  ;;  %5099 = vmax.xlane.f32.xlu1 %v5098_v34  ;;  %v3962_v8 = vadd.f32 %v7299_v60, %v3961_v51  ;;  %v10987_v34 = vld [vmem:[#allocation60_spill] sm:$0xff]  ;;  %v10988_v51 = vld [vmem:[#allocation62_spill] sm:$0xff] }
 0x6b8   :  { %v4065_v59 = vadd.f32 %v4064_v2, %v4063_v11  ;;  %v4068_v25 = vadd.f32 %v4067_v45, %v4066_v17 }
 0x6b9   :  { %v4089_v12 = vadd.f32 %v4088_v53, %v4087_v23  ;;  %v3966_v62 = vsel %vm3965_vm10, %v7299_v60, %v3962_v8  ;;  %v10985_v60 = vld [vmem:[#allocation56_spill] sm:$0xff] }
 0x6ba   :  { %v9731_v48 = vadd.f32 %v4065_v59, %v10983_v13  ;;  %v4069_v31 = vrot.slane %v4068_v25, 2  ;;  %v3971_v21 = vsel %vm3968_vm11, %v3970_v36, %v3966_v62  ;;  %v10990_v59 = vld [vmem:[#allocation75_spill] sm:$0xff]  ;;  %v10993_v36 = vld [vmem:[#allocation18_spill] sm:$0xff] }
 0x6bb   :  { %v4090_v42 = vrot.slane %v4089_v12, 2  ;;  %v3972_v40 = vmul.f32 %v9597_v24, %v3971_v21  ;;  %v10996_v21 = vld [vmem:[#allocation77_spill] sm:$0xff] }
 0x6bc   :  { %v4070_v46 = vadd.f32 %v4069_v31, %v4068_v25  ;;  %v4799_v39 = vpop.permute.xlu0 %4798  ;;  %v5023_v45 = vpop.permute.xlu2 %5022  ;;  %v10991_v25 = vld [vmem:[#allocation25_spill] sm:$0xff] }
 0x6bd   :  { %v4091_v22 = vadd.f32 %v4090_v42, %v4089_v12  ;;  %6870 = vmatpush.xpose.msk.msra.mxu0 %vm305_vm1, %v4799_v39  ;;  %v4094_v11 = vsel %vm305_vm1, %v3972_v40, 0.0  ;;  %6855 = vmatmul.msk.f32.vlgmr.msra.gmra.mxu3 %vm305_vm1, %v3972_v40  ;;  %v10995_v42 = vld [vmem:[#allocation54_spill] sm:$0xff] }
 0x6be   :  { %v4071_v5 = vrot.slane %v4070_v46, 1  ;;  %6859 = vmatmul.msk.f32.vlgmr.msrb.gmra.mxu2 %vm305_vm1, %v10984_v18  ;;  %v4095_v54 = vrot.slane %v4094_v11, 4  ;;  %6868 = vmatpush.xpose.msk.msra.mxu3 %vm305_vm1, %v10985_v60 }
 0x6bf   :  { %6874 = vmatpush.xpose.msk.msrb.mxu2 %vm305_vm1, %v10986_v37  ;;  %v4092_v24 = vrot.slane %v4091_v22, 1 }
 0x6c0   :  { %v4072_v35 = vadd.f32 %v4071_v5, %v4070_v46  ;;  %6871 = vmatmul.msk.f32.vlgmr.msra.gmra.mxu0 %vm305_vm1, %v9695_v10  ;;  %v4096_v17 = vadd.f32 %v4095_v54, %v4094_v11  ;;  %v10992_v10 = vld [vmem:[#allocation86_spill] sm:$0xff] }
 0x6c1   :  { %v4093_v15 = vadd.f32 %v4092_v24, %v4091_v22 }
 0x6c2   :  { %v9746_v2 = vadd.f32 %v4072_v35, %v10987_v34  ;;  %v4097_v23 = vrot.slane %v4096_v17, 2 }
 0x6c3   :  { %v9749_v56 = vadd.f32 %v4093_v15, %v10988_v51 }
 0x6c4   :  { %v4937_v53 = vpop.permute.xlu0 %4936  ;;  %v4098_v33 = vadd.f32 %v4097_v23, %v4096_v17  ;;  %v5049_v31 = vpop.permute.xlu2 %5048  ;;  %v10998_v23 = vld [vmem:[#allocation29_spill] sm:$0xff] }
 0x6c5   :  { %10989 = vst [vmem:[#allocation35_spill] sm:$0xff] %v9749_v56  ;;  %6881 = vmatmul.msk.f32.vlgmr.msra.gmra.mxu1 %vm305_vm1, %v4937_v53  ;;  %6861 = vmatmul.msk.f32.vlgmr.msrb.gmra.mxu3 %vm305_vm1, %v10990_v59 }
 0x6c6   :  { %6867 = vmatmul.msk.f32.vlgmr.msra.gmra.mxu2 %vm305_vm1, %v10991_v25  ;;  %6876 = vmatpush.xpose.msk.msrb.mxu3 %vm305_vm1, %v10992_v10  ;;  %v4099_v8 = vrot.slane %v4098_v33, 1 }
 0x6c7   :  { %6882 = vmatpush.xpose.msk.msra.mxu2 %vm305_vm1, %v9637_v16 }
 0x6c8   :  { %v4100_v12 = vadd.f32 %v4099_v8, %v4098_v33 }
 0x6ca   :  { %v9761_v13 = vadd.f32 %v4100_v12, %v10993_v36 }
 0x6cc   :  { %10994 = vst [vmem:[#allocation45_spill] sm:$0xff] %v9761_v13  ;;  %v4911_v62 = vpop.permute.xlu0 %4910 }
 0x6cd   :  { %6878 = vmatpush.xpose.msk.msrb.mxu0 %vm305_vm1, %v4911_v62  ;;  %6889 = vmatmul.msk.f32.vlgmr.msrb.gmra.mxu1 %vm305_vm1, %v5049_v31 }
 0x6ce   :  { %6869 = vmatmul.msk.f32.vlgmr.msra.gmra.mxu3 %vm305_vm1, %v10995_v42  ;;  %6875 = vmatmul.msk.f32.vlgmr.msrb.gmra.mxu2 %vm305_vm1, %v10996_v21  ;;  %v11000_v42 = vld [vmem:[#allocation24_spill] sm:$0xff]  ;;  %v11001_v21 = vld [vmem:[#allocation31_spill] sm:$0xff] }
 0x6cf   :  { %6884 = vmatpush.xpose.msk.msra.mxu3 %vm305_vm1, %v9664_v43 }
 0x6d0   :  { %6879 = vmatmul.msk.f32.vlgmr.msrb.gmra.mxu0 %vm305_vm1, %v9682_v4 }
 0x6d1   :  { %6886 = vmatpush.xpose.msk.msra.mxu0 %vm305_vm1, %v5023_v45  ;;  %v10997_v45 = vld [vmem:[#allocation22_spill] sm:$0xff] }
 0x6d2   :  { %v7072_v51 = vpack.i.bf16 %v10998_v23, %v10997_v45 }
 0x6d4   :  { %v5021_v16 = vpop.permute.xlu0 %5020 }
 0x6d6   :  { %6877 = vmatmul.msk.f32.vlgmr.msrb.gmra.mxu3 %vm305_vm1, %v9625_v20  ;;  %6883 = vmatmul.msk.f32.vlgmr.msra.gmra.mxu2 %vm305_vm1, %v9623_v61 }
 0x6d8   :  { %6887 = vmatmul.msk.f32.vlgmr.msra.gmra.mxu0 %vm305_vm1, %v5021_v16  ;;  %v7077_v16 = vpack.i.bf16 %v11001_v21, %v11000_v42 }
 0x6de   :  { %6885 = vmatmul.msk.f32.vlgmr.msra.gmra.mxu3 %vm305_vm1, %v4993_v27 }
 0x707   :  { %v9798_v15 = vpop.f32.mrf.mxu3 }
 0x70f   :  { %v5103_v22 = vpop.xlane.xlu1 %5102  ;;  %v9813_v25 = vpop.f32.mrf.mxu3 }
 0x710   :  { %v5143_v17 = vsub.f32 %v9655_v52, %v5103_v22  ;;  %10999 = vst [vmem:[#allocation17_spill] sm:$0xff] %v9813_v25 }
 0x712   :  { %v5162_v53 = vmul.f32 1.442695, %v5143_v17 }
 0x716   :  { %v9807_v33 = vpop.f32.mrf.mxu2 }
 0x717   :  { %v5115_v62 = vpop.xlane.xlu2 %5114 }
 0x728   :  { %v9815_v10 = vpop.f32.mrf.mxu2 }
 0x72a   :  { %v5100_v61 = vpop.xlane.xlu1 %5099 }
 0x72b   :  { %v5142_v27 = vsub.f32 %v9711_v32, %v5100_v61 }
 0x72d   :  { %v5160_v60 = vmul.f32 1.442695, %v5142_v27 }
 0x72f   :  { %7300 = vpow2.f32 %v5160_v60 }
 0x730   :  { %7302 = vpow2.f32 %v5162_v53  ;;  %v9823_v31 = vpop.f32.mrf.mxu2 }
 0x735   :  { %v9809_v52 = vpop.eup %7300 }
 0x736   :  { %v5194_v59 = vsel %vm305_vm1, %v9809_v52, 0.0  ;;  %v9817_v8 = vpop.eup %7302 }
 0x737   :  { %v5197_v12 = vsel %vm305_vm1, %v9817_v8, 0.0 }
 0x738   :  { %v9821_v36 = vpop.f32.mrf.mxu3 }
 0x739   :  { %v9831_v22 = vpop.f32.mrf.mxu2 }
 0x73d   :  { %v4821_v46 = vpop.f32.mrf.mxu0 }
 0x73e   :  { %v9780_v40 = vmul.f32 0.35355338, %v4821_v46  ;;  %v5147_v46 = vsub.f32 %v9669_v47, %v5115_v62 }
 0x740   :  { %v5110_v43 = vsel %vm305_vm1, %v9780_v40, -inf }
 0x741   :  { %5111 = vmax.xlane.f32.xlu2 %v5110_v43  ;;  %v9829_v43 = vpop.f32.mrf.mxu3 }
 0x742   :  { %v4961_v39 = vpop.f32.mrf.mxu1  ;;  %11002 = vst [vmem:[#allocation19_spill] sm:$0xff] %v9829_v43 }
 0x743   :  { %v9784_v4 = vmul.f32 0.35355338, %v4961_v39  ;;  %v5170_v39 = vmul.f32 1.442695, %v5147_v46 }
 0x745   :  { %v5125_v20 = vsel %vm305_vm1, %v9784_v4, -inf  ;;  %7304 = vpow2.f32 %v5170_v39 }
 0x746   :  { %5126 = vmax.xlane.f32.xlu0 %v5125_v20 }
 0x749   :  { %v4681_v20 = vpop.f32.mrf.mxu3 }
 0x74a   :  { %v5073_v54 = vpop.f32.mrf.mxu1 }
 0x74b   :  { %v9793_v37 = vmul.f32 0.35355338, %v5073_v54  ;;  %v9833_v61 = vpop.eup %7304 }
 0x74c   :  { %v5209_v27 = vsel %vm305_vm1, %v9833_v61, 0.0 }
 0x74d   :  { %v4933_v5 = vpop.f32.mrf.mxu0  ;;  %v5137_v34 = vsel %vm305_vm1, %v9793_v37, -inf }
 0x74e   :  { %v9788_v11 = vmul.f32 0.35355338, %v4933_v5  ;;  %v4653_v5 = vpop.f32.mrf.mxu2 }
 0x750   :  { %v5122_v18 = vsel %vm305_vm1, %v9788_v11, -inf }
 0x751   :  { %5123 = vmax.xlane.f32.xlu1 %v5122_v18  ;;  %v9837_v18 = vmul.f32 0.35355338, %v4653_v5  ;;  %v4793_v54 = vpop.f32.mrf.mxu3 }
 0x753   :  { %v5092_v47 = vsel %vm305_vm1, %v9837_v18, -inf }
 0x755   :  { %v5045_v24 = vpop.f32.mrf.mxu0 }
 0x756   :  { %v9795_v35 = vmul.f32 0.35355338, %v5045_v24  ;;  %v4765_v60 = vpop.f32.mrf.mxu2 }
 0x757   :  { %v9841_v24 = vmul.f32 0.35355338, %v4765_v60 }
 0x758   :  { %v5134_v32 = vsel %vm305_vm1, %v9795_v35, -inf }
 0x759   :  { %5138 = vmax.xlane.f32.xlu1 %v5137_v34  ;;  %5135 = vmax.xlane.f32.xlu2 %v5134_v32  ;;  %v4905_v17 = vpop.f32.mrf.mxu3  ;;  %v5104_v34 = vsel %vm305_vm1, %v9841_v24, -inf  ;;  %v9845_v32 = vmul.f32 0.35355338, %v4793_v54 }
 0x75a   :  { %7073 = vrot.lane.b32.xlu0 %v7072_v51, %s7561_s29  ;;  %v9869_v60 = vmul.f32 0.35355338, %v4905_v17 }
 0x75b   :  { %v5107_v45 = vsel %vm305_vm1, %v9845_v32, -inf }
 0x75e   :  { %v4877_v5 = vpop.f32.mrf.mxu2 }
 0x75f   :  { %v9861_v54 = vmul.f32 0.35355338, %v4877_v5  ;;  %v11005_v5 = vld [vmem:[#allocation81_spill] sm:$0xff] }
 0x761   :  { %5195 = vadd.xlane.f32.xlu2 %v5194_v59  ;;  %v5017_v23 = vpop.f32.mrf.mxu3 }
 0x762   :  { %v9849_v51 = vmul.f32 0.35355338, %v5017_v23 }
 0x764   :  { %11003 = vst [vmem:[#allocation49_spill] sm:$0xff] %v9849_v51  ;;  %v5131_v53 = vsel %vm305_vm1, %v9849_v51, -inf }
 0x769   :  { %5198 = vadd.xlane.f32.xlu2 %v5197_v12 }
 0x772   :  { %7078 = vrot.lane.b32.xlu1 %v7077_v16, %s7561_s29 }
 0x784   :  { %5210 = vadd.xlane.f32.xlu0 %v5209_v27 }
 0x78c   :  { %5093 = vmax.xlane.f32.xlu0 %v5092_v47  ;;  %v9867_v47 = vmul.f32 0.35355338, %v4681_v20 }
 0x78e   :  { %v5095_v23 = vsel %vm305_vm1, %v9867_v47, -inf }
 0x794   :  { %5105 = vmax.xlane.f32.xlu0 %v5104_v34 }
 0x79c   :  { %5108 = vmax.xlane.f32.xlu0 %v5107_v45 }
 0x7a4   :  { %5132 = vmax.xlane.f32.xlu0 %v5131_v53  ;;  %v4989_v53 = vpop.f32.mrf.mxu2 }
 0x7a5   :  { %v9877_v20 = vmul.f32 0.35355338, %v4989_v53 }
 0x7a7   :  { %11004 = vst [vmem:[#allocation43_spill] sm:$0xff] %v9877_v20 }
 0x7b4   :  { %v5112_v59 = vpop.xlane.xlu2 %5111 }
 0x7b5   :  { %v5146_v12 = vsub.f32 %v9780_v40, %v5112_v59 }
 0x7b7   :  { %v5168_v62 = vmul.f32 1.442695, %v5146_v12 }
 0x7b9   :  { %7306 = vpow2.f32 %v5168_v62  ;;  %v5127_v42 = vpop.xlane.xlu0 %5126  ;;  %v5119_v62 = vsel %vm305_vm1, %v9869_v60, -inf }
 0x7ba   :  { %v5151_v21 = vsub.f32 %v9784_v4, %v5127_v42  ;;  %v5116_v4 = vsel %vm305_vm1, %v9861_v54, -inf }
 0x7bc   :  { %v5178_v16 = vmul.f32 1.442695, %v5151_v21  ;;  %v5128_v21 = vsel %vm305_vm1, %v9877_v20, -inf }
 0x7be   :  { %7308 = vpow2.f32 %v5178_v16 }
 0x7bf   :  { %v9855_v46 = vpop.eup %7306 }
 0x7c0   :  { %v5206_v39 = vsel %vm305_vm1, %v9855_v46, 0.0 }
 0x7c1   :  { %5207 = vadd.xlane.f32.xlu1 %v5206_v39 }
 0x7c4   :  { %v9859_v27 = vpop.eup %7308  ;;  %v9879_v17 = vpop.xlane.xlu1 %5123 }
 0x7c5   :  { %v5221_v40 = vsel %vm305_vm1, %v9859_v27, 0.0 }
 0x7c6   :  { %5222 = vadd.xlane.f32.xlu2 %v5221_v40  ;;  %v4024_v40 = vsel %vm305_vm1, %v11005_v5, 0.0 }
 0x7c9   :  { %5117 = vmax.xlane.f32.xlu1 %v5116_v4 }
 0x7cc   :  { %v9871_v34 = vpop.xlane.xlu2 %5135  ;;  %v7074_v45 = vpop.permute.xlu0 %7073 }
 0x7cd   :  { %v7076_v59 = vunpack.i.h.bf16 %v7074_v45  ;;  %v7075_v12 = vunpack.i.l.bf16 %v7074_v45  ;;  %v9885_v16 = vpop.xlane.xlu1 %5138  ;;  %v4025_v45 = vrot.slane %v4024_v40, 4 }
 0x7ce   :  { %5096 = vmax.xlane.f32.xlu2 %v5095_v23 }
 0x7cf   :  { %5625 = vmatpush.msrb.mxu2 %v7075_v12  ;;  %5703 = vmatpush.msra.mxu1 %v7076_v59  ;;  %v4026_v26 = vadd.f32 %v4025_v45, %v4024_v40  ;;  %v11007_v40 = vld [vmem:[#allocation20_spill] sm:$0xff] }
 0x7d1   :  { %5120 = vmax.xlane.f32.xlu1 %v5119_v62  ;;  %v4027_v5 = vrot.slane %v4026_v26, 2 }
 0x7d3   :  { %v4028_v45 = vadd.f32 %v4027_v5, %v4026_v26 }
 0x7d4   :  { %v9881_v42 = vpop.xlane.xlu2 %5195 }
 0x7d6   :  { %5129 = vmax.xlane.f32.xlu2 %v5128_v21 }
 0x7dc   :  { %v5199_v39 = vpop.xlane.xlu2 %5198 }
 0x7dd   :  { %7310 = vrcp.f32 %v5199_v39  ;;  %v5292_v30 = vand.u32 2147483648, %v5199_v39  ;;  %v5290_v21 = vand.u32 2147483647, %v5199_v39  ;;  %vm5286_vm13 = vweird.f32 %v5199_v39 }
 0x7df   :  { %v5293_v38 = vor.u32 1.1754944e-38, %v5292_v30  ;;  %vm5291_vm15 = vcmp.eq.f32.partialorder %v5290_v21, 8.507059e+37 }
 0x7e3   :  { %v7311_v4 = vpop.eup %7310 }
 0x7e4   :  { %v5282_v23 = vmul.f32 %v7311_v4, %v5199_v39  ;;  %v7079_v53 = vpop.permute.xlu1 %7078  ;;  %vm5287_vm12 = vweird.f32 %v7311_v4  ;;  %v11008_v39 = vld [vmem:[#allocation48_spill] sm:$0xff] }
 0x7e5   :  { %v7081_v59 = vunpack.i.h.bf16 %v7079_v53  ;;  %v7080_v12 = vunpack.i.l.bf16 %v7079_v53  ;;  %vm5288_vm14 = vmor %vm5286_vm13, %vm5287_vm12 }
 0x7e6   :  { %v5283_v62 = vsub.f32 1.0, %v5282_v23 }
 0x7e7   :  { %5651 = vmatpush.msrb.mxu3 %v7080_v12  ;;  %5729 = vmatpush.msra.mxu2 %v7081_v59 }
 0x7e8   :  { %v5284_v13 = vmul.f32 %v7311_v4, %v5283_v62 }
 0x7ea   :  { %v5285_v56 = vadd.f32 %v7311_v4, %v5284_v13  ;;  %7093 = vrot.lane.b32.xlu1 %v11006_v19, %s7561_s29  ;;  %v4029_v19 = vrot.slane %v4028_v45, 1 }
 0x7ec   :  { %v5289_v43 = vsel %vm5288_vm14, %v7311_v4, %v5285_v56 }
 0x7ed   :  { %v5294_v25 = vsel %vm5291_vm15, %v5293_v38, %v5289_v43  ;;  %v4030_v38 = vadd.f32 %v4029_v19, %v4028_v45  ;;  %vm5271_vm15 = vweird.f32 %v9881_v42 }
 0x7ee   :  { %v5295_v23 = vmul.f32 %v9817_v8, %v5294_v25  ;;  %7088 = vrot.lane.b32.xlu2 %v11007_v40, %s7561_s29  ;;  %v11009_v8 = vld [vmem:[#allocation47_spill] sm:$0xff] }
 0x7ef   :  { %v4118_v43 = vadd.f32 %v4030_v38, %v11009_v8 }
 0x7f0   :  { %v5497_v53 = vsel %vm305_vm1, %v5295_v23, 0.0  ;;  %6893 = vmatmul.msk.f32.vlgmr.msra.gmra.mxu1 %vm305_vm1, %v5295_v23  ;;  %v5154_v23 = vsub.f32 %v9795_v35, %v9871_v34 }
 0x7f1   :  { %v5498_v13 = vrot.slane %v5497_v53, 4 }
 0x7f2   :  { %7098 = vrot.lane.b32.xlu1 %v11008_v39, %s7561_s29 }
 0x7f3   :  { %v5499_v59 = vadd.f32 %v5498_v13, %v5497_v53  ;;  %v5184_v53 = vmul.f32 1.442695, %v5154_v23 }
 0x7f5   :  { %v5500_v30 = vrot.slane %v5499_v59, 2 }
 0x7f7   :  { %v5501_v56 = vadd.f32 %v5500_v30, %v5499_v59  ;;  %v9898_v4 = vpop.xlane.xlu0 %5210 }
 0x7f9   :  { %v5502_v25 = vrot.slane %v5501_v56, 1 }
 0x7fb   :  { %v5503_v12 = vadd.f32 %v5502_v25, %v5501_v56 }
 0x7fd   :  { %v9901_v26 = vadd.f32 %v5503_v12, %v4118_v43 }
 0x7ff   :  { %v5094_v62 = vpop.xlane.xlu0 %5093 }
 0x800   :  { %v5140_v21 = vsub.f32 %v9837_v18, %v5094_v62 }
 0x802   :  { %v5156_v5 = vmul.f32 1.442695, %v5140_v21 }
 0x804   :  { %7312 = vpow2.f32 %v5156_v5 }
 0x805   :  { %7314 = vpow2.f32 %v5184_v53 }
 0x807   :  { %v5106_v40 = vpop.xlane.xlu0 %5105 }
 0x808   :  { %v5144_v45 = vsub.f32 %v9841_v24, %v5106_v40 }
 0x80a   :  { %v9906_v13 = vpop.eup %7312  ;;  %v5164_v19 = vmul.f32 1.442695, %v5144_v45 }
 0x80b   :  { %v5188_v39 = vsel %vm305_vm1, %v9906_v13, 0.0  ;;  %v9912_v30 = vpop.eup %7314 }
 0x80c   :  { %5189 = vadd.xlane.f32.xlu0 %v5188_v39  ;;  %7316 = vpow2.f32 %v5164_v19  ;;  %v5230_v35 = vsel %vm305_vm1, %v9912_v30, 0.0 }
 0x80f   :  { %v5109_v59 = vpop.xlane.xlu0 %5108 }
 0x810   :  { %v5145_v18 = vsub.f32 %v9845_v32, %v5109_v59 }
 0x812   :  { %v5166_v56 = vmul.f32 1.442695, %v5145_v18  ;;  %v9916_v34 = vpop.eup %7316 }
 0x813   :  { %v5200_v24 = vsel %vm305_vm1, %v9916_v34, 0.0 }
 0x814   :  { %7318 = vpow2.f32 %v5166_v56 }
 0x817   :  { %5231 = vadd.xlane.f32.xlu2 %v5230_v35 }
 0x81a   :  { %v9920_v38 = vpop.eup %7318 }
 0x81b   :  { %v5203_v25 = vsel %vm305_vm1, %v9920_v38, 0.0 }
 0x81c   :  { %5201 = vadd.xlane.f32.xlu1 %v5200_v24  ;;  %v11010_v24 = vld [vmem:[#allocation26_spill] sm:$0xff] }
 0x824   :  { %5204 = vadd.xlane.f32.xlu1 %v5203_v25  ;;  %v11011_v25 = vld [vmem:[#allocation66_spill] sm:$0xff] }
 0x834   :  { %v9924_v32 = vpop.xlane.xlu1 %5207 }
 0x839   :  { %v9926_v8 = vpop.xlane.xlu2 %5222 }
 0x83c   :  { %v5118_v43 = vpop.xlane.xlu1 %5117 }
 0x83d   :  { %v5148_v12 = vsub.f32 %v9861_v54, %v5118_v43  ;;  %v11012_v43 = vld [vmem:[#allocation67_spill] sm:$0xff] }
 0x83f   :  { %v5172_v62 = vmul.f32 1.442695, %v5148_v12  ;;  %v9953_v12 = vpop.xlane.xlu0 %5132 }
 0x840   :  { %11013 = vst [vmem:[#allocation23_spill] sm:$0xff] %v9953_v12 }
 0x841   :  { %7320 = vpow2.f32 %v5172_v62  ;;  %v5097_v21 = vpop.xlane.xlu2 %5096  ;;  %v5150_v62 = vsub.f32 %v9788_v11, %v9879_v17 }
 0x842   :  { %v5141_v5 = vsub.f32 %v9867_v47, %v5097_v21 }
 0x844   :  { %v5158_v23 = vmul.f32 1.442695, %v5141_v5  ;;  %v5121_v40 = vpop.xlane.xlu1 %5120  ;;  %v5176_v5 = vmul.f32 1.442695, %v5150_v62 }
 0x845   :  { %v5149_v53 = vsub.f32 %v9869_v60, %v5121_v40  ;;  %v5155_v40 = vsub.f32 %v9793_v37, %v9885_v16 }
 0x846   :  { %7322 = vpow2.f32 %v5158_v23 }
 0x847   :  { %v9931_v45 = vpop.eup %7320  ;;  %v5174_v39 = vmul.f32 1.442695, %v5149_v53 }
 0x848   :  { %v5212_v19 = vsel %vm305_vm1, %v9931_v45, 0.0 }
 0x849   :  { %7324 = vpow2.f32 %v5174_v39  ;;  %5213 = vadd.xlane.f32.xlu2 %v5212_v19  ;;  %v9935_v59 = vpop.xlane.xlu2 %5129  ;;  %v5186_v39 = vmul.f32 1.442695, %v5155_v40 }
 0x84c   :  { %v9937_v54 = vpop.eup %7322 }
 0x84d   :  { %v5191_v47 = vsel %vm305_vm1, %v9937_v54, 0.0 }
 0x84e   :  { %5192 = vadd.xlane.f32.xlu0 %v5191_v47 }
 0x84f   :  { %v9941_v18 = vpop.eup %7324 }
 0x850   :  { %v5215_v60 = vsel %vm305_vm1, %v9941_v18, 0.0 }
 0x851   :  { %v7089_v56 = vpop.permute.xlu2 %7088  ;;  %5216 = vadd.xlane.f32.xlu1 %v5215_v60 }
 0x852   :  { %v7090_v35 = vunpack.i.l.bf16 %v7089_v56 }
 0x854   :  { %5755 = vmatpush.msra.mxu3 %v7090_v35 }
 0x85c   :  { %v9957_v21 = vpop.permute.xlu1 %7093 }
 0x861   :  { %3090 = vrot.lane.b32.xlu2 %v11010_v24, %s7550_s10 }
 0x862   :  { %7083 = vrot.lane.b32.xlu0 %v11011_v25, %s7561_s29 }
 0x869   :  { %4575 = vrot.lane.b32.xlu2 %v9657_v14, %s7562_s30  ;;  %v9961_v14 = vpop.permute.xlu1 %7098 }
 0x86a   :  { %7103 = vrot.lane.b32.xlu1 %v11012_v43, %s7561_s29 }
 0x87f   :  { %v5190_v23 = vpop.xlane.xlu0 %5189 }
 0x880   :  { %7326 = vrcp.f32 %v5190_v23  ;;  %v5247_v35 = vand.u32 2147483648, %v5190_v23  ;;  %v5245_v17 = vand.u32 2147483647, %v5190_v23  ;;  %vm5241_vm3 = vweird.f32 %v5190_v23 }
 0x881   :  { %7328 = vpow2.f32 %v5176_v5 }
 0x882   :  { %7330 = vpow2.f32 %v5186_v39  ;;  %v5248_v37 = vor.u32 1.1754944e-38, %v5247_v35  ;;  %vm5246_vm5 = vcmp.eq.f32.partialorder %v5245_v17, 8.507059e+37  ;;  %v7091_v39 = vunpack.i.h.bf16 %v7089_v56 }
 0x886   :  { %v7327_v53 = vpop.eup %7326 }
 0x887   :  { %v5237_v19 = vmul.f32 %v7327_v53, %v5190_v23  ;;  %v9963_v47 = vpop.eup %7328  ;;  %vm5242_vm2 = vweird.f32 %v7327_v53 }
 0x888   :  { %v5218_v24 = vsel %vm305_vm1, %v9963_v47, 0.0  ;;  %vm5243_vm4 = vmor %vm5241_vm3, %vm5242_vm2  ;;  %v9967_v62 = vpop.eup %7330 }
 0x889   :  { %v5238_v60 = vsub.f32 1.0, %v5237_v19 }
 0x88b   :  { %v5239_v11 = vmul.f32 %v7327_v53, %v5238_v60  ;;  %v5233_v60 = vsel %vm305_vm1, %v9967_v62, 0.0 }
 0x88c   :  { %5219 = vadd.xlane.f32.xlu0 %v5218_v24 }
 0x88d   :  { %v5240_v25 = vadd.f32 %v7327_v53, %v5239_v11 }
 0x88f   :  { %v5244_v16 = vsel %vm5243_vm4, %v7327_v53, %v5240_v25  ;;  %v5202_v43 = vpop.xlane.xlu1 %5201 }
 0x890   :  { %v5249_v5 = vsel %vm5246_vm5, %v5248_v37, %v5244_v16  ;;  %7332 = vrcp.f32 %v5202_v43  ;;  %v5307_v25 = vand.u32 2147483648, %v5202_v43  ;;  %v5305_v16 = vand.u32 2147483647, %v5202_v43 }
 0x891   :  { %v5250_v40 = vmul.f32 %v9906_v13, %v5249_v5  ;;  %7334 = vrcp.f32 %v9881_v42  ;;  %vm5301_vm7 = vweird.f32 %v5202_v43  ;;  %vm5346_vm5 = vweird.f32 %v9898_v4 }
 0x892   :  { %vm5306_vm9 = vcmp.eq.f32.partialorder %v5305_v16, 8.507059e+37 }
 0x893   :  { %v5476_v19 = vsel %vm305_vm1, %v5250_v40, 0.0  ;;  %6890 = vmatmul.msk.f32.vlgmr.msrb.gmra.mxu2 %vm305_vm1, %v5250_v40 }
 0x894   :  { %v5477_v23 = vrot.slane %v5476_v19, 4  ;;  %5833 = vmatpush.msrb.mxu2 %v7091_v39  ;;  %5234 = vadd.xlane.f32.xlu1 %v5233_v60 }
 0x896   :  { %v7333_v53 = vpop.eup %7332  ;;  %v5478_v35 = vadd.f32 %v5477_v23, %v5476_v19  ;;  %v5308_v19 = vor.u32 1.1754944e-38, %v5307_v25 }
 0x897   :  { %v5297_v11 = vmul.f32 %v7333_v53, %v5202_v43  ;;  %v5205_v17 = vpop.xlane.xlu1 %5204  ;;  %vm5302_vm6 = vweird.f32 %v7333_v53  ;;  %v9975_v40 = vpop.eup %7334 }
 0x898   :  { %v5479_v24 = vrot.slane %v5478_v35, 2  ;;  %7336 = vrcp.f32 %v5205_v17  ;;  %vm5303_vm8 = vmor %vm5301_vm7, %vm5302_vm6  ;;  %v5320_v25 = vand.u32 2147483647, %v5205_v17  ;;  %vm5316_vm11 = vweird.f32 %v5205_v17 }
 0x899   :  { %v5298_v13 = vsub.f32 1.0, %v5297_v11  ;;  %v5267_v11 = vmul.f32 %v9975_v40, %v9881_v42  ;;  %7338 = vrcp.f32 %v9898_v4  ;;  %vm5272_vm14 = vweird.f32 %v9975_v40 }
 0x89a   :  { %v5480_v56 = vadd.f32 %v5479_v24, %v5478_v35  ;;  %vm5321_vm13 = vcmp.eq.f32.partialorder %v5320_v25, 8.507059e+37  ;;  %7340 = vrcp.f32 %v9924_v32  ;;  %v5275_v25 = vand.u32 2147483647, %v9881_v42  ;;  %vm5273_vm2 = vmor %vm5271_vm15, %vm5272_vm14 }
 0x89b   :  { %v5299_v37 = vmul.f32 %v7333_v53, %v5298_v13  ;;  %v7101_v13 = vunpack.i.h.bf16 %v9961_v14  ;;  %7342 = vrcp.f32 %v9926_v8 }
 0x89c   :  { %v5481_v5 = vrot.slane %v5480_v56, 1  ;;  %vm5276_vm3 = vcmp.eq.f32.partialorder %v5275_v25, 8.507059e+37 }
 0x89d   :  { %v5300_v51 = vadd.f32 %v7333_v53, %v5299_v37 }
 0x89e   :  { %v7337_v39 = vpop.eup %7336  ;;  %v5482_v60 = vadd.f32 %v5481_v5, %v5480_v56 }
 0x89f   :  { %v5304_v23 = vsel %vm5303_vm8, %v7333_v53, %v5300_v51  ;;  %v5312_v12 = vmul.f32 %v7337_v39, %v5205_v17  ;;  %v5322_v51 = vand.u32 2147483648, %v5205_v17  ;;  %vm5317_vm10 = vweird.f32 %v7337_v39 }
 0x8a0   :  { %v5309_v20 = vsel %vm5306_vm9, %v5308_v19, %v5304_v23  ;;  %5968 = vrot.lane.b32.xlu0 %v7866_v0, %s7561_s29  ;;  %v9980_v35 = vadd.f32 %v5482_v60, %v9667_v28  ;;  %v5268_v28 = vsub.f32 1.0, %v5267_v11  ;;  %vm5318_vm12 = vmor %vm5316_vm11, %vm5317_vm10  ;;  %vm5331_vm9 = vweird.f32 %v9924_v32 }
 0x8a1   :  { %v5310_v24 = vmul.f32 %v9916_v34, %v5309_v20  ;;  %v5313_v43 = vsub.f32 1.0, %v5312_v12  ;;  %v5323_v20 = vor.u32 1.1754944e-38, %v5322_v51  ;;  %v7339_v12 = vpop.eup %7338  ;;  %v11014_v51 = vld [vmem:[#allocation55_spill] sm:$0xff]  ;;  %vm3138_vm11 = vcmask 130112  }
 0x8a2   :  { %v5269_v19 = vmul.f32 %v9975_v40, %v5268_v28  ;;  %v5342_v17 = vmul.f32 %v7339_v12, %v9898_v4  ;;  %vm5347_vm4 = vweird.f32 %v7339_v12 }
 0x8a3   :  { %v5504_v53 = vsel %vm305_vm1, %v5310_v24, 0.0  ;;  %v5314_v56 = vmul.f32 %v7337_v39, %v5313_v43  ;;  %6894 = vmatmul.msk.f32.vlgmr.msra.gmra.mxu2 %vm305_vm1, %v5310_v24  ;;  %vm5348_vm6 = vmor %vm5346_vm5, %vm5347_vm4  ;;  %vm5406_vm4 = vweird.f32 %v9926_v8 }
 0x8a4   :  { %v5505_v0 = vrot.slane %v5504_v53, 4  ;;  %5937 = vmatpush.msra.mxu2 %v7101_v13  ;;  %v5270_v13 = vadd.f32 %v9975_v40, %v5269_v19 }
 0x8a5   :  { %v5315_v37 = vadd.f32 %v7337_v39, %v5314_v56 }
 0x8a6   :  { %v5506_v16 = vadd.f32 %v5505_v0, %v5504_v53  ;;  %v5277_v53 = vand.u32 2147483648, %v9881_v42  ;;  %v5343_v0 = vsub.f32 1.0, %v5342_v17 }
 0x8a7   :  { %v5319_v34 = vsel %vm5318_vm12, %v7337_v39, %v5315_v37 }
 0x8a8   :  { %v5507_v5 = vrot.slane %v5506_v16, 2  ;;  %v5324_v60 = vsel %vm5321_vm13, %v5323_v20, %v5319_v34  ;;  %5994 = vrot.lane.b32.xlu0 %v10970_v50, %s7561_s29  ;;  %v7341_v50 = vpop.eup %7340  ;;  %v5278_v34 = vor.u32 1.1754944e-38, %v5277_v53 }
 0x8a9   :  { %v9994_v23 = vmul.f32 %v9920_v38, %v5324_v60  ;;  %v5327_v20 = vmul.f32 %v7341_v50, %v9924_v32  ;;  %v5344_v60 = vmul.f32 %v7339_v12, %v5343_v0  ;;  %vm5332_vm8 = vweird.f32 %v7341_v50 }
 0x8aa   :  { %v5508_v11 = vadd.f32 %v5507_v5, %v5506_v16  ;;  %v5274_v16 = vsel %vm5273_vm2, %v9975_v40, %v5270_v13  ;;  %v5352_v40 = vand.u32 2147483648, %v9898_v4  ;;  %v5350_v13 = vand.u32 2147483647, %v9898_v4  ;;  %vm5333_vm10 = vmor %vm5331_vm9, %vm5332_vm8 }
 0x8ab   :  { %v5511_v39 = vsel %vm305_vm1, %v9994_v23, 0.0  ;;  %v5279_v19 = vsel %vm5276_vm3, %v5278_v34, %v5274_v16  ;;  %v5328_v17 = vsub.f32 1.0, %v5327_v20  ;;  %v5337_v0 = vand.u32 2147483648, %v9924_v32  ;;  %v10041_v20 = vpop.eup %7342 }
 0x8ac   :  { %v5512_v24 = vrot.slane %v5511_v39, 4  ;;  %v5509_v43 = vrot.slane %v5508_v11, 1  ;;  %v5353_v53 = vor.u32 1.1754944e-38, %v5352_v40  ;;  %vm5351_vm7 = vcmp.eq.f32.partialorder %v5350_v13, 8.507059e+37 }
 0x8ad   :  { %3112 = vrot.lane.b32.xlu1 %v11014_v51, %s7550_s10  ;;  %v5329_v51 = vmul.f32 %v7341_v50, %v5328_v17  ;;  %v5335_v4 = vand.u32 2147483647, %v9924_v32  ;;  %vm5407_vm9 = vweird.f32 %v10041_v20 }
 0x8ae   :  { %v5513_v38 = vadd.f32 %v5512_v24, %v5511_v39  ;;  %v5510_v56 = vadd.f32 %v5509_v43, %v5508_v11  ;;  %v10013_v11 = vpop.xlane.xlu2 %5231  ;;  %v5345_v39 = vadd.f32 %v7339_v12, %v5344_v60  ;;  %v11015_v24 = vld [vmem:[#allocation50_spill] sm:$0xff] }
 0x8af   :  { %vm5336_vm12 = vcmp.eq.f32.partialorder %v5335_v4, 8.507059e+37 }
 0x8b0   :  { %4563 = vrot.lane.b32.xlu0 %v9807_v33, %s7562_s30  ;;  %v5514_v28 = vrot.slane %v5513_v38, 2  ;;  %v10009_v37 = vadd.f32 %v5510_v56, %v9715_v58  ;;  %v10018_v58 = vmul.f32 %v9809_v52, %v5279_v19  ;;  %v5349_v52 = vsel %vm5348_vm6, %v7339_v12, %v5345_v39 }
 0x8b1   :  { %v5330_v56 = vadd.f32 %v7341_v50, %v5329_v51  ;;  %v5354_v25 = vsel %vm5351_vm7, %v5353_v53, %v5349_v52 }
 0x8b2   :  { %v5515_v5 = vadd.f32 %v5514_v28, %v5513_v38  ;;  %v10037_v12 = vmul.f32 %v9833_v61, %v5354_v25 }
 0x8b3   :  { %v5334_v28 = vsel %vm5333_vm10, %v7341_v50, %v5330_v56  ;;  %v5402_v50 = vmul.f32 %v10041_v20, %v9926_v8 }
 0x8b4   :  { %v5516_v42 = vrot.slane %v5515_v5, 1 }
 0x8b5   :  { %4565 = vrot.lane.b32.xlu1 %v9798_v15, %s7562_s30  ;;  %v5490_v15 = vsel %vm305_vm1, %v10018_v58, 0.0  ;;  %v5403_v56 = vsub.f32 1.0, %v5402_v50 }
 0x8b6   :  { %v5517_v33 = vadd.f32 %v5516_v42, %v5515_v5  ;;  %v5338_v5 = vor.u32 1.1754944e-38, %v5337_v0 }
 0x8b7   :  { %v5404_v50 = vmul.f32 %v10041_v20, %v5403_v56  ;;  %v5412_v56 = vand.u32 2147483648, %v9926_v8 }
 0x8b8   :  { %3102 = vrot.lane.b32.xlu0 %v11015_v24, %s7550_s10  ;;  %v10024_v43 = vadd.f32 %v5517_v33, %v9662_v1  ;;  %v5491_v1 = vrot.slane %v5490_v15, 4  ;;  %v5339_v32 = vsel %vm5336_vm12, %v5338_v5, %v5334_v28 }
 0x8b9   :  { %v10053_v39 = vmul.f32 %v9855_v46, %v5339_v32 }
 0x8ba   :  { %v5492_v34 = vadd.f32 %v5491_v1, %v5490_v15 }
 0x8bb   :  { %v5518_v0 = vsel %vm305_vm1, %v10053_v39, 0.0 }
 0x8bc   :  { %v5214_v38 = vpop.xlane.xlu2 %5213  ;;  %v5493_v61 = vrot.slane %v5492_v34, 2 }
 0x8bd   :  { %7344 = vrcp.f32 %v5214_v38  ;;  %v5367_v40 = vand.u32 2147483648, %v5214_v38  ;;  %v5365_v51 = vand.u32 2147483647, %v5214_v38  ;;  %vm5361_vm14 = vweird.f32 %v5214_v38 }
 0x8be   :  { %v10056_v53 = vadd.f32 %v5493_v61, %v5492_v34  ;;  %v5519_v61 = vrot.slane %v5518_v0, 4 }
 0x8bf   :  { %v5368_v46 = vor.u32 1.1754944e-38, %v5367_v40  ;;  %vm5366_vm2 = vcmp.eq.f32.partialorder %v5365_v51, 8.507059e+37 }
 0x8c0   :  { %4585 = vrot.lane.b32.xlu0 %v9635_v29, %s7562_s30  ;;  %v5525_v29 = vsel %vm305_vm1, %v10037_v12, 0.0 }
 0x8c1   :  { %v10039_v16 = vpop.xlane.xlu0 %5192  ;;  %v5526_v15 = vrot.slane %v5525_v29, 4 }
 0x8c2   :  { %7346 = vrcp.f32 %v10039_v16  ;;  %v5262_v28 = vand.u32 2147483648, %v10039_v16  ;;  %vm5256_vm5 = vweird.f32 %v10039_v16 }
 0x8c3   :  { %v7345_v60 = vpop.eup %7344 }
 0x8c4   :  { %v5357_v19 = vmul.f32 %v7345_v60, %v5214_v38  ;;  %v3091_v42 = vpop.permute.xlu2 %3090  ;;  %v10044_v17 = vpop.xlane.xlu1 %5216  ;;  %vm5362_vm13 = vweird.f32 %v7345_v60  ;;  %v5260_v38 = vand.u32 2147483647, %v10039_v16 }
 0x8c5   :  { %3139 = vst.msk [vmem:[#allocation2] sm:$0xff] %vm3138_vm11, %v3091_v42  ;;  %7348 = vrcp.f32 %v10044_v17  ;;  %vm5363_vm15 = vmor %vm5361_vm14, %vm5362_vm13  ;;  %vm5376_vm10 = vweird.f32 %v10044_v17 }
 0x8c6   :  { %v5358_v33 = vsub.f32 1.0, %v5357_v19  ;;  %v10062_v19 = vadd.f32 %v5526_v15, %v5525_v29  ;;  %v5382_v29 = vand.u32 2147483648, %v10044_v17  ;;  %vm5261_vm8 = vcmp.eq.f32.partialorder %v5260_v38, 8.507059e+37  ;;  %vm10087_vm14 = vmor %vm5406_vm4, %vm5407_vm9 }
 0x8c7   :  { %vm6274_vm4 = vcmask 1043459   ;;  %7350 = vrcp.f32 %v10013_v11 }
 0x8c8   :  { %v7347_v24 = vpop.eup %7346  ;;  %v5359_v13 = vmul.f32 %v7345_v60, %v5358_v33 }
 0x8c9   :  { %v5252_v52 = vmul.f32 %v7347_v24, %v10039_v16  ;;  %vm5257_vm3 = vweird.f32 %v7347_v24 }
 0x8ca   :  { %v5360_v1 = vadd.f32 %v7345_v60, %v5359_v13  ;;  %vm5258_vm6 = vmor %vm5256_vm5, %vm5257_vm3  ;;  %vm6272_vm3 = vcmask 1042434   ;;  %vm6276_vm5 = vcmask 1044484  }
 0x8cb   :  { %v7349_v25 = vpop.eup %7348  ;;  %v5253_v4 = vsub.f32 1.0, %v5252_v52  ;;  %v5380_v52 = vand.u32 2147483647, %v10044_v17 }
 0x8cc   :  { %v5364_v5 = vsel %vm5363_vm15, %v7345_v60, %v5360_v1  ;;  %v5372_v32 = vmul.f32 %v7349_v25, %v10044_v17  ;;  %v5263_v60 = vor.u32 1.1754944e-38, %v5262_v28  ;;  %vm5377_vm7 = vweird.f32 %v7349_v25 }
 0x8cd   :  { %v5369_v34 = vsel %vm5366_vm2, %v5368_v46, %v5364_v5  ;;  %v5254_v42 = vmul.f32 %v7347_v24, %v5253_v4  ;;  %vm5378_vm12 = vmor %vm5376_vm10, %vm5377_vm7  ;;  %v5383_v5 = vor.u32 1.1754944e-38, %v5382_v29  ;;  %vm5381_vm13 = vcmp.eq.f32.partialorder %v5380_v52, 8.507059e+37 }
 0x8ce   :  { %v5370_v33 = vmul.f32 %v9931_v45, %v5369_v34  ;;  %v5373_v40 = vsub.f32 1.0, %v5372_v32  ;;  %v5520_v32 = vadd.f32 %v5519_v61, %v5518_v0  ;;  %v5405_v34 = vadd.f32 %v10041_v20, %v5404_v50 }
 0x8cf   :  { %v5255_v13 = vadd.f32 %v7347_v24, %v5254_v42  ;;  %v7100_v42 = vunpack.i.l.bf16 %v9961_v14  ;;  %v5410_v17 = vand.u32 2147483647, %v9926_v8  ;;  %vm10694_vm2 = vcmask 1041409  }
 0x8d0   :  { %v5532_v51 = vsel %vm305_vm1, %v5370_v33, 0.0  ;;  %v5374_v15 = vmul.f32 %v7349_v25, %v5373_v40  ;;  %6898 = vmatmul.msk.f32.vlgmr.msrb.gmra.mxu2 %vm305_vm1, %v5370_v33  ;;  %v5521_v50 = vrot.slane %v5520_v32, 2  ;;  %vm6280_vm7 = vcmask 1046534  }
 0x8d1   :  { %v5533_v1 = vrot.slane %v5532_v51, 4  ;;  %v5259_v45 = vsel %vm5258_vm6, %v7347_v24, %v5255_v13  ;;  %vm5411_vm15 = vcmp.eq.f32.partialorder %v5410_v17, 8.507059e+37  ;;  %vm6278_vm6 = vcmask 1045509  }
 0x8d2   :  { %v5264_v16 = vsel %vm5261_vm8, %v5263_v60, %v5259_v45  ;;  %v5375_v46 = vadd.f32 %v7349_v25, %v5374_v15  ;;  %v7095_v15 = vunpack.i.l.bf16 %v9957_v21  ;;  %vm10695_vm8 = vcmask 1047559  }
 0x8d3   :  { %v5534_v4 = vadd.f32 %v5533_v1, %v5532_v51  ;;  %v5265_v28 = vmul.f32 %v9937_v54, %v5264_v16  ;;  %v5528_v51 = vrot.slane %v10062_v19, 2  ;;  %v5413_v1 = vor.u32 1.1754944e-38, %v5412_v56 }
 0x8d4   :  { %v5379_v33 = vsel %vm5378_vm12, %v7349_v25, %v5375_v46  ;;  %v7084_v24 = vpop.permute.xlu0 %7083  ;;  %v7096_v25 = vunpack.i.h.bf16 %v9957_v21  ;;  %v5495_v46 = vrot.slane %v10056_v53, 1 }
 0x8d5   :  { %v5535_v38 = vrot.slane %v5534_v4, 2  ;;  %v5483_v40 = vsel %vm305_vm1, %v5265_v28, 0.0  ;;  %v5384_v13 = vsel %vm5381_vm13, %v5383_v5, %v5379_v33  ;;  %v7086_v60 = vunpack.i.h.bf16 %v7084_v24  ;;  %6891 = vmatmul.msk.f32.vlgmr.msrb.gmra.mxu3 %vm305_vm1, %v5265_v28 }
 0x8d6   :  { %v5484_v54 = vrot.slane %v5483_v40, 4  ;;  %v5385_v29 = vmul.f32 %v9941_v18, %v5384_v13  ;;  %v7085_v0 = vunpack.i.l.bf16 %v7084_v24  ;;  %5859 = vmatpush.msrb.mxu3 %v7100_v42  ;;  %v5409_v18 = vsel %vm10087_vm14, %v10041_v20, %v5405_v34 }
 0x8d7   :  { %v5536_v61 = vadd.f32 %v5535_v38, %v5534_v4  ;;  %5807 = vmatpush.msrb.mxu1 %v7086_v60  ;;  %v5414_v21 = vsel %vm5411_vm15, %v5413_v1, %v5409_v18  ;;  %v5522_v5 = vadd.f32 %v5521_v50, %v5520_v32  ;;  %v5496_v13 = vadd.f32 %v5495_v46, %v10056_v53 }
 0x8d8   :  { %v5485_v52 = vadd.f32 %v5484_v54, %v5483_v40  ;;  %v5539_v8 = vsel %vm305_vm1, %v5385_v29, 0.0  ;;  %5677 = vmatpush.msrb.mxu0 %v7085_v0  ;;  %6897 = vmatmul.msk.f32.vlgmr.msrb.gmra.mxu1 %vm305_vm1, %v10037_v12  ;;  %v5529_v12 = vadd.f32 %v5528_v51, %v10062_v19  ;;  %v5415_v38 = vmul.f32 %v9859_v27, %v5414_v21 }
 0x8d9   :  { %v5537_v45 = vrot.slane %v5536_v61, 1  ;;  %v5540_v16 = vrot.slane %v5539_v8, 4  ;;  %6892 = vmatmul.msk.f32.vlgmr.msrb.gmra.mxu0 %vm305_vm1, %v10018_v58  ;;  %5911 = vmatpush.msra.mxu1 %v7096_v25  ;;  %v5523_v32 = vrot.slane %v5522_v5, 1  ;;  %v5590_v53 = vadd.f32 %v5496_v13, %v9568_v55 }
 0x8da   :  { %v5486_v20 = vrot.slane %v5485_v52, 2  ;;  %5781 = vmatpush.msra.mxu0 %v7095_v15  ;;  %v5530_v19 = vrot.slane %v5529_v12, 1  ;;  %v4080_v18 = vsel %vm305_vm1, %v9517_v41, 0.0  ;;  %vm5451_vm15 = vweird.f32 %v10013_v11 }
 0x8db   :  { %v5538_v4 = vadd.f32 %v5537_v45, %v5536_v61  ;;  %v5541_v28 = vadd.f32 %v5540_v16, %v5539_v8 }
 0x8dc   :  { %v5487_v34 = vadd.f32 %v5486_v20, %v5485_v52  ;;  %v7104_v42 = vpop.permute.xlu1 %7103  ;;  %v5531_v0 = vadd.f32 %v5530_v19, %v5529_v12  ;;  %v5553_v52 = vsel %vm305_vm1, %v5415_v38, 0.0 }
 0x8dd   :  { %v5542_v56 = vrot.slane %v5541_v28, 2  ;;  %v7106_v33 = vunpack.i.h.bf16 %v7104_v42  ;;  %v7105_v24 = vunpack.i.l.bf16 %v7104_v42  ;;  %6895 = vmatmul.msk.f32.vlgmr.msra.gmra.mxu3 %vm305_vm1, %v9994_v23  ;;  %v5596_v58 = vadd.f32 %v5538_v4, %v9731_v48 }
 0x8de   :  { %v5488_v40 = vrot.slane %v5487_v34, 1  ;;  %v5524_v23 = vadd.f32 %v5523_v32, %v5522_v5  ;;  %v5554_v45 = vrot.slane %v5553_v52, 4 }
 0x8df   :  { %v5543_v60 = vadd.f32 %v5542_v56, %v5541_v28  ;;  %5885 = vmatpush.msrb.mxu0 %v7106_v33  ;;  %5963 = vmatpush.msra.mxu3 %v7105_v24 }
 0x8e0   :  { %v5489_v17 = vadd.f32 %v5488_v40, %v5487_v34  ;;  %6901 = vmatmul.msk.f32.vlgmr.msra.gmra.mxu1 %vm305_vm1, %v5415_v38  ;;  %v5594_v61 = vadd.f32 %v5524_v23, %v9522_v57  ;;  %v7351_v57 = vpop.eup %7350  ;;  %v5555_v5 = vadd.f32 %v5554_v45, %v5553_v52 }
 0x8e1   :  { %v5544_v54 = vrot.slane %v5543_v60, 1  ;;  %6896 = vmatmul.msk.f32.vlgmr.msra.gmra.mxu0 %vm305_vm1, %v10053_v39  ;;  %vm5452_vm12 = vweird.f32 %v7351_v57 }
 0x8e2   :  { %v5589_v48 = vadd.f32 %v5489_v17, %v9646_v9  ;;  %v5556_v40 = vrot.slane %v5555_v5, 2 }
 0x8e3   :  { %v5545_v27 = vadd.f32 %v5544_v54, %v5543_v60  ;;  %v5455_v60 = vand.u32 2147483647, %v10013_v11 }
 0x8e4   :  { %v6271_v14 = vsel %vm10694_vm2, %v5589_v48, %v9980_v35 }
 0x8e5   :  { %6899 = vmatmul.msk.f32.vlgmr.msrb.gmra.mxu3 %vm305_vm1, %v5385_v29  ;;  %v6273_v25 = vsel %vm6272_vm3, %v5590_v53, %v6271_v14  ;;  %v5597_v39 = vadd.f32 %v5545_v27, %v9746_v2  ;;  %v5595_v29 = vadd.f32 %v5531_v0, %v9540_v49  ;;  %v4081_v49 = vrot.slane %v4080_v18, 4 }
 0x8e6   :  { %v6275_v9 = vsel %vm6274_vm4, %v9901_v26, %v6273_v25 }
 0x8e7   :  { %v6277_v55 = vsel %vm6276_vm5, %v10009_v37, %v6275_v9  ;;  %v10125_v35 = vsel %vm10694_vm2, %v5597_v39, %v5596_v58  ;;  %v5447_v37 = vmul.f32 %v7351_v57, %v10013_v11  ;;  %v4082_v46 = vadd.f32 %v4081_v49, %v4080_v18  ;;  %vm10141_vm2 = vmor %vm5451_vm15, %vm5452_vm12 }
 0x8e8   :  { %v6279_v50 = vsel %vm6278_vm6, %v10024_v43, %v6277_v55  ;;  %v5457_v58 = vand.u32 2147483648, %v10013_v11  ;;  %v5557_v11 = vadd.f32 %v5556_v40, %v5555_v5  ;;  %vm6084_vm15 = vcmask 261312  }
 0x8e9   :  { %v6281_v2 = vsel %vm6280_vm7, %v5594_v61, %v6279_v50  ;;  %v5448_v43 = vsub.f32 1.0, %v5447_v37  ;;  %v4083_v42 = vrot.slane %v4082_v46, 2 }
 0x8ea   :  { %v10132_v51 = vsel %vm10695_vm8, %v5595_v29, %v6281_v2  ;;  %v5458_v14 = vor.u32 1.1754944e-38, %v5457_v58  ;;  %v5558_v37 = vrot.slane %v5557_v11, 1 }
 0x8eb   :  { %v5449_v20 = vmul.f32 %v7351_v57, %v5448_v43  ;;  %v4084_v19 = vadd.f32 %v4083_v42, %v4082_v46  ;;  %v11020_v46 = vld [vmem:[#allocation68_spill] sm:$0xff] }
 0x8ed   :  { %v5450_v12 = vadd.f32 %v7351_v57, %v5449_v20  ;;  %v4085_v55 = vrot.slane %v4084_v19, 1 }
 0x8ef   :  { %v5454_v54 = vsel %vm10141_vm2, %v7351_v57, %v5450_v12  ;;  %v4086_v49 = vadd.f32 %v4085_v55, %v4084_v19  ;;  %v11026_v19 = vld [vmem:[#allocation70_spill] sm:$0xff] }
 0x8ff   :  { %v5220_v26 = vpop.xlane.xlu0 %5219 }
 0x900   :  { %7352 = vrcp.f32 %v5220_v26  ;;  %v5397_v21 = vand.u32 2147483648, %v5220_v26  ;;  %v5395_v28 = vand.u32 2147483647, %v5220_v26  ;;  %vm5391_vm10 = vweird.f32 %v5220_v26 }
 0x902   :  { %v5398_v56 = vor.u32 1.1754944e-38, %v5397_v21  ;;  %vm5396_vm14 = vcmp.eq.f32.partialorder %v5395_v28, 8.507059e+37 }
 0x906   :  { %v7353_v15 = vpop.eup %7352 }
 0x907   :  { %v5387_v8 = vmul.f32 %v7353_v15, %v5220_v26  ;;  %v5235_v1 = vpop.xlane.xlu1 %5234  ;;  %vm5392_vm9 = vweird.f32 %v7353_v15 }
 0x908   :  { %7354 = vrcp.f32 %v5235_v1  ;;  %vm5393_vm13 = vmor %vm5391_vm10, %vm5392_vm9  ;;  %v5472_v48 = vand.u32 2147483648, %v5235_v1  ;;  %v5470_v0 = vand.u32 2147483647, %v5235_v1  ;;  %vm5456_vm10 = vcmp.eq.f32.partialorder %v5455_v60, 8.507059e+37  ;;  %v11022_v60 = vld [vmem:[#allocation83_spill] sm:$0xff] }
 0x909   :  { %v5388_v16 = vsub.f32 1.0, %v5387_v8  ;;  %vm5466_vm12 = vweird.f32 %v5235_v1  ;;  %v5459_v39 = vsel %vm5456_vm10, %v5458_v14, %v5454_v54  ;;  %v11027_v54 = vld [vmem:[#allocation78_spill] sm:$0xff]  ;;  %v11029_v14 = vld [vmem:[#allocation71_spill] sm:$0xff] }
 0x90a   :  { %v5473_v61 = vor.u32 1.1754944e-38, %v5472_v48  ;;  %vm5471_vm2 = vcmp.eq.f32.partialorder %v5470_v0, 8.507059e+37  ;;  %v10152_v57 = vmul.f32 %v9912_v30, %v5459_v39 }
 0x90b   :  { %v5389_v4 = vmul.f32 %v7353_v15, %v5388_v16 }
 0x90d   :  { %v5390_v34 = vadd.f32 %v7353_v15, %v5389_v4 }
 0x90e   :  { %v7355_v41 = vpop.eup %7354 }
 0x90f   :  { %v5394_v33 = vsel %vm5393_vm13, %v7353_v15, %v5390_v34  ;;  %v5462_v24 = vmul.f32 %v7355_v41, %v5235_v1  ;;  %vm5467_vm9 = vweird.f32 %v7355_v41  ;;  %v5559_v1 = vadd.f32 %v5558_v37, %v5557_v11  ;;  %v11031_v11 = vld [vmem:[#allocation49_spill] sm:$0xff] }
 0x910   :  { %v5399_v38 = vsel %vm5396_vm14, %v5398_v56, %v5394_v33  ;;  %vm5468_vm13 = vmor %vm5466_vm12, %vm5467_vm9  ;;  %vm4611_vm14 = vcmask 195712  }
 0x911   :  { %v5400_v32 = vmul.f32 %v9963_v47, %v5399_v38  ;;  %v5463_v17 = vsub.f32 1.0, %v5462_v24  ;;  %v4576_v24 = vpop.permute.xlu2 %4575 }
 0x912   :  { %v5969_v27 = vpop.permute.xlu0 %5968 }
 0x913   :  { %v5546_v23 = vsel %vm305_vm1, %v5400_v32, 0.0  ;;  %v5464_v53 = vmul.f32 %v7355_v41, %v5463_v17  ;;  %6900 = vmatmul.msk.f32.vlgmr.msrb.gmra.mxu0 %vm305_vm1, %v5400_v32  ;;  %v11024_v32 = vld [vmem:[#allocation32_spill] sm:$0xff] }
 0x914   :  { %v5547_v25 = vrot.slane %v5546_v23, 4  ;;  %5989 = vmatpush.msra.mxu0 %v5969_v27 }
 0x915   :  { %v5465_v47 = vadd.f32 %v7355_v41, %v5464_v53  ;;  %v11028_v53 = vld [vmem:[#allocation43_spill] sm:$0xff] }
 0x916   :  { %v5548_v9 = vadd.f32 %v5547_v25, %v5546_v23  ;;  %v5152_v0 = vsub.f32 %v11028_v53, %v9935_v59  ;;  %v11030_v25 = vld [vmem:[#allocation23_spill] sm:$0xff]  ;;  %v11032_v59 = vld [vmem:[#allocation17_spill] sm:$0xff] }
 0x917   :  { %v5469_v29 = vsel %vm5468_vm13, %v7355_v41, %v5465_v47  ;;  %v5153_v47 = vsub.f32 %v11031_v11, %v11030_v25  ;;  %v5574_v11 = vsel %vm305_vm1, %v10152_v57, 0.0 }
 0x918   :  { %v5549_v50 = vrot.slane %v5548_v9, 2  ;;  %v5474_v2 = vsel %vm5471_vm2, %v5473_v61, %v5469_v29 }
 0x919   :  { %v5475_v26 = vmul.f32 %v9967_v62, %v5474_v2  ;;  %v4126_v62 = vadd.f32 %v4086_v49, %v11020_v46  ;;  %v5182_v39 = vmul.f32 1.442695, %v5153_v47 }
 0x91a   :  { %v5550_v18 = vadd.f32 %v5549_v50, %v5548_v9  ;;  %v5995_v15 = vpop.permute.xlu0 %5994 }
 0x91b   :  { %6904 = vmatmul.msk.f32.vlgmr.msra.gmra.mxu0 %vm305_vm1, %v10152_v57  ;;  %6015 = vmatpush.msrb.mxu1 %v5995_v15  ;;  %v5581_v52 = vsel %vm305_vm1, %v5475_v26, 0.0  ;;  %v5599_v4 = vadd.f32 %v5559_v1, %v4126_v62  ;;  %v11033_v15 = vld [vmem:[#allocation19_spill] sm:$0xff] }
 0x91c   :  { %v5551_v43 = vrot.slane %v5550_v18, 1  ;;  %6905 = vmatmul.msk.f32.vlgmr.msrb.gmra.mxu1 %vm305_vm1, %v5475_v26  ;;  %v5582_v8 = vrot.slane %v5581_v52, 4 }
 0x91e   :  { %v5552_v45 = vadd.f32 %v5551_v43, %v5550_v18  ;;  %v5583_v30 = vadd.f32 %v5582_v8, %v5581_v52  ;;  %v11034_v8 = vld [vmem:[#allocation51_spill] sm:$0xff] }
 0x91f   :  { %v3113_v16 = vpop.permute.xlu1 %3112 }
 0x920   :  { %3150 = vst.msk [vmem:[#allocation2 + $0x58] sm:$0xff] %vm3138_vm11, %v3113_v16  ;;  %v5584_v20 = vrot.slane %v5583_v30, 2  ;;  %v5598_v21 = vadd.f32 %v5552_v45, %v9585_v44  ;;  %v11035_v16 = vld [vmem:[#allocation59_spill] sm:$0xff] }
 0x922   :  { %v4564_v28 = vpop.permute.xlu0 %4563  ;;  %v5585_v5 = vadd.f32 %v5584_v20, %v5583_v30  ;;  %v6285_v34 = vsel %vm6272_vm3, %v5598_v21, %v10125_v35  ;;  %v5705_v35 = vpop.f32.mrf.mxu1  ;;  %v11036_v21 = vld [vmem:[#allocation39_spill] sm:$0xff] }
 0x923   :  { %4612 = vst.msk [vmem:[#allocation2] sm:$0xff] %vm4611_vm14, %v4564_v28  ;;  %v10166_v41 = vsel %vm6274_vm4, %v5599_v4, %v6285_v34 }
 0x924   :  { %v5586_v42 = vrot.slane %v5585_v5, 1 }
 0x926   :  { %v5587_v12 = vadd.f32 %v5586_v42, %v5585_v5  ;;  %v11037_v5 = vld [vmem:[#allocation27_spill] sm:$0xff] }
 0x927   :  { %v4566_v2 = vpop.permute.xlu1 %4565 }
 0x928   :  { %v10169_v56 = vadd.f32 %v5587_v12, %v9552_v6  ;;  %v11021_v6 = vld [vmem:[#allocation69_spill] sm:$0xff]  ;;  %v11038_v12 = vld [vmem:[#allocation58_spill] sm:$0xff] }
 0x92a   :  { %v3103_v33 = vpop.permute.xlu0 %3102 }
 0x92b   :  { %3145 = vst.msk [vmem:[#allocation2 + $0x30] sm:$0xff] %vm3138_vm11, %v3103_v33 }
 0x92c   :  { %4618 = vst.msk [vmem:[#allocation2 + $0x30] sm:$0xff] %vm4611_vm14, %v4576_v24 }
 0x932   :  { %v4586_v44 = vpop.permute.xlu0 %4585 }
 0x933   :  { %4623 = vst.msk [vmem:[#allocation2 + $0x58] sm:$0xff] %vm4611_vm14, %v4586_v44  ;;  %v6120_v44 = vld [vmem:[#allocation9 + $0x18] sm:$0xff] }
 0x934   :  { %6185 = vmatpush.msrb.mxu0 %v6120_v44  ;;  %6926 = vmatpush.msrb.mxu2 %v6120_v44 }
 0x935   :  { %6927 = vmatpush.msrb.mxu3 %v6120_v44 }
 0x955   :  { %v5809_v58 = vpop.f32.mrf.mxu1 }
 0x956   :  { %v5679_v38 = vpop.f32.mrf.mxu0  ;;  %6050 = vrot.lane.b32.xlu1 %v5809_v58, %s7563_s8  ;;  %v11039_v58 = vld [vmem:[#allocation80_spill] sm:$0xff] }
 0x958   :  { %v5653_v17 = vpop.f32.mrf.mxu3 }
 0x95d   :  { %v5913_v40 = vpop.f32.mrf.mxu1 }
 0x95e   :  { %v5783_v13 = vpop.f32.mrf.mxu0  ;;  %4567 = vrot.lane.b32.xlu1 %v9650_v7, %s7562_s30  ;;  %6058 = vrot.lane.b32.xlu0 %v5913_v40, %s7563_s8  ;;  %v11023_v7 = vld [vmem:[#allocation74_spill] sm:$0xff] }
 0x95f   :  { %6048 = vrot.lane.b32.xlu2 %v5783_v13, %s7563_s8  ;;  %v6118_v13 = vld [vmem:[#allocation9 + $0x8] sm:$0xff] }
 0x966   :  { %6040 = vrot.lane.b32.xlu1 %v5679_v38, %s7563_s8  ;;  %3104 = vrot.lane.b32.xlu0 %v11021_v6, %s7550_s10  ;;  %v11040_v6 = vld [vmem:[#allocation76_spill] sm:$0xff] }
 0x967   :  { %3092 = vrot.lane.b32.xlu2 %v11022_v60, %s7550_s10 }
 0x96e   :  { %4569 = vrot.lane.b32.xlu1 %v9627_v3, %s7562_s30  ;;  %4577 = vrot.lane.b32.xlu0 %v9629_v63, %s7562_s30  ;;  %v11025_v3 = vld [vmem:[#allocation64_spill] sm:$0xff]  ;;  %v5627_v63 = vpop.f32.mrf.mxu2 }
 0x96f   :  { %3114 = vrot.lane.b32.xlu2 %v11023_v7, %s7550_s10  ;;  %v6117_v7 = vld [vmem:[#allocation9] sm:$0xff] }
 0x976   :  { %6042 = vrot.lane.b32.xlu1 %v5705_v35, %s7563_s8  ;;  %3106 = vrot.lane.b32.xlu0 %v11024_v32, %s7550_s10  ;;  %v6119_v35 = vld [vmem:[#allocation9 + $0x10] sm:$0xff] }
 0x977   :  { %4587 = vrot.lane.b32.xlu2 %v9831_v22, %s7562_s30  ;;  %v5731_v22 = vpop.f32.mrf.mxu2  ;;  %6186 = vmatpush.msrb.mxu0 %v6119_v35 }
 0x978   :  { %6928 = vmatpush.msrb.mxu2 %v6119_v35  ;;  %6929 = vmatpush.msrb.mxu3 %v6119_v35  ;;  %v11041_v35 = vld [vmem:[#allocation35_spill] sm:$0xff] }
 0x979   :  { %6187 = vmatpush.msrb.mxu0 %v6118_v13 }
 0x97a   :  { %6930 = vmatpush.msrb.mxu2 %v6118_v13  ;;  %6931 = vmatpush.msrb.mxu3 %v6118_v13 }
 0x97b   :  { %6188 = vmatpush.msrb.mxu0 %v6117_v7 }
 0x97c   :  { %6932 = vmatpush.msrb.mxu2 %v6117_v7  ;;  %6933 = vmatpush.msrb.mxu3 %v6117_v7 }
 0x97e   :  { %4571 = vrot.lane.b32.xlu1 %v9815_v10, %s7562_s30  ;;  %4579 = vrot.lane.b32.xlu0 %v9823_v31, %s7562_s30  ;;  %v10209_v31 = vpop.f32.mrf.mxu3 }
 0x97f   :  { %3094 = vrot.lane.b32.xlu2 %v11025_v3, %s7550_s10  ;;  %v5835_v48 = vpop.f32.mrf.mxu2 }
 0x986   :  { %6038 = vrot.lane.b32.xlu1 %v5653_v17, %s7563_s8  ;;  %3108 = vrot.lane.b32.xlu0 %v11026_v19, %s7550_s10  ;;  %v5861_v23 = vpop.f32.mrf.mxu3 }
 0x987   :  { %3116 = vrot.lane.b32.xlu2 %v11027_v54, %s7550_s10 }
 0x98e   :  { %4581 = vrot.lane.b32.xlu0 %v9821_v36, %s7562_s30  ;;  %6044 = vrot.lane.b32.xlu1 %v5731_v22, %s7563_s8  ;;  %v5180_v36 = vmul.f32 1.442695, %v5152_v0 }
 0x990   :  { %v5887_v10 = vpop.f32.mrf.mxu0  ;;  %7356 = vpow2.f32 %v5180_v36 }
 0x991   :  { %7358 = vpow2.f32 %v5182_v39 }
 0x996   :  { %6052 = vrot.lane.b32.xlu1 %v5835_v48, %s7563_s8  ;;  %v10222_v9 = vpop.eup %7356 }
 0x997   :  { %v5224_v61 = vsel %vm305_vm1, %v10222_v9, 0.0  ;;  %v10228_v55 = vpop.eup %7358 }
 0x998   :  { %v5991_v27 = vpop.f32.mrf.mxu0  ;;  %v5227_v29 = vsel %vm305_vm1, %v10228_v55, 0.0 }
 0x999   :  { %6064 = vrot.lane.b32.xlu0 %v5991_v27, %s7563_s8 }
 0x99e   :  { %6054 = vrot.lane.b32.xlu1 %v5861_v23, %s7563_s8 }
 0x9a1   :  { %3110 = vrot.lane.b32.xlu0 %v11029_v14, %s7550_s10 }
 0x9a6   :  { %6056 = vrot.lane.b32.xlu1 %v5887_v10, %s7563_s8 }
 0x9a9   :  { %6036 = vrot.lane.b32.xlu0 %v5627_v63, %s7563_s8 }
 0x9ae   :  { %4573 = vrot.lane.b32.xlu1 %v11032_v59, %s7562_s30 }
 0x9b0   :  { %5225 = vadd.xlane.f32.xlu2 %v5224_v61 }
 0x9b8   :  { %5228 = vadd.xlane.f32.xlu2 %v5227_v29 }
 0x9b9   :  { %v6049_v50 = vpop.permute.xlu2 %6048 }
 0x9ba   :  { %6091 = vst.msk [vmem:[#allocation2 + $0x30] sm:$0xff] %vm6084_vm15, %v6049_v50 }
 0x9c1   :  { %v3093_v26 = vpop.permute.xlu2 %3092 }
 0x9c2   :  { %3140 = vst.msk [vmem:[#allocation2 + $0x8] sm:$0xff] %vm3138_vm11, %v3093_v26 }
 0x9c3   :  { %4613 = vst.msk [vmem:[#allocation2 + $0x8] sm:$0xff] %vm4611_vm14, %v4566_v2 }
 0x9c8   :  { %v6051_v37 = vpop.permute.xlu1 %6050 }
 0x9c9   :  { %v3115_v18 = vpop.permute.xlu2 %3114 }
 0x9ca   :  { %3151 = vst.msk [vmem:[#allocation2 + $0x60] sm:$0xff] %vm3138_vm11, %v3115_v18 }
 0x9d0   :  { %4589 = vrot.lane.b32.xlu2 %v11033_v15, %s7562_s30  ;;  %v4568_v49 = vpop.permute.xlu1 %4567  ;;  %v6059_v52 = vpop.permute.xlu0 %6058 }
 0x9d1   :  { %v4588_v43 = vpop.permute.xlu2 %4587  ;;  %6096 = vst.msk [vmem:[#allocation2 + $0x58] sm:$0xff] %vm6084_vm15, %v6059_v52 }
 0x9d2   :  { %4624 = vst.msk [vmem:[#allocation2 + $0x60] sm:$0xff] %vm4611_vm14, %v4588_v43 }
 0x9d8   :  { %3096 = vrot.lane.b32.xlu2 %v11034_v8, %s7550_s10  ;;  %v6041_v1 = vpop.permute.xlu1 %6040  ;;  %v3105_v45 = vpop.permute.xlu0 %3104 }
 0x9d9   :  { %v3095_v30 = vpop.permute.xlu2 %3094  ;;  %3146 = vst.msk [vmem:[#allocation2 + $0x38] sm:$0xff] %vm3138_vm11, %v3105_v45 }
 0x9da   :  { %3141 = vst.msk [vmem:[#allocation2 + $0x10] sm:$0xff] %vm3138_vm11, %v3095_v30 }
 0x9db   :  { %4614 = vst.msk [vmem:[#allocation2 + $0x10] sm:$0xff] %vm4611_vm14, %v4568_v49 }
 0x9dc   :  { %6087 = vst.msk [vmem:[#allocation2 + $0x10] sm:$0xff] %vm6084_vm15, %v6041_v1 }
 0x9e0   :  { %3118 = vrot.lane.b32.xlu2 %v11035_v16, %s7550_s10  ;;  %v10248_v46 = vpop.permute.xlu1 %4569  ;;  %v4578_v62 = vpop.permute.xlu0 %4577 }
 0x9e1   :  { %v3117_v20 = vpop.permute.xlu2 %3116  ;;  %4619 = vst.msk [vmem:[#allocation2 + $0x38] sm:$0xff] %vm4611_vm14, %v4578_v62 }
 0x9e2   :  { %3152 = vst.msk [vmem:[#allocation2 + $0x68] sm:$0xff] %vm3138_vm11, %v3117_v20 }
 0x9e3   :  { %6092 = vst.msk [vmem:[#allocation2 + $0x38] sm:$0xff] %vm6084_vm15, %v6051_v37  ;;  %v6103_v29 = vld [vmem:[#allocation2 + $0x10] sm:$0xff] }
 0x9e8   :  { %4591 = vrot.lane.b32.xlu2 %v11036_v21, %s7562_s30  ;;  %v10255_v4 = vpop.permute.xlu1 %6042  ;;  %v3107_v28 = vpop.permute.xlu0 %3106  ;;  %v6107_v21 = vld [vmem:[#allocation2 + $0x30] sm:$0xff] }
 0x9e9   :  { %3147 = vst.msk [vmem:[#allocation2 + $0x40] sm:$0xff] %vm3138_vm11, %v3107_v28 }
 0x9ea   :  { %v6108_v13 = vld [vmem:[#allocation2 + $0x38] sm:$0xff] }
 0x9f0   :  { %3098 = vrot.lane.b32.xlu2 %v11037_v5, %s7550_s10  ;;  %v10260_v34 = vpop.permute.xlu1 %4571  ;;  %v4580_v42 = vpop.permute.xlu0 %4579 }
 0x9f1   :  { %4620 = vst.msk [vmem:[#allocation2 + $0x40] sm:$0xff] %vm4611_vm14, %v4580_v42 }
 0x9f8   :  { %3120 = vrot.lane.b32.xlu2 %v11038_v12, %s7550_s10  ;;  %v6039_v33 = vpop.permute.xlu1 %6038  ;;  %v3109_v24 = vpop.permute.xlu0 %3108 }
 0x9f9   :  { %6086 = vst.msk [vmem:[#allocation2 + $0x8] sm:$0xff] %vm6084_vm15, %v6039_v33 }
 0x9fa   :  { %3148 = vst.msk [vmem:[#allocation2 + $0x48] sm:$0xff] %vm3138_vm11, %v3109_v24 }
 0xa00   :  { %4593 = vrot.lane.b32.xlu2 %v11039_v58, %s7562_s30  ;;  %v4582_v38 = vpop.permute.xlu0 %4581  ;;  %v10269_v40 = vpop.permute.xlu1 %6044  ;;  %v6102_v27 = vld [vmem:[#allocation2 + $0x8] sm:$0xff] }
 0xa01   :  { %4621 = vst.msk [vmem:[#allocation2 + $0x48] sm:$0xff] %vm4611_vm14, %v4582_v38 }
 0xa08   :  { %3100 = vrot.lane.b32.xlu2 %v11040_v6, %s7550_s10  ;;  %v6053_v60 = vpop.permute.xlu1 %6052  ;;  %v6112_v6 = vld [vmem:[#allocation2 + $0x58] sm:$0xff] }
 0xa09   :  { %6093 = vst.msk [vmem:[#allocation2 + $0x40] sm:$0xff] %vm6084_vm15, %v6053_v60 }
 0xa0b   :  { %v10275_v32 = vpop.permute.xlu0 %6064 }
 0xa10   :  { %v6055_v3 = vpop.permute.xlu1 %6054 }
 0xa11   :  { %6094 = vst.msk [vmem:[#allocation2 + $0x48] sm:$0xff] %vm6084_vm15, %v6055_v3 }
 0xa13   :  { %v3111_v63 = vpop.permute.xlu0 %3110 }
 0xa14   :  { %3149 = vst.msk [vmem:[#allocation2 + $0x50] sm:$0xff] %vm3138_vm11, %v3111_v63 }
 0xa1b   :  { %v6037_v17 = vpop.permute.xlu0 %6036 }
 0xa1c   :  { %6085 = vst.msk [vmem:[#allocation2] sm:$0xff] %vm6084_vm15, %v6037_v17 }
 0xa23   :  { %v5226_v19 = vpop.xlane.xlu2 %5225  ;;  %v6101_v54 = vld [vmem:[#allocation2] sm:$0xff] }
 0xa24   :  { %7360 = vrcp.f32 %v5226_v19  ;;  %6906 = vmatmul.msk.f32.vlgmr.msrb.gmra.mxu0 %vm122_vm0, %v6101_v54  ;;  %v5427_v53 = vand.u32 2147483648, %v5226_v19  ;;  %v5425_v14 = vand.u32 2147483647, %v5226_v19  ;;  %vm5421_vm10 = vweird.f32 %v5226_v19  ;;  %v11042_v54 = vld [vmem:[#allocation45_spill] sm:$0xff] }
 0xa26   :  { %v5428_v47 = vor.u32 1.1754944e-38, %v5427_v53  ;;  %vm5426_vm13 = vcmp.eq.f32.partialorder %v5425_v14, 8.507059e+37 }
 0xa2a   :  { %v7361_v22 = vpop.eup %7360 }
 0xa2b   :  { %v5417_v10 = vmul.f32 %v7361_v22, %v5226_v19  ;;  %v5229_v48 = vpop.xlane.xlu2 %5228  ;;  %vm5422_vm9 = vweird.f32 %v7361_v22 }
 0xa2c   :  { %7362 = vrcp.f32 %v5229_v48  ;;  %6907 = vmatmul.msk.f32.gmra.mxu0 %vm122_vm0, %v6102_v27  ;;  %vm5423_vm12 = vmor %vm5421_vm10, %vm5422_vm9  ;;  %v5442_v37 = vand.u32 2147483648, %v5229_v48  ;;  %v5440_v15 = vand.u32 2147483647, %v5229_v48  ;;  %vm5436_vm9 = vweird.f32 %v5229_v48  ;;  %v6109_v27 = vld [vmem:[#allocation2 + $0x40] sm:$0xff] }
 0xa2d   :  { %v5418_v23 = vsub.f32 1.0, %v5417_v10  ;;  %v11043_v10 = vld [vmem:[#allocation73_spill] sm:$0xff] }
 0xa2e   :  { %6293 = vxpose.xlu2.b32.start [1/2] (short) (narrow) %v10132_v51, 8  ;;  %v5575_v51 = vrot.slane %v5574_v11, 4  ;;  %v5443_v1 = vor.u32 1.1754944e-38, %v5442_v37 }
 0xa2f   :  { %v5419_v0 = vmul.f32 %v7361_v22, %v5418_v23 }
 0xa30   :  { %v5576_v43 = vadd.f32 %v5575_v51, %v5574_v11 }
 0xa31   :  { %v5420_v36 = vadd.f32 %v7361_v22, %v5419_v0 }
 0xa32   :  { %v7363_v25 = vpop.eup %7362  ;;  %v5577_v20 = vrot.slane %v5576_v43, 2 }
 0xa33   :  { %v5424_v39 = vsel %vm5423_vm12, %v7361_v22, %v5420_v36  ;;  %v5432_v59 = vmul.f32 %v7363_v25, %v5229_v48  ;;  %v4590_v61 = vpop.permute.xlu2 %4589  ;;  %vm5437_vm2 = vweird.f32 %v7363_v25  ;;  %vm5441_vm12 = vcmp.eq.f32.partialorder %v5440_v15, 8.507059e+37 }
 0xa34   :  { %v5429_v50 = vsel %vm5426_vm13, %v5428_v47, %v5424_v39  ;;  %4625 = vst.msk [vmem:[#allocation2 + $0x68] sm:$0xff] %vm4611_vm14, %v4590_v61  ;;  %6908 = vmatmul.msk.f32.gmra.mxu0 %vm122_vm0, %v6103_v29  ;;  %vm5438_vm10 = vmor %vm5436_vm9, %vm5437_vm2  ;;  %v5578_v33 = vadd.f32 %v5577_v20, %v5576_v43 }
 0xa35   :  { %v5430_v2 = vmul.f32 %v10222_v9, %v5429_v50  ;;  %v5433_v26 = vsub.f32 1.0, %v5432_v59 }
 0xa36   :  { %v5579_v38 = vrot.slane %v5578_v33, 1 }
 0xa37   :  { %v5560_v18 = vsel %vm305_vm1, %v5430_v2, 0.0  ;;  %v5434_v57 = vmul.f32 %v7363_v25, %v5433_v26  ;;  %6902 = vmatmul.msk.f32.vlgmr.msra.gmra.mxu2 %vm305_vm1, %v5430_v2 }
 0xa38   :  { %v5561_v49 = vrot.slane %v5560_v18, 4  ;;  %v5580_v63 = vadd.f32 %v5579_v38, %v5578_v33 }
 0xa39   :  { %v5435_v52 = vadd.f32 %v7363_v25, %v5434_v57 }
 0xa3a   :  { %v5562_v8 = vadd.f32 %v5561_v49, %v5560_v18  ;;  %v5602_v48 = vadd.f32 %v5580_v63, %v11043_v10 }
 0xa3b   :  { %v5439_v45 = vsel %vm5438_vm10, %v7363_v25, %v5435_v52  ;;  %v3097_v30 = vpop.permute.xlu2 %3096 }
 0xa3c   :  { %v5563_v9 = vrot.slane %v5562_v8, 2  ;;  %v5444_v16 = vsel %vm5441_vm12, %v5443_v1, %v5439_v45  ;;  %3142 = vst.msk [vmem:[#allocation2 + $0x18] sm:$0xff] %vm3138_vm11, %v3097_v30  ;;  %v6017_v1 = vpop.f32.mrf.mxu1 }
 0xa3d   :  { %v5445_v62 = vmul.f32 %v10228_v55, %v5444_v16  ;;  %4615 = vst.msk [vmem:[#allocation2 + $0x18] sm:$0xff] %vm4611_vm14, %v10248_v46 }
 0xa3e   :  { %6088 = vst.msk [vmem:[#allocation2 + $0x18] sm:$0xff] %vm6084_vm15, %v10255_v4  ;;  %v5564_v28 = vadd.f32 %v5563_v9, %v5562_v8  ;;  %v11044_v8 = vld [vmem:[#allocation33_spill] sm:$0xff] }
 0xa3f   :  { %v5567_v5 = vsel %vm305_vm1, %v5445_v62, 0.0  ;;  %6903 = vmatmul.msk.f32.vlgmr.msra.gmra.mxu3 %vm305_vm1, %v5445_v62  ;;  %6912 = vmatmul.msk.f32.vlgmr.msrb.gmra.mxu2 %vm122_vm0, %v6107_v21  ;;  %v10391_v21 = vld [vmem:[#allocation11] sm:$0xff]  ;;  %vm6369_vm1 = vcmask 130048  }
 0xa40   :  { %v5568_v42 = vrot.slane %v5567_v5, 4  ;;  %v5565_v12 = vrot.slane %v5564_v28, 1 }
 0xa42   :  { %v5569_v24 = vadd.f32 %v5568_v42, %v5567_v5  ;;  %v5566_v55 = vadd.f32 %v5565_v12, %v5564_v28  ;;  %v6327_v28 = vsub.f32 1.0, %v10391_v21 }
 0xa43   :  { %v3119_v44 = vpop.permute.xlu2 %3118 }
 0xa44   :  { %3153 = vst.msk [vmem:[#allocation2 + $0x70] sm:$0xff] %vm3138_vm11, %v3119_v44  ;;  %v5570_v46 = vrot.slane %v5569_v24, 2  ;;  %v5600_v58 = vadd.f32 %v5566_v55, %v11041_v35  ;;  %v6328_v12 = vmul.f32 -1e+10, %v6327_v28 }
 0xa45   :  { %v6104_v4 = vld [vmem:[#allocation2 + $0x18] sm:$0xff] }
 0xa46   :  { %6909 = vmatmul.msk.f32.gmra.mxu0 %vm122_vm0, %v6104_v4  ;;  %v5571_v60 = vadd.f32 %v5570_v46, %v5569_v24  ;;  %v6287_v7 = vsel %vm6276_vm5, %v5600_v58, %v10166_v41 }
 0xa47   :  { %6913 = vmatmul.msk.f32.gmra.mxu2 %vm122_vm0, %v6108_v13  ;;  %6917 = vmatmul.msk.f32.vlgmr.msrb.gmra.mxu3 %vm122_vm0, %v6112_v6 }
 0xa48   :  { %v5572_v3 = vrot.slane %v5571_v60, 1 }
 0xa4a   :  { %v5573_v17 = vadd.f32 %v5572_v3, %v5571_v60 }
 0xa4b   :  { %v4592_v19 = vpop.permute.xlu2 %4591 }
 0xa4c   :  { %4626 = vst.msk [vmem:[#allocation2 + $0x70] sm:$0xff] %vm4611_vm14, %v4592_v19  ;;  %v5601_v22 = vadd.f32 %v5573_v17, %v11042_v54 }
 0xa4d   :  { %6099 = vst.msk [vmem:[#allocation2 + $0x70] sm:$0xff] %vm6084_vm15, %v10275_v32  ;;  %v6110_v32 = vld [vmem:[#allocation2 + $0x48] sm:$0xff] }
 0xa4e   :  { %v6288_v41 = vsel %vm6278_vm6, %v5601_v22, %v6287_v7 }
 0xa4f   :  { %6914 = vmatmul.msk.f32.gmra.mxu2 %vm122_vm0, %v6109_v27  ;;  %v6289_v23 = vsel %vm6280_vm7, %v5602_v48, %v6288_v41 }
 0xa50   :  { %v6290_v53 = vsel %vm10695_vm8, %v10169_v56, %v6289_v23  ;;  %v10324_v56 = vpop.permute.xlu1 %6056 }
 0xa51   :  { %6294 = vxpose.xlu2.b32.end [2/2] (short) (narrow) %v6290_v53, 8 }
 0xa53   :  { %v3099_v0 = vpop.permute.xlu2 %3098 }
 0xa54   :  { %3143 = vst.msk [vmem:[#allocation2 + $0x20] sm:$0xff] %vm3138_vm11, %v3099_v0 }
 0xa55   :  { %4616 = vst.msk [vmem:[#allocation2 + $0x20] sm:$0xff] %vm4611_vm14, %v10260_v34  ;;  %v10332_v34 = vld [vmem:[%s10610_s4] ss:$0 sm:$0xff] }
 0xa56   :  { %6089 = vst.msk [vmem:[#allocation2 + $0x20] sm:$0xff] %vm6084_vm15, %v10269_v40 }
 0xa57   :  { %6915 = vmatmul.msk.f32.gmra.mxu2 %vm122_vm0, %v6110_v32 }
 0xa58   :  { %v4574_v47 = vpop.permute.xlu1 %4573 }
 0xa5b   :  { %v3121_v14 = vpop.permute.xlu2 %3120 }
 0xa5c   :  { %3154 = vst.msk [vmem:[#allocation2 + $0x78] sm:$0xff] %vm3138_vm11, %v3121_v14 }
 0xa5d   :  { %v6105_v36 = vld [vmem:[#allocation2 + $0x20] sm:$0xff] }
 0xa5e   :  { %6910 = vmatmul.msk.f32.gmra.mxu0 %vm122_vm0, %v6105_v36 }
 0xa63   :  { %v4594_v25 = vpop.permute.xlu2 %4593 }
 0xa64   :  { %4627 = vst.msk [vmem:[#allocation2 + $0x78] sm:$0xff] %vm4611_vm14, %v4594_v25 }
 0xa6b   :  { %v3101_v11 = vpop.permute.xlu2 %3100 }
 0xa6c   :  { %3144 = vst.msk [vmem:[#allocation2 + $0x28] sm:$0xff] %vm3138_vm11, %v3101_v11 }
 0xa6d   :  { %4617 = vst.msk [vmem:[#allocation2 + $0x28] sm:$0xff] %vm4611_vm14, %v4574_v47 }
 0xaa1   :  { %v6190_v40 = vpop.f32.mrf.mxu0 }
 0xaa2   :  { %v6191_v39 = vadd.f32 %v10332_v34, %v6190_v40 }
 0xaa4   :  { %6238 = vst.msk [vmem:[%s10612_s6] sm:$0xff] %vm122_vm0, %v6191_v39 }
 0xaa9   :  { %v6193_v59 = vpop.f32.mrf.mxu0 }
 0xaaa   :  { %v6194_v61 = vadd.f32 %v10332_v34, %v6193_v59 }
 0xaac   :  { %6239 = vst.msk [vmem:[%s10612_s6 + $0x8] sm:$0xff] %vm122_vm0, %v6194_v61 }
 0xab1   :  { %v6196_v29 = vpop.f32.mrf.mxu0 }
 0xab2   :  { %v6197_v50 = vadd.f32 %v10332_v34, %v6196_v29 }
 0xab4   :  { %6240 = vst.msk [vmem:[%s10612_s6 + $0x10] sm:$0xff] %vm122_vm0, %v6197_v50 }
 0xaba   :  { %v5939_v51 = vpop.f32.mrf.mxu2 }
 0xabb   :  { %6060 = vrot.lane.b32.xlu0 %v5939_v51, %s7563_s8 }
 0xac2   :  { %v5965_v2 = vpop.f32.mrf.mxu3  ;;  %v6208_v26 = vpop.f32.mrf.mxu2 }
 0xac3   :  { %v6209_v37 = vadd.f32 %v10332_v34, %v6208_v26  ;;  %v6199_v18 = vpop.f32.mrf.mxu0  ;;  %6062 = vrot.lane.b32.xlu0 %v5965_v2, %s7563_s8 }
 0xac4   :  { %v6200_v57 = vadd.f32 %v10332_v34, %v6199_v18 }
 0xac5   :  { %6244 = vst.msk [vmem:[%s10612_s6 + $0x30] sm:$0xff] %vm122_vm0, %v6209_v37 }
 0xac6   :  { %6241 = vst.msk [vmem:[%s10612_s6 + $0x18] sm:$0xff] %vm122_vm0, %v6200_v57 }
 0xaca   :  { %v6211_v15 = vpop.f32.mrf.mxu2  ;;  %v6223_v49 = vpop.f32.mrf.mxu3 }
 0xacb   :  { %v6212_v52 = vadd.f32 %v10332_v34, %v6211_v15  ;;  %v6224_v43 = vadd.f32 %v10332_v34, %v6223_v49  ;;  %4583 = vrot.lane.b32.xlu0 %v11044_v8, %s7562_s30  ;;  %v6115_v15 = vld [vmem:[#allocation2 + $0x70] sm:$0xff] }
 0xacd   :  { %6245 = vst.msk [vmem:[%s10612_s6 + $0x38] sm:$0xff] %vm122_vm0, %v6212_v52 }
 0xace   :  { %6249 = vst.msk [vmem:[%s10612_s6 + $0x58] sm:$0xff] %vm122_vm0, %v6224_v43 }
 0xad2   :  { %v6214_v45 = vpop.f32.mrf.mxu2 }
 0xad3   :  { %v6215_v30 = vadd.f32 %v10332_v34, %v6214_v45  ;;  %6066 = vrot.lane.b32.xlu0 %v6017_v1, %s7563_s8 }
 0xad5   :  { %6246 = vst.msk [vmem:[%s10612_s6 + $0x40] sm:$0xff] %vm122_vm0, %v6215_v30 }
 0xada   :  { %v6217_v9 = vpop.f32.mrf.mxu2 }
 0xadb   :  { %v6218_v16 = vadd.f32 %v10332_v34, %v6217_v9  ;;  %v6202_v62 = vpop.f32.mrf.mxu0  ;;  %6046 = vrot.lane.b32.xlu0 %v10209_v31, %s7563_s8 }
 0xadc   :  { %v6203_v20 = vadd.f32 %v10332_v34, %v6202_v62 }
 0xadd   :  { %6247 = vst.msk [vmem:[%s10612_s6 + $0x48] sm:$0xff] %vm122_vm0, %v6218_v16 }
 0xade   :  { %6242 = vst.msk [vmem:[%s10612_s6 + $0x20] sm:$0xff] %vm122_vm0, %v6203_v20 }
 0xae2   :  { %v6309_v5 = vpop.trf.xlu2 }
 0xae3   :  { %v6325_v42 = vmul.f32 0.25, %v6309_v5 }
 0xae5   :  { %v6337_v31 = vperm.slane %v6325_v42, 0  ;;  %v6332_v33 = vrot.slane %v6325_v42, 3  ;;  %v6331_v24 = vrot.slane %v6325_v42, 2  ;;  %v6334_v38 = vrot.slane %v6325_v42, 5 }
 0xae6   :  { %v6336_v19 = vrot.slane %v6325_v42, 7  ;;  %v6330_v54 = vrot.slane %v6325_v42, 1  ;;  %v6333_v53 = vrot.slane %v6325_v42, 4  ;;  %v6335_v47 = vrot.slane %v6325_v42, 6 }
 0xae7   :  { %v6353_v55 = vmul.f32 %v6337_v31, %v10391_v21  ;;  %v6340_v44 = vperm.slane %v6332_v33, 0  ;;  %v6339_v46 = vperm.slane %v6331_v24, 0  ;;  %v6342_v3 = vperm.slane %v6334_v38, 0 }
 0xae8   :  { %v6344_v10 = vperm.slane %v6336_v19, 0  ;;  %v6338_v48 = vperm.slane %v6330_v54, 0  ;;  %v6341_v14 = vperm.slane %v6333_v53, 0  ;;  %v6343_v39 = vperm.slane %v6335_v47, 0 }
 0xae9   :  { %v10395_v35 = vadd.f32 %v6353_v55, %v6328_v12  ;;  %v6356_v58 = vmul.f32 %v6340_v44, %v10391_v21  ;;  %v6355_v4 = vmul.f32 %v6339_v46, %v10391_v21  ;;  %v6358_v17 = vmul.f32 %v6342_v3, %v10391_v21 }
 0xaea   :  { %v6360_v41 = vmul.f32 %v6344_v10, %v10391_v21  ;;  %v6354_v23 = vmul.f32 %v6338_v48, %v10391_v21  ;;  %v6357_v11 = vmul.f32 %v6341_v14, %v10391_v21  ;;  %v6359_v61 = vmul.f32 %v6343_v39, %v10391_v21 }
 0xaeb   :  { %v6370_v13 = vsel %vm6369_vm1, %v10395_v35, -inf  ;;  %v10401_v6 = vadd.f32 %v6356_v58, %v6328_v12  ;;  %v10405_v7 = vadd.f32 %v6355_v4, %v6328_v12  ;;  %v10410_v22 = vadd.f32 %v6358_v17, %v6328_v12 }
 0xaec   :  { %6371 = vmax.xlane.f32.xlu1 %v6370_v13  ;;  %v10416_v0 = vadd.f32 %v6360_v41, %v6328_v12  ;;  %v6362_v32 = vadd.f32 %v6354_v23, %v6328_v12  ;;  %v6365_v40 = vadd.f32 %v6357_v11, %v6328_v12  ;;  %v10424_v29 = vadd.f32 %v6359_v61, %v6328_v12 }
 0xaed   :  { %v6379_v60 = vsel %vm6369_vm1, %v10401_v6, -inf  ;;  %v6376_v63 = vsel %vm6369_vm1, %v10405_v7, -inf  ;;  %v6385_v27 = vsel %vm6369_vm1, %v10410_v22, -inf }
 0xaee   :  { %6380 = vmax.xlane.f32.xlu2 %v6379_v60  ;;  %v6391_v36 = vsel %vm6369_vm1, %v10416_v0, -inf  ;;  %v6373_v25 = vsel %vm6369_vm1, %v6362_v32, -inf  ;;  %v6382_v59 = vsel %vm6369_vm1, %v6365_v40, -inf  ;;  %v6388_v50 = vsel %vm6369_vm1, %v10424_v29, -inf }
 0xaf4   :  { %6377 = vmax.xlane.f32.xlu1 %v6376_v63 }
 0xafc   :  { %6386 = vmax.xlane.f32.xlu1 %v6385_v27 }
 0xb04   :  { %6392 = vmax.xlane.f32.xlu1 %v6391_v36 }
 0xb05   :  { %6374 = vmax.xlane.f32.xlu0 %v6373_v25 }
 0xb0d   :  { %6383 = vmax.xlane.f32.xlu0 %v6382_v59 }
 0xb15   :  { %6389 = vmax.xlane.f32.xlu0 %v6388_v50 }
 0xb2d   :  { %v6061_v51 = vpop.permute.xlu0 %6060 }
 0xb2e   :  { %6097 = vst.msk [vmem:[#allocation2 + $0x60] sm:$0xff] %vm6084_vm15, %v6061_v51 }
 0xb35   :  { %v6063_v2 = vpop.permute.xlu0 %6062  ;;  %v6113_v26 = vld [vmem:[#allocation2 + $0x60] sm:$0xff] }
 0xb36   :  { %6098 = vst.msk [vmem:[#allocation2 + $0x68] sm:$0xff] %vm6084_vm15, %v6063_v2  ;;  %6918 = vmatmul.msk.f32.gmra.mxu3 %vm122_vm0, %v6113_v26 }
 0xb3d   :  { %v4584_v37 = vpop.permute.xlu0 %4583  ;;  %v6114_v18 = vld [vmem:[#allocation2 + $0x68] sm:$0xff] }
 0xb3e   :  { %4622 = vst.msk [vmem:[#allocation2 + $0x50] sm:$0xff] %vm4611_vm14, %v4584_v37  ;;  %6919 = vmatmul.msk.f32.gmra.mxu3 %vm122_vm0, %v6114_v18 }
 0xb3f   :  { %6095 = vst.msk [vmem:[#allocation2 + $0x50] sm:$0xff] %vm6084_vm15, %v10324_v56 }
 0xb45   :  { %v6067_v57 = vpop.permute.xlu0 %6066 }
 0xb46   :  { %6100 = vst.msk [vmem:[#allocation2 + $0x78] sm:$0xff] %vm6084_vm15, %v6067_v57  ;;  %6920 = vmatmul.msk.f32.gmra.mxu3 %vm122_vm0, %v6115_v15  ;;  %v6111_v49 = vld [vmem:[#allocation2 + $0x50] sm:$0xff] }
 0xb47   :  { %6916 = vmatmul.msk.f32.gmra.mxu2 %vm122_vm0, %v6111_v49 }
 0xb4d   :  { %v6047_v52 = vpop.permute.xlu0 %6046  ;;  %v6116_v43 = vld [vmem:[#allocation2 + $0x78] sm:$0xff] }
 0xb4e   :  { %6090 = vst.msk [vmem:[#allocation2 + $0x28] sm:$0xff] %vm6084_vm15, %v6047_v52  ;;  %6921 = vmatmul.msk.f32.gmra.mxu3 %vm122_vm0, %v6116_v43 }
 0xb55   :  { %v6106_v8 = vld [vmem:[#allocation2 + $0x28] sm:$0xff] }
 0xb56   :  { %6911 = vmatmul.msk.f32.gmra.mxu0 %vm122_vm0, %v6106_v8 }
 0xb5f   :  { %v6372_v1 = vpop.xlane.xlu1 %6371 }
 0xb60   :  { %v6394_v56 = vsub.f32 %v10395_v35, %v6372_v1 }
 0xb61   :  { %v6381_v42 = vpop.xlane.xlu2 %6380 }
 0xb62   :  { %v6402_v45 = vmul.f32 1.442695, %v6394_v56  ;;  %v6397_v33 = vsub.f32 %v10401_v6, %v6381_v42 }
 0xb64   :  { %7364 = vpow2.f32 %v6402_v45  ;;  %v6408_v44 = vmul.f32 1.442695, %v6397_v33 }
 0xb67   :  { %v6378_v30 = vpop.xlane.xlu1 %6377 }
 0xb68   :  { %v6396_v9 = vsub.f32 %v10405_v7, %v6378_v30 }
 0xb6a   :  { %v10443_v16 = vpop.eup %7364  ;;  %v6406_v62 = vmul.f32 1.442695, %v6396_v9 }
 0xb6b   :  { %v6418_v20 = vsel %vm6369_vm1, %v10443_v16, 0.0 }
 0xb6c   :  { %7366 = vpow2.f32 %v6406_v62  ;;  %6419 = vadd.xlane.f32.xlu0 %v6418_v20 }
 0xb6f   :  { %v6387_v55 = vpop.xlane.xlu1 %6386 }
 0xb70   :  { %v6399_v4 = vsub.f32 %v10410_v22, %v6387_v55 }
 0xb72   :  { %v10447_v28 = vpop.eup %7366  ;;  %v6412_v60 = vmul.f32 1.442695, %v6399_v4 }
 0xb73   :  { %v6424_v5 = vsel %vm6369_vm1, %v10447_v28, 0.0 }
 0xb74   :  { %6425 = vadd.xlane.f32.xlu0 %v6424_v5 }
 0xb77   :  { %v6393_v7 = vpop.xlane.xlu1 %6392 }
 0xb78   :  { %v6375_v12 = vpop.xlane.xlu0 %6374  ;;  %v6401_v19 = vsub.f32 %v10416_v0, %v6393_v7 }
 0xb79   :  { %v6395_v31 = vsub.f32 %v6362_v32, %v6375_v12 }
 0xb7a   :  { %v6416_v48 = vmul.f32 1.442695, %v6401_v19 }
 0xb7b   :  { %v6404_v24 = vmul.f32 1.442695, %v6395_v31 }
 0xb7d   :  { %7368 = vpow2.f32 %v6404_v24 }
 0xb7e   :  { %7370 = vpow2.f32 %v6408_v44 }
 0xb80   :  { %v6384_v46 = vpop.xlane.xlu0 %6383 }
 0xb81   :  { %v6398_v35 = vsub.f32 %v6365_v40, %v6384_v46 }
 0xb83   :  { %v10452_v58 = vpop.eup %7368  ;;  %v6410_v38 = vmul.f32 1.442695, %v6398_v35 }
 0xb84   :  { %v6421_v13 = vsel %vm6369_vm1, %v10452_v58, 0.0  ;;  %v10457_v3 = vpop.eup %7370 }
 0xb85   :  { %7372 = vpow2.f32 %v6410_v38  ;;  %6422 = vadd.xlane.f32.xlu1 %v6421_v13  ;;  %v6427_v22 = vsel %vm6369_vm1, %v10457_v3, 0.0 }
 0xb86   :  { %7374 = vpow2.f32 %v6412_v60 }
 0xb88   :  { %v6390_v6 = vpop.xlane.xlu0 %6389 }
 0xb89   :  { %v6400_v63 = vsub.f32 %v10424_v29, %v6390_v6 }
 0xb8b   :  { %v10460_v17 = vpop.eup %7372  ;;  %v6414_v54 = vmul.f32 1.442695, %v6400_v63 }
 0xb8c   :  { %v6430_v10 = vsel %vm6369_vm1, %v10460_v17, 0.0  ;;  %v10467_v27 = vpop.eup %7374 }
 0xb8d   :  { %7376 = vpow2.f32 %v6414_v54  ;;  %6428 = vadd.xlane.f32.xlu1 %v6427_v22  ;;  %6431 = vadd.xlane.f32.xlu0 %v6430_v10  ;;  %v6433_v23 = vsel %vm6369_vm1, %v10467_v27, 0.0 }
 0xb8e   :  { %7378 = vpow2.f32 %v6416_v48 }
 0xb93   :  { %v10469_v41 = vpop.eup %7376 }
 0xb94   :  { %v6436_v53 = vsel %vm6369_vm1, %v10469_v41, 0.0  ;;  %v10475_v0 = vpop.eup %7378 }
 0xb95   :  { %6434 = vadd.xlane.f32.xlu1 %v6433_v23  ;;  %6437 = vadd.xlane.f32.xlu0 %v6436_v53  ;;  %v6439_v32 = vsel %vm6369_vm1, %v10475_v0, 0.0 }
 0xb9d   :  { %6440 = vadd.xlane.f32.xlu1 %v6439_v32 }
 0xbb9   :  { %v6226_v14 = vpop.f32.mrf.mxu3 }
 0xbba   :  { %v6227_v36 = vadd.f32 %v10332_v34, %v6226_v14 }
 0xbbc   :  { %6250 = vst.msk [vmem:[%s10612_s6 + $0x60] sm:$0xff] %vm122_vm0, %v6227_v36 }
 0xbc1   :  { %v6229_v25 = vpop.f32.mrf.mxu3 }
 0xbc2   :  { %v6230_v11 = vadd.f32 %v10332_v34, %v6229_v25 }
 0xbc4   :  { %6251 = vst.msk [vmem:[%s10612_s6 + $0x68] sm:$0xff] %vm122_vm0, %v6230_v11 }
 0xbc9   :  { %v6232_v47 = vpop.f32.mrf.mxu3 }
 0xbca   :  { %v6233_v40 = vadd.f32 %v10332_v34, %v6232_v47  ;;  %v6220_v39 = vpop.f32.mrf.mxu2 }
 0xbcb   :  { %v6221_v59 = vadd.f32 %v10332_v34, %v6220_v39 }
 0xbcc   :  { %6252 = vst.msk [vmem:[%s10612_s6 + $0x70] sm:$0xff] %vm122_vm0, %v6233_v40 }
 0xbcd   :  { %6248 = vst.msk [vmem:[%s10612_s6 + $0x50] sm:$0xff] %vm122_vm0, %v6221_v59 }
 0xbd1   :  { %v6235_v61 = vpop.f32.mrf.mxu3 }
 0xbd2   :  { %v6236_v29 = vadd.f32 %v10332_v34, %v6235_v61 }
 0xbd3   :  { %v6205_v50 = vpop.f32.mrf.mxu0 }
 0xbd4   :  { %6253 = vst.msk [vmem:[%s10612_s6 + $0x78] sm:$0xff] %vm122_vm0, %v6236_v29  ;;  %v6206_v51 = vadd.f32 %v10332_v34, %v6205_v50 }
 0xbd6   :  { %6243 = vst.msk [vmem:[%s10612_s6 + $0x28] sm:$0xff] %vm122_vm0, %v6206_v51  ;;  %s7564_s6 = smov [#allocation12]  }
 0xbd7   :  { %s6666_s14 = sshll.u32 %s7564_s6, 4  ;;  %s6667_s14 = int_to_ptr.vmem [resolvable:$true] %s6666_s14 }
 0xbdf   :  { %v6420_v2 = vpop.xlane.xlu0 %6419 }
 0xbe0   :  { %7380 = vrcp.f32 %v6420_v2  ;;  %v6453_v15 = vand.u32 2147483648, %v6420_v2  ;;  %v6451_v52 = vand.u32 2147483647, %v6420_v2  ;;  %vm6447_vm14 = vweird.f32 %v6420_v2 }
 0xbe2   :  { %v6454_v34 = vor.u32 1.1754944e-38, %v6453_v15  ;;  %vm6452_vm13 = vcmp.eq.f32.partialorder %v6451_v52, 8.507059e+37 }
 0xbe6   :  { %v7381_v26 = vpop.eup %7380 }
 0xbe7   :  { %v6443_v37 = vmul.f32 %v7381_v26, %v6420_v2  ;;  %v6426_v18 = vpop.xlane.xlu0 %6425  ;;  %vm6448_vm11 = vweird.f32 %v7381_v26 }
 0xbe8   :  { %7382 = vrcp.f32 %v6426_v18  ;;  %vm6449_vm15 = vmor %vm6447_vm14, %vm6448_vm11  ;;  %v6483_v62 = vand.u32 2147483648, %v6426_v18  ;;  %v6481_v5 = vand.u32 2147483647, %v6426_v18  ;;  %vm6477_vm2 = vweird.f32 %v6426_v18 }
 0xbe9   :  { %v6444_v57 = vsub.f32 1.0, %v6443_v37 }
 0xbea   :  { %v6484_v31 = vor.u32 1.1754944e-38, %v6483_v62  ;;  %vm6482_vm10 = vcmp.eq.f32.partialorder %v6481_v5, 8.507059e+37 }
 0xbeb   :  { %v6445_v49 = vmul.f32 %v7381_v26, %v6444_v57 }
 0xbed   :  { %v6446_v43 = vadd.f32 %v7381_v26, %v6445_v49 }
 0xbee   :  { %v7383_v8 = vpop.eup %7382 }
 0xbef   :  { %v6450_v1 = vsel %vm6449_vm15, %v7381_v26, %v6446_v43  ;;  %v6473_v56 = vmul.f32 %v7383_v8, %v6426_v18  ;;  %vm6478_vm0 = vweird.f32 %v7383_v8 }
 0xbf0   :  { %v6455_v45 = vsel %vm6452_vm13, %v6454_v34, %v6450_v1  ;;  %vm6479_vm9 = vmor %vm6477_vm2, %vm6478_vm0 }
 0xbf1   :  { %v6474_v30 = vsub.f32 1.0, %v6473_v56  ;;  %v6456_v9 = vmul.f32 %v10443_v16, %v6455_v45 }
 0xbf3   :  { %v6475_v20 = vmul.f32 %v7383_v8, %v6474_v30  ;;  %v6562_v12 = vmul.f32 %v6456_v9, %v10391_v21 }
 0xbf5   :  { %v6476_v42 = vadd.f32 %v7383_v8, %v6475_v20  ;;  %vm6570_vm12 = vcmp.ne.f32.partialorder %v6562_v12, %v6562_v12 }
 0xbf6   :  { %v6578_v46 = vsel %vm6570_vm12, 0.0, %v6562_v12 }
 0xbf7   :  { %v6480_v33 = vsel %vm6479_vm9, %v7383_v8, %v6476_v42  ;;  %v6586_v4 = vsel %vm6369_vm1, %v6578_v46, 0.0 }
 0xbf8   :  { %v6485_v24 = vsel %vm6482_vm10, %v6484_v31, %v6480_v33  ;;  %v6423_v55 = vpop.xlane.xlu1 %6422  ;;  %v6587_v6 = vrot.slane %v6586_v4, 4 }
 0xbf9   :  { %7384 = vrcp.f32 %v6423_v55  ;;  %v6486_v44 = vmul.f32 %v10447_v28, %v6485_v24  ;;  %v6466_v63 = vand.u32 2147483647, %v6423_v55  ;;  %v6468_v19 = vand.u32 2147483648, %v6423_v55 }
 0xbfa   :  { %vm6462_vm15 = vweird.f32 %v6423_v55  ;;  %v10514_v48 = vadd.f32 %v6587_v6, %v6586_v4 }
 0xbfb   :  { %v6564_v16 = vmul.f32 %v6486_v44, %v10391_v21  ;;  %vm6467_vm0 = vcmp.eq.f32.partialorder %v6466_v63, 8.507059e+37  ;;  %v6469_v23 = vor.u32 1.1754944e-38, %v6468_v19 }
 0xbfd   :  { %vm6572_vm11 = vcmp.ne.f32.partialorder %v6564_v16, %v6564_v16 }
 0xbfe   :  { %v6580_v22 = vsel %vm6572_vm11, 0.0, %v6564_v16 }
 0xbff   :  { %v7385_v35 = vpop.eup %7384  ;;  %v10517_v32 = vsel %vm6369_vm1, %v6580_v22, 0.0 }
 0xc00   :  { %v6458_v38 = vmul.f32 %v7385_v35, %v6423_v55  ;;  %v6429_v13 = vpop.xlane.xlu1 %6428  ;;  %v6432_v60 = vpop.xlane.xlu0 %6431  ;;  %vm6463_vm14 = vweird.f32 %v7385_v35  ;;  %v6601_v2 = vrot.slane %v10517_v32, 4 }
 0xc01   :  { %7386 = vrcp.f32 %v6429_v13  ;;  %vm6464_vm13 = vmor %vm6462_vm15, %vm6463_vm14  ;;  %v6496_v25 = vand.u32 2147483647, %v6429_v13  ;;  %v6498_v39 = vand.u32 2147483648, %v6429_v13  ;;  %v6511_v50 = vand.u32 2147483647, %v6432_v60 }
 0xc02   :  { %v6459_v7 = vsub.f32 1.0, %v6458_v38  ;;  %7388 = vrcp.f32 %v6432_v60  ;;  %v6513_v51 = vand.u32 2147483648, %v6432_v60  ;;  %vm6492_vm2 = vweird.f32 %v6429_v13 }
 0xc03   :  { %vm10528_vm10 = vcmp.eq.f32.partialorder %v6496_v25, 8.507059e+37  ;;  %v6499_v15 = vor.u32 1.1754944e-38, %v6498_v39  ;;  %vm6507_vm12 = vweird.f32 %v6432_v60  ;;  %vm10532_vm15 = vcmp.eq.f32.partialorder %v6511_v50, 8.507059e+37 }
 0xc04   :  { %v6460_v54 = vmul.f32 %v7385_v35, %v6459_v7  ;;  %v6514_v43 = vor.u32 1.1754944e-38, %v6513_v51  ;;  %v6589_v50 = vrot.slane %v10514_v48, 2  ;;  %v6602_v51 = vadd.f32 %v6601_v2, %v10517_v32 }
 0xc06   :  { %v6461_v28 = vadd.f32 %v7385_v35, %v6460_v54  ;;  %v6590_v2 = vadd.f32 %v6589_v50, %v10514_v48 }
 0xc07   :  { %v7387_v10 = vpop.eup %7386 }
 0xc08   :  { %v7389_v53 = vpop.eup %7388  ;;  %v6465_v14 = vsel %vm6464_vm13, %v7385_v35, %v6461_v28  ;;  %v6488_v36 = vmul.f32 %v7387_v10, %v6429_v13  ;;  %v10519_v11 = vpop.xlane.xlu1 %6434  ;;  %vm6493_vm9 = vweird.f32 %v7387_v10 }
 0xc09   :  { %v10521_v47 = vpop.xlane.xlu0 %6437  ;;  %v6470_v40 = vsel %vm6467_vm0, %v6469_v23, %v6465_v14  ;;  %v6503_v59 = vmul.f32 %v7389_v53, %v6432_v60  ;;  %7390 = vrcp.f32 %v10519_v11  ;;  %vm6508_vm11 = vweird.f32 %v7389_v53  ;;  %vm6494_vm13 = vmor %vm6492_vm2, %vm6493_vm9 }
 0xc0a   :  { %v6471_v61 = vmul.f32 %v10452_v58, %v6470_v40  ;;  %v6489_v29 = vsub.f32 1.0, %v6488_v36  ;;  %7392 = vrcp.f32 %v10521_v47  ;;  %vm6522_vm0 = vweird.f32 %v10519_v11  ;;  %vm6509_vm8 = vmor %vm6507_vm12, %vm6508_vm11 }
 0xc0b   :  { %v6504_v26 = vsub.f32 1.0, %v6503_v59  ;;  %v6526_v56 = vand.u32 2147483647, %v10519_v11  ;;  %v6528_v62 = vand.u32 2147483648, %v10519_v11  ;;  %vm6537_vm2 = vweird.f32 %v10521_v47 }
 0xc0c   :  { %v6563_v37 = vmul.f32 %v6471_v61, %v10391_v21  ;;  %v6490_v18 = vmul.f32 %v7387_v10, %v6489_v29  ;;  %v6541_v16 = vand.u32 2147483647, %v10521_v47  ;;  %v6543_v35 = vand.u32 2147483648, %v10521_v47 }
 0xc0d   :  { %v6505_v49 = vmul.f32 %v7389_v53, %v6504_v26  ;;  %vm10557_vm9 = vcmp.eq.f32.partialorder %v6526_v56, 8.507059e+37  ;;  %v6529_v6 = vor.u32 1.1754944e-38, %v6528_v62 }
 0xc0e   :  { %vm6571_vm14 = vcmp.ne.f32.partialorder %v6563_v37, %v6563_v37  ;;  %v6491_v58 = vadd.f32 %v7387_v10, %v6490_v18  ;;  %v6544_v28 = vor.u32 1.1754944e-38, %v6543_v35 }
 0xc0f   :  { %v7391_v8 = vpop.eup %7390  ;;  %v6579_v34 = vsel %vm6571_vm14, 0.0, %v6563_v37  ;;  %v6506_v1 = vadd.f32 %v7389_v53, %v6505_v49 }
 0xc10   :  { %v6593_v45 = vsel %vm6369_vm1, %v6579_v34, 0.0  ;;  %v6495_v30 = vsel %vm6494_vm13, %v7387_v10, %v6491_v58  ;;  %v6518_v9 = vmul.f32 %v7391_v8, %v10519_v11  ;;  %v10542_v20 = vpop.xlane.xlu1 %6440  ;;  %v7393_v5 = vpop.eup %7392 }
 0xc11   :  { %v6594_v42 = vrot.slane %v6593_v45, 4  ;;  %v6500_v12 = vsel %vm10528_vm10, %v6499_v15, %v6495_v30  ;;  %v6510_v31 = vsel %vm6509_vm8, %v7389_v53, %v6506_v1  ;;  %7394 = vrcp.f32 %v10542_v20 }
 0xc12   :  { %v6501_v33 = vmul.f32 %v10457_v3, %v6500_v12  ;;  %v6515_v24 = vsel %vm10532_vm15, %v6514_v43, %v6510_v31  ;;  %v6519_v55 = vsub.f32 1.0, %v6518_v9  ;;  %v6533_v44 = vmul.f32 %v7393_v5, %v10521_v47 }
 0xc13   :  { %v6516_v46 = vmul.f32 %v10460_v17, %v6515_v24  ;;  %vm6523_vm8 = vweird.f32 %v7391_v8  ;;  %v6595_v3 = vadd.f32 %v6594_v42, %v6593_v45  ;;  %vm6538_vm12 = vweird.f32 %v7393_v5 }
 0xc14   :  { %v6565_v4 = vmul.f32 %v6501_v33, %v10391_v21  ;;  %v6520_v38 = vmul.f32 %v7391_v8, %v6519_v55  ;;  %v6534_v13 = vsub.f32 1.0, %v6533_v44  ;;  %vm6524_vm14 = vmor %vm6522_vm0, %vm6523_vm8  ;;  %vm10563_vm15 = vcmp.eq.f32.partialorder %v6541_v16, 8.507059e+37 }
 0xc15   :  { %v6566_v60 = vmul.f32 %v6516_v46, %v10391_v21  ;;  %v6596_v36 = vrot.slane %v6595_v3, 2  ;;  %vm6539_vm13 = vmor %vm6537_vm2, %vm6538_vm12  ;;  %v6558_v49 = vand.u32 2147483648, %v10542_v20  ;;  %v6603_v43 = vrot.slane %v6602_v51, 2 }
 0xc16   :  { %vm6573_vm10 = vcmp.ne.f32.partialorder %v6565_v4, %v6565_v4  ;;  %v6521_v17 = vadd.f32 %v7391_v8, %v6520_v38  ;;  %v6535_v63 = vmul.f32 %v7393_v5, %v6534_v13  ;;  %v6591_v44 = vrot.slane %v6590_v2, 1 }
 0xc17   :  { %v7395_v19 = vpop.eup %7394  ;;  %v6581_v54 = vsel %vm6573_vm10, 0.0, %v6565_v4  ;;  %vm6574_vm11 = vcmp.ne.f32.partialorder %v6566_v60, %v6566_v60  ;;  %v6597_v15 = vadd.f32 %v6596_v36, %v6595_v3  ;;  %v6559_v30 = vor.u32 1.1754944e-38, %v6558_v49 }
 0xc18   :  { %v6607_v10 = vsel %vm6369_vm1, %v6581_v54, 0.0  ;;  %v6582_v23 = vsel %vm6574_vm11, 0.0, %v6566_v60  ;;  %v6525_v53 = vsel %vm6524_vm14, %v7391_v8, %v6521_v17  ;;  %v6536_v14 = vadd.f32 %v7393_v5, %v6535_v63 }
 0xc19   :  { %v6608_v25 = vrot.slane %v6607_v10, 4  ;;  %v6614_v40 = vsel %vm6369_vm1, %v6582_v23, 0.0  ;;  %v6530_v39 = vsel %vm10557_vm9, %v6529_v6, %v6525_v53  ;;  %v6548_v29 = vmul.f32 %v7395_v19, %v10542_v20 }
 0xc1a   :  { %v6615_v11 = vrot.slane %v6614_v40, 4  ;;  %v6531_v59 = vmul.f32 %v10467_v27, %v6530_v39  ;;  %v6540_v61 = vsel %vm6539_vm13, %v7393_v5, %v6536_v14  ;;  %vm6553_vm0 = vweird.f32 %v7395_v19 }
 0xc1b   :  { %v6609_v26 = vadd.f32 %v6608_v25, %v6607_v10  ;;  %v6545_v37 = vsel %vm10563_vm15, %v6544_v28, %v6540_v61  ;;  %v6549_v57 = vsub.f32 1.0, %v6548_v29  ;;  %v6556_v27 = vand.u32 2147483647, %v10542_v20 }
 0xc1c   :  { %v6567_v18 = vmul.f32 %v6531_v59, %v10391_v21  ;;  %v6546_v47 = vmul.f32 %v10469_v41, %v6545_v37  ;;  %v6616_v58 = vadd.f32 %v6615_v11, %v6614_v40  ;;  %vm6552_vm9 = vweird.f32 %v10542_v20 }
 0xc1d   :  { %v6550_v32 = vmul.f32 %v7395_v19, %v6549_v57  ;;  %v6610_v8 = vrot.slane %v6609_v26, 2  ;;  %vm6554_vm10 = vmor %vm6552_vm9, %vm6553_vm0  ;;  %vm6557_vm12 = vcmp.eq.f32.partialorder %v6556_v27, 8.507059e+37  ;;  %v6598_v9 = vrot.slane %v6597_v15, 1 }
 0xc1e   :  { %vm6575_vm2 = vcmp.ne.f32.partialorder %v6567_v18, %v6567_v18  ;;  %v6568_v52 = vmul.f32 %v6546_v47, %v10391_v21  ;;  %v6617_v62 = vrot.slane %v6616_v58, 2  ;;  %v6604_v24 = vadd.f32 %v6603_v43, %v6602_v51 }
 0xc1f   :  { %v6583_v34 = vsel %vm6575_vm2, 0.0, %v6567_v18  ;;  %v6551_v41 = vadd.f32 %v7395_v19, %v6550_v32  ;;  %v6611_v42 = vadd.f32 %v6610_v8, %v6609_v26  ;;  %v6599_v4 = vadd.f32 %v6598_v9, %v6597_v15 }
 0xc20   :  { %v6621_v1 = vsel %vm6369_vm1, %v6583_v34, 0.0  ;;  %vm6576_vm8 = vcmp.ne.f32.partialorder %v6568_v52, %v6568_v52  ;;  %v6618_v35 = vadd.f32 %v6617_v62, %v6616_v58  ;;  %v6605_v60 = vrot.slane %v6604_v24, 1 }
 0xc21   :  { %v6622_v56 = vrot.slane %v6621_v1, 4  ;;  %v6584_v45 = vsel %vm6576_vm8, 0.0, %v6568_v52  ;;  %v6555_v48 = vsel %vm6554_vm10, %v7395_v19, %v6551_v41  ;;  %v6612_v38 = vrot.slane %v6611_v42, 1 }
 0xc22   :  { %v6628_v5 = vsel %vm6369_vm1, %v6584_v45, 0.0  ;;  %v6560_v33 = vsel %vm6557_vm12, %v6559_v30, %v6555_v48  ;;  %v6592_v7 = vadd.f32 %v6591_v44, %v6590_v2  ;;  %v6619_v63 = vrot.slane %v6618_v35, 1 }
 0xc23   :  { %v6623_v12 = vadd.f32 %v6622_v56, %v6621_v1  ;;  %v6629_v31 = vrot.slane %v6628_v5, 4  ;;  %v6561_v55 = vmul.f32 %v10475_v0, %v6560_v33  ;;  %v6613_v0 = vadd.f32 %v6612_v38, %v6611_v42 }
 0xc24   :  { %vm11053_vm14 = vcmask 1041409   ;;  %v6606_v10 = vadd.f32 %v6605_v60, %v6604_v24  ;;  %v6620_v23 = vadd.f32 %v6619_v63, %v6618_v35 }
 0xc25   :  { %v6630_v20 = vadd.f32 %v6629_v31, %v6628_v5  ;;  %v6624_v46 = vrot.slane %v6623_v12, 2  ;;  %v6569_v16 = vmul.f32 %v6561_v55, %v10391_v21  ;;  %v6650_v28 = vsel %vm11053_vm14, %v6599_v4, %v6592_v7 }
 0xc26   :  { %v6651_v14 = vsel %vm6272_vm3, %v6606_v10, %v6650_v28  ;;  %vm11054_vm3 = vcmask 1047559  }
 0xc27   :  { %v6625_v13 = vadd.f32 %v6624_v46, %v6623_v12  ;;  %v6631_v3 = vrot.slane %v6630_v20, 2  ;;  %vm6577_vm11 = vcmp.ne.f32.partialorder %v6569_v16, %v6569_v16  ;;  %v6652_v40 = vsel %vm6274_vm4, %v6613_v0, %v6651_v14 }
 0xc28   :  { %v6585_v6 = vsel %vm6577_vm11, 0.0, %v6569_v16  ;;  %v6653_v59 = vsel %vm6276_vm5, %v6620_v23, %v6652_v40 }
 0xc29   :  { %v6635_v17 = vsel %vm6369_vm1, %v6585_v6, 0.0  ;;  %v6632_v19 = vadd.f32 %v6631_v3, %v6630_v20  ;;  %v6626_v22 = vrot.slane %v6625_v13, 1 }
 0xc2a   :  { %v6636_v54 = vrot.slane %v6635_v17, 4 }
 0xc2b   :  { %v6633_v53 = vrot.slane %v6632_v19, 1  ;;  %v6627_v36 = vadd.f32 %v6626_v22, %v6625_v13 }
 0xc2c   :  { %v6637_v21 = vadd.f32 %v6636_v54, %v6635_v17 }
 0xc2d   :  { %v6634_v11 = vadd.f32 %v6633_v53, %v6632_v19  ;;  %v6654_v29 = vsel %vm6278_vm6, %v6627_v36, %v6653_v59 }
 0xc2e   :  { %v6638_v25 = vrot.slane %v6637_v21, 2 }
 0xc2f   :  { %v6655_v51 = vsel %vm6280_vm7, %v6634_v11, %v6654_v29 }
 0xc30   :  { %v6639_v39 = vadd.f32 %v6638_v25, %v6637_v21 }
 0xc32   :  { %v6640_v61 = vrot.slane %v6639_v39, 1 }
 0xc34   :  { %v6641_v50 = vadd.f32 %v6640_v61, %v6639_v39 }
 0xc36   :  { %v6656_v26 = vsel %vm11054_vm3, %v6641_v50, %v6655_v51 }
 0xc37   :  { %6658 = vst.msk [vmem:[#allocation12] sm:$0xff] %vm6369_vm1, %v6656_v26 }
 0xc38   :  { %6671 = dma.vmem_to_hbm [thread:$0]  %s6667_s14, 128, %s6669_s1, [#allocation5]  }
 0xc39   :  { %7546 = dma.done.wait [#allocation5], 128  }
 0xc3a   :  { %7547 = vsyncadd [#allocation5], 4294967168 }
 0xc3b   :  { %6678 = vsyncpa [#allocation4], 1 }
 0xc3c   :  { %6679 = vsyncpa [#allocation7], 1 }
 0xc3d   :  { %6680 = vsyncpa [#allocation10], 1 }
 0xc3e   :  { %6681 = vsyncpa [#allocation5], 1 }

</bundles_post_ra>
